<compile_context>
chip_gen: v6e
topology: v6e:2x2x1
jax: 0.10.0
libtpu: 0.0.40
codegen_flags: <defaults>
</compile_context>

<pallas_src>
import functools
import math

import jax
import jax.numpy as jnp
import numpy as np
from jax import lax
from jax.experimental import pallas as pl
from jax.experimental.pallas import tpu as pltpu

HIGHWAY_BIAS = -2.0
SCALE_X = (1.0 + math.exp(HIGHWAY_BIAS) * 2.0) ** 0.5   # SRU rescale=True constant
LN_EPS = 1e-5                                           # nn.LayerNorm default
RMS_EPS = 1e-6                                          # RMSNorm eps


def _layernorm(v, w, b, eps=LN_EPS):
    # One-pass form: E[x] and E[x^2] are independent reductions (shorter XLU critical path).
    m = jnp.mean(v, axis=-1, keepdims=True)
    ms = jnp.mean(v * v, axis=-1, keepdims=True)
    var = jnp.maximum(ms - m * m, 0.0)
    return (v - m) * lax.rsqrt(var + eps) * w + b


def causal_rcn_block_kernel(
    # inputs
    x_ref,                                   # (1, L*Bb, H) time-major block, UNPADDED
    conv_w_ref,                              # (K, H, H)  [k, in, out]
    pv_ref,                                  # (12, H)  packed per-feature vectors (row order below)
    pv2_ref,                                 # (2, 2H)  [ln2_w ; ln2_b]
    w_u0_ref, w_u1_ref, w_u2_ref,            # (H, H)   SRU projection, pre-split in wrapper
    w1_ref,                                  # (H, 2H)
    w2_ref,                                  # (2H, H)
    # output
    out_ref,                                 # (1, L*Bb, H)
    # scratch (all (L*Bb, H) f32)
    conv_ref, u0_ref, u1_ref, u2_ref, c_ref,
    *, block_b, mm_dtype,
):
    _, M, H = out_ref.shape
    K = conv_w_ref.shape[0]
    L = M // block_b

    def mm(a, b):
        # TODO(synk): enable mm_dtype=bf16 (and bf16 gate scratch) for production H >= 128 on v6e/v7x.
        if mm_dtype is not None:
            a = a.astype(mm_dtype)
            b = b.astype(mm_dtype)
        return jnp.dot(a, b, preferred_element_type=jnp.float32)

    # ---- packed per-feature parameter vectors: one small load, static row slices ------------
    pv = pv_ref[...]
    conv_b, ln_sru_w, ln_sru_b = pv[0:1], pv[1:2], pv[2:3]
    vf, vr, bf, br = pv[3:4], pv[4:5], pv[5:6], pv[6:7]
    lam, rms_w = pv[7:8], pv[8:9]
    ln1_w, ln1_b, b2 = pv[9:10], pv[10:11], pv[11:12]
    pv2 = pv2_ref[...]
    ln2_w, ln2_b = pv2[0:1], pv2[1:2]

    x_b = x_ref.at[0]                        # (M, H) ref view, rows ordered t*Bb + b

    # ---- causal Conv1d with the zero-padding folded into the row ranges ---------------------
    # Output row r = t*Bb + b takes tap k from input row r - (K-1-k)*Bb; rows that would read
    # the (implicit) left zero-pad simply receive no contribution -> no padded copy of x at all.
    conv_ref[...] = mm(x_b[...], conv_w_ref[K - 1]) + conv_b          # "current" tap: all rows
    for k in range(K - 1):                   # static unroll (K small)
        off = (K - 1 - k) * block_b          # sublane-aligned (block_b % 8 == 0)
        rows = M - off
        if rows <= 0:
            continue
        contrib = mm(x_b[pl.ds(0, rows), :], conv_w_ref[k])
        conv_ref[pl.ds(off, rows), :] = conv_ref[pl.ds(off, rows), :] + contrib

    # ---- SRU pre-projection, fully vectorized over all L*Bb rows ----------------------------
    conv = conv_ref[...]
    xn = _layernorm(conv, ln_sru_w, ln_sru_b)
    # TODO(synk): for production H >= 128, fuse these three into a single (H, 3H) matmul
    # (column slices then land on 128-lane boundaries); split kept here for H = 32.
    u0_ref[...] = mm(xn, w_u0_ref[...])
    u1_ref[...] = mm(xn, w_u1_ref[...]) + bf      # forget-gate bias pre-folded
    u2_ref[...] = mm(xn, w_u2_ref[...]) + br      # reset-gate bias pre-folded

    # ---- minimal sequential scan: only the true c recurrence (f_t, c_t) ---------------------
    vf_b = jnp.broadcast_to(vf, (block_b, H))     # hoist broadcast out of the loop

    def step(t, c_prev):
        r0 = pl.multiple_of(t * block_b, block_b)
        u1_t = u1_ref[pl.ds(r0, block_b), :]      # (Bb, H), contiguous & sublane-aligned
        u0_t = u0_ref[pl.ds(r0, block_b), :]
        f = jax.nn.sigmoid(u1_t + c_prev * vf_b)
        c = u0_t + (c_prev - u0_t) * f
        c_ref[pl.ds(r0, block_b), :] = c          # r / tanh / h done vectorized below
        return c

    lax.fori_loop(0, L, step, jnp.zeros((block_b, H), jnp.float32),
                  unroll=min(8, L))

    # ---- vectorized epilogue over the whole (L*Bb, H) block ---------------------------------
    c_all = c_ref[...]
    conv = conv_ref[...]
    xn = _layernorm(conv, ln_sru_w, ln_sru_b)     # recompute instead of an extra xp scratch
    xp = xn * SCALE_X                             # SRU rescale=True skip term
    r = jax.nn.sigmoid(u2_ref[...] + c_all * vr)
    h = (jnp.tanh(c_all) - xp) * r + xp

    # ---- lambda mix + RMSNorm, then gate the block input ------------------------------------
    mixed = lam * conv + (1.0 - lam) * h
    rvar = jnp.mean(mixed * mixed, axis=-1, keepdims=True)
    normed = mixed * lax.rsqrt(rvar + RMS_EPS) * rms_w
    stage1 = normed * x_b[...]                    # memory_mixer(x) * x

    # ---- CausalRCNTokenMixer (LN -> relu -> linear1 -> LN -> relu -> linear2) + residual ----
    a1 = jnp.maximum(_layernorm(stage1, ln1_w, ln1_b), 0.0)
    t1 = mm(a1, w1_ref[...])
    a2 = jnp.maximum(_layernorm(t1, ln2_w, ln2_b), 0.0)
    t2 = mm(a2, w2_ref[...]) + b2

    # TODO(synk): for production, keep H >= 128 (or fold to a lane-dense (M*H/128, 128) slab)
    # so this store is an unmasked vst; left row-major for the small H=32 test shape.
    out_ref[0] = (t2 + stage1).astype(out_ref.dtype)


def _plan_blocks(B, L, device_kind=""):
    """Pick (padded batch, batch block Bb).

    Bb is a multiple of 8 so every per-timestep (Bb, H) slice is sublane-aligned. On single-TC
    chips (v5e/v6e) grow Bb until M = L*Bb >= 128 (MXU-row fill, fewer grid steps); on v7x
    (2 TensorCores) keep at least 2 grid steps when possible so both cores get work.
    """
    b_pad = ((B + 7) // 8) * 8
    cands = [bb for bb in range(8, b_pad + 1, 8) if b_pad % bb == 0]
    good = [bb for bb in cands if L * bb >= 128]
    bb = min(good) if good else max(cands)
    if "v7" in device_kind.lower():
        while b_pad // bb < 2 and bb > 8 and bb % 16 == 0 and b_pad % (bb // 2) == 0:
            bb //= 2
    return b_pad, bb


def causal_rcn_block(x, params, *, block_b=None, mm_dtype=None):
    B, L, H = x.shape
    K = params["conv_w"].shape[0]

    try:
        device_kind = jax.devices()[0].device_kind
    except Exception:
        device_kind = ""

    if block_b is None:
        b_pad, Bb = _plan_blocks(B, L, device_kind)
    else:
        Bb = int(block_b)
        b_pad = ((B + Bb - 1) // Bb) * Bb

    if b_pad != B:                               # pad batch with zeros; sliced away afterwards
        x = jnp.concatenate([x, jnp.zeros((b_pad - B, L, H), x.dtype)], axis=0)

    nB = b_pad // Bb
    M = L * Bb
    # TODO(synk): for very long L, tile the time axis on an 'arbitrary' grid dim (carry c) so
    # the five (M, H) scratch buffers stay within v7x's 64 MiB VMEM.

    # Layout plumbing only: group Bb batch rows, go time-major (rows ordered t*Bb + b).
    # Causal zero-padding is handled inside the kernel -> no pad/concat HBM copies here.
    x_tm = x.reshape(nB, Bb, L, H).transpose(0, 2, 1, 3).reshape(nB, M, H)

    f32 = jnp.float32
    # Split the SRU projection outside the kernel (free) -> no sub-128-lane column slices inside.
    w_u0 = params["w_sru"][:, :H].astype(f32)
    w_u1 = params["w_sru"][:, H:2 * H].astype(f32)
    w_u2 = params["w_sru"][:, 2 * H:].astype(f32)
    # Pack the small per-feature vectors into one (12, H) block -> a single contiguous DMA.
    pvecs = jnp.stack(
        [params["conv_b"], params["ln_sru_w"], params["ln_sru_b"],
         params["v_sru"][:H], params["v_sru"][H:],          # vf, vr
         params["b_sru"][:H], params["b_sru"][H:],          # bf, br
         params["lambda_w"], params["rms_w"],
         params["ln1_w"], params["ln1_b"], params["b2"]], axis=0).astype(f32)
    pvecs2 = jnp.stack([params["ln2_w"], params["ln2_b"]], axis=0).astype(f32)

    ordered = [params["conv_w"].astype(f32), pvecs, pvecs2,
               w_u0, w_u1, w_u2,
               params["w1"].astype(f32), params["w2"].astype(f32)]

    def _const(a):
        nd = a.ndim
        return pl.BlockSpec(a.shape, lambda i, _n=nd: (0,) * _n)

    in_specs = [pl.BlockSpec((1, M, H), lambda i: (i, 0, 0))]
    in_specs += [_const(a) for a in ordered]

    # Explicit VMEM budget: in/out blocks (double-buffered), 5 f32 scratch blocks, params.
    blk = M * H * 4
    const_bytes = int(sum(int(np.prod(a.shape)) for a in ordered)) * 4
    est = 2 * blk + 2 * blk + 5 * blk + 2 * const_bytes
    vmem_limit = int(min(max(2 * est, 8 << 20), 48 << 20))   # safe on v7x (64 MiB physical)

    kernel = functools.partial(causal_rcn_block_kernel, block_b=Bb, mm_dtype=mm_dtype)

    out_tm = pl.pallas_call(
        kernel,
        out_shape=jax.ShapeDtypeStruct((nB, M, H), x.dtype),
        grid_spec=pltpu.PrefetchScalarGridSpec(
            num_scalar_prefetch=0,
            grid=(nB,),
            in_specs=in_specs,
            out_specs=pl.BlockSpec((1, M, H), lambda i: (i, 0, 0)),
            scratch_shapes=[pltpu.VMEM((M, H), jnp.float32) for _ in range(5)],
        ),
        compiler_params=pltpu.CompilerParams(
            dimension_semantics=("parallel",),
            vmem_limit_bytes=vmem_limit),
    )(x_tm, *ordered)

    # back to (B, L, H)
    out = out_tm.reshape(nB, L, Bb, H).transpose(0, 2, 1, 3).reshape(b_pad, L, H)
    return out[:B]


def ref_forward(x, p):
    """Pure-JAX reference with identical math (for validation)."""
    B, L, H = x.shape
    K = p["conv_w"].shape[0]

    def ln(v, w, b, eps=LN_EPS):
        m = v.mean(-1, keepdims=True)
        var = ((v - m) ** 2).mean(-1, keepdims=True)
        return (v - m) / jnp.sqrt(var + eps) * w + b

    def per_batch(xb):
        xpad = jnp.concatenate([jnp.zeros((K - 1, H), xb.dtype), xb], axis=0)
        conv = jnp.zeros((L, H), jnp.float32)
        for k in range(K):
            conv = conv + xpad[k:k + L] @ p["conv_w"][k]
        conv = conv + p["conv_b"]
        xn = ln(conv, p["ln_sru_w"], p["ln_sru_b"])
        U = xn @ p["w_sru"]
        xp = xn * SCALE_X
        vf, vr = p["v_sru"][:H], p["v_sru"][H:]
        bf, br = p["b_sru"][:H], p["b_sru"][H:]

        def step(c_prev, inp):
            u, xpt = inp
            u0, u1, u2 = u[:H], u[H:2 * H], u[2 * H:]
            f = jax.nn.sigmoid(u1 + c_prev * vf + bf)
            c = u0 + (c_prev - u0) * f
            r = jax.nn.sigmoid(u2 + c * vr + br)
            h = (jnp.tanh(c) - xpt) * r + xpt
            return c, h

        _, hs = lax.scan(step, jnp.zeros((H,), jnp.float32), (U, xp))
        lam = p["lambda_w"]
        mixed = lam * conv + (1 - lam) * hs
        normed = mixed * lax.rsqrt((mixed ** 2).mean(-1, keepdims=True) + RMS_EPS) * p["rms_w"]
        s1 = normed * xb
        a1 = jnp.maximum(ln(s1, p["ln1_w"], p["ln1_b"]), 0.0)
        t1 = a1 @ p["w1"]
        a2 = jnp.maximum(ln(t1, p["ln2_w"], p["ln2_b"]), 0.0)
        t2 = a2 @ p["w2"] + p["b2"]
        return t2 + s1

    return jax.vmap(per_batch)(x)


if __name__ == "__main__":
    B, L, H, K = 16, 8, 32, 3          # batch, seq, hidden_dim, window_size (small test shapes)
    key = jax.random.PRNGKey(0)
    keys = jax.random.split(key, 8)

    params = {
        # Causal_RCNN
        "conv_w": jax.random.normal(keys[0], (K, H, H), jnp.float32) * 0.15,   # [k, in, out]
        "conv_b": jax.random.normal(keys[1], (H,), jnp.float32) * 0.1,
        "ln_sru_w": jnp.ones((H,), jnp.float32),
        "ln_sru_b": jnp.zeros((H,), jnp.float32),
        "w_sru": jax.random.normal(keys[2], (H, 3 * H), jnp.float32) * (1.0 / math.sqrt(H)),
        "v_sru": jax.random.normal(keys[3], (2 * H,), jnp.float32) * 0.1,      # weight_c [vf|vr]
        "b_sru": jnp.concatenate([jnp.zeros((H,), jnp.float32),
                                  jnp.full((H,), HIGHWAY_BIAS, jnp.float32)]),
        "lambda_w": jax.random.normal(keys[4], (H,), jnp.float32) * 0.5,
        "rms_w": jnp.ones((H,), jnp.float32),
        # CausalRCNTokenMixer (internal_dim = 2H)
        "ln1_w": jnp.ones((H,), jnp.float32),
        "ln1_b": jnp.zeros((H,), jnp.float32),
        "w1": jax.random.normal(keys[5], (H, 2 * H), jnp.float32) * (1.0 / math.sqrt(H)),
        "ln2_w": jnp.ones((2 * H,), jnp.float32),
        "ln2_b": jnp.zeros((2 * H,), jnp.float32),
        "w2": jax.random.normal(keys[6], (2 * H, H), jnp.float32) * (1.0 / math.sqrt(2 * H)),
        "b2": jnp.zeros((H,), jnp.float32),
    }
    x = jax.random.normal(keys[7], (B, L, H), jnp.float32)

    out = jax.block_until_ready(causal_rcn_block(x, params))
    ref = ref_forward(x, params)

    assert out.shape == (B, L, H)
    np.testing.assert_allclose(np.asarray(out), np.asarray(ref), rtol=2e-2, atol=2e-2)
    print("KERNEL_OK")
</pallas_src>

<mosaic_0001>
module attributes {stable_mosaic.version = 11 : i64} {
  func.func @causal_rcn_block_kernel(%arg0: i32, %arg1: memref<1x128x32xf32, #tpu.memory_space<vmem>>, %arg2: memref<3x32x32xf32, #tpu.memory_space<vmem>>, %arg3: memref<12x32xf32, #tpu.memory_space<vmem>>, %arg4: memref<2x64xf32, #tpu.memory_space<vmem>>, %arg5: memref<32x32xf32, #tpu.memory_space<vmem>>, %arg6: memref<32x32xf32, #tpu.memory_space<vmem>>, %arg7: memref<32x32xf32, #tpu.memory_space<vmem>>, %arg8: memref<32x64xf32, #tpu.memory_space<vmem>>, %arg9: memref<64x32xf32, #tpu.memory_space<vmem>>, %arg10: memref<1x128x32xf32, #tpu.memory_space<vmem>>, %arg11: memref<128x32xf32, #tpu.memory_space<vmem>>, %arg12: memref<128x32xf32, #tpu.memory_space<vmem>>, %arg13: memref<128x32xf32, #tpu.memory_space<vmem>>, %arg14: memref<128x32xf32, #tpu.memory_space<vmem>>, %arg15: memref<128x32xf32, #tpu.memory_space<vmem>>) attributes {dimension_semantics = [#tpu.dimension_semantics<parallel>], iteration_bounds = array<i64: 1>, scalar_prefetch = 0 : i64, scratch_operands = 5 : i64, tpu.core_type = #tpu.core_type<tc>, window_params = [{transform_indices = @transform_0, window_bounds = array<i64: 1, 128, 32>}, {pipeline_mode = #tpu.pipeline_mode<synchronous>, transform_indices = @transform_1, window_bounds = array<i64: 3, 32, 32>}, {pipeline_mode = #tpu.pipeline_mode<synchronous>, transform_indices = @transform_2, window_bounds = array<i64: 12, 32>}, {pipeline_mode = #tpu.pipeline_mode<synchronous>, transform_indices = @transform_3, window_bounds = array<i64: 2, 64>}, {pipeline_mode = #tpu.pipeline_mode<synchronous>, transform_indices = @transform_4, window_bounds = array<i64: 32, 32>}, {pipeline_mode = #tpu.pipeline_mode<synchronous>, transform_indices = @transform_5, window_bounds = array<i64: 32, 32>}, {pipeline_mode = #tpu.pipeline_mode<synchronous>, transform_indices = @transform_6, window_bounds = array<i64: 32, 32>}, {pipeline_mode = #tpu.pipeline_mode<synchronous>, transform_indices = @transform_7, window_bounds = array<i64: 32, 64>}, {pipeline_mode = #tpu.pipeline_mode<synchronous>, transform_indices = @transform_8, window_bounds = array<i64: 64, 32>}, {transform_indices = @transform_9, window_bounds = array<i64: 1, 128, 32>}]} {
    %c0 = arith.constant 0 : index
    %c0_0 = arith.constant 0 : index
    %0 = vector.load %arg3[%c0, %c0_0] : memref<12x32xf32, #tpu.memory_space<vmem>>, vector<12x32xf32>
    %1 = vector.extract_strided_slice %0 {offsets = [0, 0], sizes = [1, 32], strides = [1, 1]} : vector<12x32xf32> to vector<1x32xf32>
    %2 = vector.extract_strided_slice %0 {offsets = [1, 0], sizes = [1, 32], strides = [1, 1]} : vector<12x32xf32> to vector<1x32xf32>
    %3 = vector.extract_strided_slice %0 {offsets = [2, 0], sizes = [1, 32], strides = [1, 1]} : vector<12x32xf32> to vector<1x32xf32>
    %4 = vector.extract_strided_slice %0 {offsets = [3, 0], sizes = [1, 32], strides = [1, 1]} : vector<12x32xf32> to vector<1x32xf32>
    %5 = vector.extract_strided_slice %0 {offsets = [4, 0], sizes = [1, 32], strides = [1, 1]} : vector<12x32xf32> to vector<1x32xf32>
    %6 = vector.extract_strided_slice %0 {offsets = [5, 0], sizes = [1, 32], strides = [1, 1]} : vector<12x32xf32> to vector<1x32xf32>
    %7 = vector.extract_strided_slice %0 {offsets = [6, 0], sizes = [1, 32], strides = [1, 1]} : vector<12x32xf32> to vector<1x32xf32>
    %8 = vector.extract_strided_slice %0 {offsets = [7, 0], sizes = [1, 32], strides = [1, 1]} : vector<12x32xf32> to vector<1x32xf32>
    %9 = vector.extract_strided_slice %0 {offsets = [8, 0], sizes = [1, 32], strides = [1, 1]} : vector<12x32xf32> to vector<1x32xf32>
    %10 = vector.extract_strided_slice %0 {offsets = [9, 0], sizes = [1, 32], strides = [1, 1]} : vector<12x32xf32> to vector<1x32xf32>
    %11 = vector.extract_strided_slice %0 {offsets = [10, 0], sizes = [1, 32], strides = [1, 1]} : vector<12x32xf32> to vector<1x32xf32>
    %12 = vector.extract_strided_slice %0 {offsets = [11, 0], sizes = [1, 32], strides = [1, 1]} : vector<12x32xf32> to vector<1x32xf32>
    %c0_1 = arith.constant 0 : index
    %c0_2 = arith.constant 0 : index
    %13 = vector.load %arg4[%c0_1, %c0_2] : memref<2x64xf32, #tpu.memory_space<vmem>>, vector<2x64xf32>
    %14 = vector.extract_strided_slice %13 {offsets = [0, 0], sizes = [1, 64], strides = [1, 1]} : vector<2x64xf32> to vector<1x64xf32>
    %15 = vector.extract_strided_slice %13 {offsets = [1, 0], sizes = [1, 64], strides = [1, 1]} : vector<2x64xf32> to vector<1x64xf32>
    %c0_3 = arith.constant 0 : index
    %c0_4 = arith.constant 0 : index
    %c0_5 = arith.constant 0 : index
    %16 = vector.load %arg1[%c0_3, %c0_4, %c0_5] : memref<1x128x32xf32, #tpu.memory_space<vmem>>, vector<1x128x32xf32>
    %17 = vector.shape_cast %16 : vector<1x128x32xf32> to vector<128x32xf32>
    %c2 = arith.constant 2 : index
    %c0_6 = arith.constant 0 : index
    %c0_7 = arith.constant 0 : index
    %18 = vector.load %arg2[%c2, %c0_6, %c0_7] : memref<3x32x32xf32, #tpu.memory_space<vmem>>, vector<1x32x32xf32>
    %19 = vector.shape_cast %18 : vector<1x32x32xf32> to vector<32x32xf32>
    %cst = arith.constant dense<0.000000e+00> : vector<128x32xf32>
    %20 = tpu.matmul %17, %19, %cst {dimension_numbers = #tpu.dot_dimension_numbers<[1], [0], [0], [1], [0, 0, 1, 1], [], []>} : vector<128x32xf32>, vector<32x32xf32>, vector<128x32xf32> -> vector<128x32xf32>
    %21 = vector.broadcast %1 : vector<1x32xf32> to vector<128x32xf32>
    %22 = arith.addf %20, %21 : vector<128x32xf32>
    %c0_8 = arith.constant 0 : index
    %c0_9 = arith.constant 0 : index
    %23 = vector.load %arg11[%c0_8, %c0_9] : memref<128x32xf32, #tpu.memory_space<vmem>>, vector<128x32xf32>
    tpu.vector_store %arg11[%c0_8, %c0_9], %22 {strides = array<i32>} : memref<128x32xf32, #tpu.memory_space<vmem>>, vector<128x32xf32>,
    %c0_i32 = arith.constant 0 : i32
    %c0_i32_10 = arith.constant 0 : i32
    %c0_i32_11 = arith.constant 0 : i32
    %24 = tpu.memref_slice %arg1[%c0_i32, %c0_i32_10, %c0_i32_11] : memref<1x128x32xf32, #tpu.memory_space<vmem>> -> memref<1x128x32xf32, #tpu.memory_space<vmem>>
    %25 = tpu.memref_squeeze %24 : memref<1x128x32xf32, #tpu.memory_space<vmem>> -> memref<128x32xf32, #tpu.memory_space<vmem>>
    %c0_12 = arith.constant 0 : index
    %c0_13 = arith.constant 0 : index
    %26 = vector.load %25[%c0_12, %c0_13] : memref<128x32xf32, #tpu.memory_space<vmem>>, vector<96x32xf32>
    %c0_14 = arith.constant 0 : index
    %c0_15 = arith.constant 0 : index
    %c0_16 = arith.constant 0 : index
    %27 = vector.load %arg2[%c0_14, %c0_15, %c0_16] : memref<3x32x32xf32, #tpu.memory_space<vmem>>, vector<1x32x32xf32>
    %28 = vector.shape_cast %27 : vector<1x32x32xf32> to vector<32x32xf32>
    %cst_17 = arith.constant dense<0.000000e+00> : vector<96x32xf32>
    %29 = tpu.matmul %26, %28, %cst_17 {dimension_numbers = #tpu.dot_dimension_numbers<[1], [0], [0], [1], [0, 0, 1, 1], [], []>} : vector<96x32xf32>, vector<32x32xf32>, vector<96x32xf32> -> vector<96x32xf32>
    %c32 = arith.constant 32 : index
    %c0_18 = arith.constant 0 : index
    %30 = vector.load %arg11[%c32, %c0_18] : memref<128x32xf32, #tpu.memory_space<vmem>>, vector<96x32xf32>
    %31 = arith.addf %30, %29 : vector<96x32xf32>
    %c32_19 = arith.constant 32 : index
    %c0_20 = arith.constant 0 : index
    %32 = vector.load %arg11[%c32_19, %c0_20] : memref<128x32xf32, #tpu.memory_space<vmem>>, vector<96x32xf32>
    tpu.vector_store %arg11[%c32_19, %c0_20], %31 {strides = array<i32>} : memref<128x32xf32, #tpu.memory_space<vmem>>, vector<96x32xf32>,
    %c0_i32_21 = arith.constant 0 : i32
    %c0_i32_22 = arith.constant 0 : i32
    %c0_i32_23 = arith.constant 0 : i32
    %33 = tpu.memref_slice %arg1[%c0_i32_21, %c0_i32_22, %c0_i32_23] : memref<1x128x32xf32, #tpu.memory_space<vmem>> -> memref<1x128x32xf32, #tpu.memory_space<vmem>>
    %34 = tpu.memref_squeeze %33 : memref<1x128x32xf32, #tpu.memory_space<vmem>> -> memref<128x32xf32, #tpu.memory_space<vmem>>
    %c0_24 = arith.constant 0 : index
    %c0_25 = arith.constant 0 : index
    %35 = vector.load %34[%c0_24, %c0_25] : memref<128x32xf32, #tpu.memory_space<vmem>>, vector<112x32xf32>
    %c1 = arith.constant 1 : index
    %c0_26 = arith.constant 0 : index
    %c0_27 = arith.constant 0 : index
    %36 = vector.load %arg2[%c1, %c0_26, %c0_27] : memref<3x32x32xf32, #tpu.memory_space<vmem>>, vector<1x32x32xf32>
    %37 = vector.shape_cast %36 : vector<1x32x32xf32> to vector<32x32xf32>
    %cst_28 = arith.constant dense<0.000000e+00> : vector<112x32xf32>
    %38 = tpu.matmul %35, %37, %cst_28 {dimension_numbers = #tpu.dot_dimension_numbers<[1], [0], [0], [1], [0, 0, 1, 1], [], []>} : vector<112x32xf32>, vector<32x32xf32>, vector<112x32xf32> -> vector<112x32xf32>
    %c16 = arith.constant 16 : index
    %c0_29 = arith.constant 0 : index
    %39 = vector.load %arg11[%c16, %c0_29] : memref<128x32xf32, #tpu.memory_space<vmem>>, vector<112x32xf32>
    %40 = arith.addf %39, %38 : vector<112x32xf32>
    %c16_30 = arith.constant 16 : index
    %c0_31 = arith.constant 0 : index
    %41 = vector.load %arg11[%c16_30, %c0_31] : memref<128x32xf32, #tpu.memory_space<vmem>>, vector<112x32xf32>
    tpu.vector_store %arg11[%c16_30, %c0_31], %40 {strides = array<i32>} : memref<128x32xf32, #tpu.memory_space<vmem>>, vector<112x32xf32>,
    %c0_32 = arith.constant 0 : index
    %c0_33 = arith.constant 0 : index
    %42 = vector.load %arg11[%c0_32, %c0_33] : memref<128x32xf32, #tpu.memory_space<vmem>>, vector<128x32xf32>
    %cst_34 = arith.constant dense<0.000000e+00> : vector<128xf32>
    %43 = vector.multi_reduction <add>, %42, %cst_34 [1] : vector<128x32xf32> to vector<128xf32>
    %44 = vector.shape_cast %43 : vector<128xf32> to vector<128x1xf32>
    %cst_35 = arith.constant 3.200000e+01 : f32
    %45 = vector.broadcast %cst_35 : f32 to vector<128x1xf32>
    %46 = arith.divf %44, %45 : vector<128x1xf32>
    %47 = arith.mulf %42, %42 : vector<128x32xf32>
    %cst_36 = arith.constant dense<0.000000e+00> : vector<128xf32>
    %48 = vector.multi_reduction <add>, %47, %cst_36 [1] : vector<128x32xf32> to vector<128xf32>
    %49 = vector.shape_cast %48 : vector<128xf32> to vector<128x1xf32>
    %cst_37 = arith.constant 3.200000e+01 : f32
    %50 = vector.broadcast %cst_37 : f32 to vector<128x1xf32>
    %51 = arith.divf %49, %50 : vector<128x1xf32>
    %52 = arith.mulf %46, %46 : vector<128x1xf32>
    %53 = arith.subf %51, %52 : vector<128x1xf32>
    %cst_38 = arith.constant 0.000000e+00 : f32
    %54 = vector.broadcast %cst_38 : f32 to vector<128x1xf32>
    %55 = arith.maximumf %53, %54 : vector<128x1xf32>
    %56 = vector.broadcast %46 : vector<128x1xf32> to vector<128x32xf32>
    %57 = arith.subf %42, %56 : vector<128x32xf32>
    %cst_39 = arith.constant 9.99999974E-6 : f32
    %58 = vector.broadcast %cst_39 : f32 to vector<128x1xf32>
    %59 = arith.addf %55, %58 : vector<128x1xf32>
    %60 = math.rsqrt %59 : vector<128x1xf32>
    %61 = vector.broadcast %60 : vector<128x1xf32> to vector<128x32xf32>
    %62 = arith.mulf %57, %61 : vector<128x32xf32>
    %63 = vector.broadcast %2 : vector<1x32xf32> to vector<128x32xf32>
    %64 = arith.mulf %62, %63 : vector<128x32xf32>
    %65 = vector.broadcast %3 : vector<1x32xf32> to vector<128x32xf32>
    %66 = arith.addf %64, %65 : vector<128x32xf32>
    %c0_40 = arith.constant 0 : index
    %c0_41 = arith.constant 0 : index
    %67 = vector.load %arg5[%c0_40, %c0_41] : memref<32x32xf32, #tpu.memory_space<vmem>>, vector<32x32xf32>
    %cst_42 = arith.constant dense<0.000000e+00> : vector<128x32xf32>
    %68 = tpu.matmul %66, %67, %cst_42 {dimension_numbers = #tpu.dot_dimension_numbers<[1], [0], [0], [1], [0, 0, 1, 1], [], []>} : vector<128x32xf32>, vector<32x32xf32>, vector<128x32xf32> -> vector<128x32xf32>
    %c0_43 = arith.constant 0 : index
    %c0_44 = arith.constant 0 : index
    %69 = vector.load %arg12[%c0_43, %c0_44] : memref<128x32xf32, #tpu.memory_space<vmem>>, vector<128x32xf32>
    tpu.vector_store %arg12[%c0_43, %c0_44], %68 {strides = array<i32>} : memref<128x32xf32, #tpu.memory_space<vmem>>, vector<128x32xf32>,
    %c0_45 = arith.constant 0 : index
    %c0_46 = arith.constant 0 : index
    %70 = vector.load %arg6[%c0_45, %c0_46] : memref<32x32xf32, #tpu.memory_space<vmem>>, vector<32x32xf32>
    %cst_47 = arith.constant dense<0.000000e+00> : vector<128x32xf32>
    %71 = tpu.matmul %66, %70, %cst_47 {dimension_numbers = #tpu.dot_dimension_numbers<[1], [0], [0], [1], [0, 0, 1, 1], [], []>} : vector<128x32xf32>, vector<32x32xf32>, vector<128x32xf32> -> vector<128x32xf32>
    %72 = vector.broadcast %6 : vector<1x32xf32> to vector<128x32xf32>
    %73 = arith.addf %71, %72 : vector<128x32xf32>
    %c0_48 = arith.constant 0 : index
    %c0_49 = arith.constant 0 : index
    %74 = vector.load %arg13[%c0_48, %c0_49] : memref<128x32xf32, #tpu.memory_space<vmem>>, vector<128x32xf32>
    tpu.vector_store %arg13[%c0_48, %c0_49], %73 {strides = array<i32>} : memref<128x32xf32, #tpu.memory_space<vmem>>, vector<128x32xf32>,
    %c0_50 = arith.constant 0 : index
    %c0_51 = arith.constant 0 : index
    %75 = vector.load %arg7[%c0_50, %c0_51] : memref<32x32xf32, #tpu.memory_space<vmem>>, vector<32x32xf32>
    %cst_52 = arith.constant dense<0.000000e+00> : vector<128x32xf32>
    %76 = tpu.matmul %66, %75, %cst_52 {dimension_numbers = #tpu.dot_dimension_numbers<[1], [0], [0], [1], [0, 0, 1, 1], [], []>} : vector<128x32xf32>, vector<32x32xf32>, vector<128x32xf32> -> vector<128x32xf32>
    %77 = vector.broadcast %7 : vector<1x32xf32> to vector<128x32xf32>
    %78 = arith.addf %76, %77 : vector<128x32xf32>
    %c0_53 = arith.constant 0 : index
    %c0_54 = arith.constant 0 : index
    %79 = vector.load %arg14[%c0_53, %c0_54] : memref<128x32xf32, #tpu.memory_space<vmem>>, vector<128x32xf32>
    tpu.vector_store %arg14[%c0_53, %c0_54], %78 {strides = array<i32>} : memref<128x32xf32, #tpu.memory_space<vmem>>, vector<128x32xf32>,
    %80 = vector.shape_cast %4 : vector<1x32xf32> to vector<1x32xf32>
    %81 = vector.broadcast %80 : vector<1x32xf32> to vector<16x32xf32>
    %cst_55 = arith.constant 0.000000e+00 : f32
    %82 = vector.broadcast %cst_55 : f32 to vector<16x32xf32>
    %c0_i32_56 = arith.constant 0 : i32
    %c16_i32 = arith.constant 16 : i32
    %83 = arith.muli %c0_i32_56, %c16_i32 : i32
    %84 = tpu.assume_multiple %83, 16 : i32
    %85 = arith.index_cast %84 : i32 to index
    %c0_57 = arith.constant 0 : index
    %86 = vector.load %arg13[%85, %c0_57] : memref<128x32xf32, #tpu.memory_space<vmem>>, vector<16x32xf32>
    %87 = arith.index_cast %84 : i32 to index
    %c0_58 = arith.constant 0 : index
    %88 = vector.load %arg12[%87, %c0_58] : memref<128x32xf32, #tpu.memory_space<vmem>>, vector<16x32xf32>
    %89 = arith.mulf %82, %81 : vector<16x32xf32>
    %90 = arith.addf %86, %89 : vector<16x32xf32>
    %91 = arith.negf %90 : vector<16x32xf32>
    %92 = math.exp %91 : vector<16x32xf32>
    %cst_59 = arith.constant 1.000000e+00 : f32
    %93 = vector.broadcast %cst_59 : f32 to vector<16x32xf32>
    %94 = arith.addf %93, %92 : vector<16x32xf32>
    %95 = arith.divf %93, %94 : vector<16x32xf32>
    %96 = arith.subf %82, %88 : vector<16x32xf32>
    %97 = arith.mulf %96, %95 : vector<16x32xf32>
    %98 = arith.addf %88, %97 : vector<16x32xf32>
    %99 = arith.index_cast %84 : i32 to index
    %c0_60 = arith.constant 0 : index
    %100 = vector.load %arg15[%99, %c0_60] : memref<128x32xf32, #tpu.memory_space<vmem>>, vector<16x32xf32>
    tpu.vector_store %arg15[%99, %c0_60], %98 {strides = array<i32>} : memref<128x32xf32, #tpu.memory_space<vmem>>, vector<16x32xf32>,
    %c1_i32 = arith.constant 1 : i32
    %c16_i32_61 = arith.constant 16 : i32
    %101 = arith.muli %c1_i32, %c16_i32_61 : i32
    %102 = tpu.assume_multiple %101, 16 : i32
    %103 = arith.index_cast %102 : i32 to index
    %c0_62 = arith.constant 0 : index
    %104 = vector.load %arg13[%103, %c0_62] : memref<128x32xf32, #tpu.memory_space<vmem>>, vector<16x32xf32>
    %105 = arith.index_cast %102 : i32 to index
    %c0_63 = arith.constant 0 : index
    %106 = vector.load %arg12[%105, %c0_63] : memref<128x32xf32, #tpu.memory_space<vmem>>, vector<16x32xf32>
    %107 = arith.mulf %98, %81 : vector<16x32xf32>
    %108 = arith.addf %104, %107 : vector<16x32xf32>
    %109 = arith.negf %108 : vector<16x32xf32>
    %110 = math.exp %109 : vector<16x32xf32>
    %cst_64 = arith.constant 1.000000e+00 : f32
    %111 = vector.broadcast %cst_64 : f32 to vector<16x32xf32>
    %112 = arith.addf %111, %110 : vector<16x32xf32>
    %113 = arith.divf %111, %112 : vector<16x32xf32>
    %114 = arith.subf %98, %106 : vector<16x32xf32>
    %115 = arith.mulf %114, %113 : vector<16x32xf32>
    %116 = arith.addf %106, %115 : vector<16x32xf32>
    %117 = arith.index_cast %102 : i32 to index
    %c0_65 = arith.constant 0 : index
    %118 = vector.load %arg15[%117, %c0_65] : memref<128x32xf32, #tpu.memory_space<vmem>>, vector<16x32xf32>
    tpu.vector_store %arg15[%117, %c0_65], %116 {strides = array<i32>} : memref<128x32xf32, #tpu.memory_space<vmem>>, vector<16x32xf32>,
    %c2_i32 = arith.constant 2 : i32
    %c16_i32_66 = arith.constant 16 : i32
    %119 = arith.muli %c2_i32, %c16_i32_66 : i32
    %120 = tpu.assume_multiple %119, 16 : i32
    %121 = arith.index_cast %120 : i32 to index
    %c0_67 = arith.constant 0 : index
    %122 = vector.load %arg13[%121, %c0_67] : memref<128x32xf32, #tpu.memory_space<vmem>>, vector<16x32xf32>
    %123 = arith.index_cast %120 : i32 to index
    %c0_68 = arith.constant 0 : index
    %124 = vector.load %arg12[%123, %c0_68] : memref<128x32xf32, #tpu.memory_space<vmem>>, vector<16x32xf32>
    %125 = arith.mulf %116, %81 : vector<16x32xf32>
    %126 = arith.addf %122, %125 : vector<16x32xf32>
    %127 = arith.negf %126 : vector<16x32xf32>
    %128 = math.exp %127 : vector<16x32xf32>
    %cst_69 = arith.constant 1.000000e+00 : f32
    %129 = vector.broadcast %cst_69 : f32 to vector<16x32xf32>
    %130 = arith.addf %129, %128 : vector<16x32xf32>
    %131 = arith.divf %129, %130 : vector<16x32xf32>
    %132 = arith.subf %116, %124 : vector<16x32xf32>
    %133 = arith.mulf %132, %131 : vector<16x32xf32>
    %134 = arith.addf %124, %133 : vector<16x32xf32>
    %135 = arith.index_cast %120 : i32 to index
    %c0_70 = arith.constant 0 : index
    %136 = vector.load %arg15[%135, %c0_70] : memref<128x32xf32, #tpu.memory_space<vmem>>, vector<16x32xf32>
    tpu.vector_store %arg15[%135, %c0_70], %134 {strides = array<i32>} : memref<128x32xf32, #tpu.memory_space<vmem>>, vector<16x32xf32>,
    %c3_i32 = arith.constant 3 : i32
    %c16_i32_71 = arith.constant 16 : i32
    %137 = arith.muli %c3_i32, %c16_i32_71 : i32
    %138 = tpu.assume_multiple %137, 16 : i32
    %139 = arith.index_cast %138 : i32 to index
    %c0_72 = arith.constant 0 : index
    %140 = vector.load %arg13[%139, %c0_72] : memref<128x32xf32, #tpu.memory_space<vmem>>, vector<16x32xf32>
    %141 = arith.index_cast %138 : i32 to index
    %c0_73 = arith.constant 0 : index
    %142 = vector.load %arg12[%141, %c0_73] : memref<128x32xf32, #tpu.memory_space<vmem>>, vector<16x32xf32>
    %143 = arith.mulf %134, %81 : vector<16x32xf32>
    %144 = arith.addf %140, %143 : vector<16x32xf32>
    %145 = arith.negf %144 : vector<16x32xf32>
    %146 = math.exp %145 : vector<16x32xf32>
    %cst_74 = arith.constant 1.000000e+00 : f32
    %147 = vector.broadcast %cst_74 : f32 to vector<16x32xf32>
    %148 = arith.addf %147, %146 : vector<16x32xf32>
    %149 = arith.divf %147, %148 : vector<16x32xf32>
    %150 = arith.subf %134, %142 : vector<16x32xf32>
    %151 = arith.mulf %150, %149 : vector<16x32xf32>
    %152 = arith.addf %142, %151 : vector<16x32xf32>
    %153 = arith.index_cast %138 : i32 to index
    %c0_75 = arith.constant 0 : index
    %154 = vector.load %arg15[%153, %c0_75] : memref<128x32xf32, #tpu.memory_space<vmem>>, vector<16x32xf32>
    tpu.vector_store %arg15[%153, %c0_75], %152 {strides = array<i32>} : memref<128x32xf32, #tpu.memory_space<vmem>>, vector<16x32xf32>,
    %c4_i32 = arith.constant 4 : i32
    %c16_i32_76 = arith.constant 16 : i32
    %155 = arith.muli %c4_i32, %c16_i32_76 : i32
    %156 = tpu.assume_multiple %155, 16 : i32
    %157 = arith.index_cast %156 : i32 to index
    %c0_77 = arith.constant 0 : index
    %158 = vector.load %arg13[%157, %c0_77] : memref<128x32xf32, #tpu.memory_space<vmem>>, vector<16x32xf32>
    %159 = arith.index_cast %156 : i32 to index
    %c0_78 = arith.constant 0 : index
    %160 = vector.load %arg12[%159, %c0_78] : memref<128x32xf32, #tpu.memory_space<vmem>>, vector<16x32xf32>
    %161 = arith.mulf %152, %81 : vector<16x32xf32>
    %162 = arith.addf %158, %161 : vector<16x32xf32>
    %163 = arith.negf %162 : vector<16x32xf32>
    %164 = math.exp %163 : vector<16x32xf32>
    %cst_79 = arith.constant 1.000000e+00 : f32
    %165 = vector.broadcast %cst_79 : f32 to vector<16x32xf32>
    %166 = arith.addf %165, %164 : vector<16x32xf32>
    %167 = arith.divf %165, %166 : vector<16x32xf32>
    %168 = arith.subf %152, %160 : vector<16x32xf32>
    %169 = arith.mulf %168, %167 : vector<16x32xf32>
    %170 = arith.addf %160, %169 : vector<16x32xf32>
    %171 = arith.index_cast %156 : i32 to index
    %c0_80 = arith.constant 0 : index
    %172 = vector.load %arg15[%171, %c0_80] : memref<128x32xf32, #tpu.memory_space<vmem>>, vector<16x32xf32>
    tpu.vector_store %arg15[%171, %c0_80], %170 {strides = array<i32>} : memref<128x32xf32, #tpu.memory_space<vmem>>, vector<16x32xf32>,
    %c5_i32 = arith.constant 5 : i32
    %c16_i32_81 = arith.constant 16 : i32
    %173 = arith.muli %c5_i32, %c16_i32_81 : i32
    %174 = tpu.assume_multiple %173, 16 : i32
    %175 = arith.index_cast %174 : i32 to index
    %c0_82 = arith.constant 0 : index
    %176 = vector.load %arg13[%175, %c0_82] : memref<128x32xf32, #tpu.memory_space<vmem>>, vector<16x32xf32>
    %177 = arith.index_cast %174 : i32 to index
    %c0_83 = arith.constant 0 : index
    %178 = vector.load %arg12[%177, %c0_83] : memref<128x32xf32, #tpu.memory_space<vmem>>, vector<16x32xf32>
    %179 = arith.mulf %170, %81 : vector<16x32xf32>
    %180 = arith.addf %176, %179 : vector<16x32xf32>
    %181 = arith.negf %180 : vector<16x32xf32>
    %182 = math.exp %181 : vector<16x32xf32>
    %cst_84 = arith.constant 1.000000e+00 : f32
    %183 = vector.broadcast %cst_84 : f32 to vector<16x32xf32>
    %184 = arith.addf %183, %182 : vector<16x32xf32>
    %185 = arith.divf %183, %184 : vector<16x32xf32>
    %186 = arith.subf %170, %178 : vector<16x32xf32>
    %187 = arith.mulf %186, %185 : vector<16x32xf32>
    %188 = arith.addf %178, %187 : vector<16x32xf32>
    %189 = arith.index_cast %174 : i32 to index
    %c0_85 = arith.constant 0 : index
    %190 = vector.load %arg15[%189, %c0_85] : memref<128x32xf32, #tpu.memory_space<vmem>>, vector<16x32xf32>
    tpu.vector_store %arg15[%189, %c0_85], %188 {strides = array<i32>} : memref<128x32xf32, #tpu.memory_space<vmem>>, vector<16x32xf32>,
    %c6_i32 = arith.constant 6 : i32
    %c16_i32_86 = arith.constant 16 : i32
    %191 = arith.muli %c6_i32, %c16_i32_86 : i32
    %192 = tpu.assume_multiple %191, 16 : i32
    %193 = arith.index_cast %192 : i32 to index
    %c0_87 = arith.constant 0 : index
    %194 = vector.load %arg13[%193, %c0_87] : memref<128x32xf32, #tpu.memory_space<vmem>>, vector<16x32xf32>
    %195 = arith.index_cast %192 : i32 to index
    %c0_88 = arith.constant 0 : index
    %196 = vector.load %arg12[%195, %c0_88] : memref<128x32xf32, #tpu.memory_space<vmem>>, vector<16x32xf32>
    %197 = arith.mulf %188, %81 : vector<16x32xf32>
    %198 = arith.addf %194, %197 : vector<16x32xf32>
    %199 = arith.negf %198 : vector<16x32xf32>
    %200 = math.exp %199 : vector<16x32xf32>
    %cst_89 = arith.constant 1.000000e+00 : f32
    %201 = vector.broadcast %cst_89 : f32 to vector<16x32xf32>
    %202 = arith.addf %201, %200 : vector<16x32xf32>
    %203 = arith.divf %201, %202 : vector<16x32xf32>
    %204 = arith.subf %188, %196 : vector<16x32xf32>
    %205 = arith.mulf %204, %203 : vector<16x32xf32>
    %206 = arith.addf %196, %205 : vector<16x32xf32>
    %207 = arith.index_cast %192 : i32 to index
    %c0_90 = arith.constant 0 : index
    %208 = vector.load %arg15[%207, %c0_90] : memref<128x32xf32, #tpu.memory_space<vmem>>, vector<16x32xf32>
    tpu.vector_store %arg15[%207, %c0_90], %206 {strides = array<i32>} : memref<128x32xf32, #tpu.memory_space<vmem>>, vector<16x32xf32>,
    %c7_i32 = arith.constant 7 : i32
    %c16_i32_91 = arith.constant 16 : i32
    %209 = arith.muli %c7_i32, %c16_i32_91 : i32
    %210 = tpu.assume_multiple %209, 16 : i32
    %211 = arith.index_cast %210 : i32 to index
    %c0_92 = arith.constant 0 : index
    %212 = vector.load %arg13[%211, %c0_92] : memref<128x32xf32, #tpu.memory_space<vmem>>, vector<16x32xf32>
    %213 = arith.index_cast %210 : i32 to index
    %c0_93 = arith.constant 0 : index
    %214 = vector.load %arg12[%213, %c0_93] : memref<128x32xf32, #tpu.memory_space<vmem>>, vector<16x32xf32>
    %215 = arith.mulf %206, %81 : vector<16x32xf32>
    %216 = arith.addf %212, %215 : vector<16x32xf32>
    %217 = arith.negf %216 : vector<16x32xf32>
    %218 = math.exp %217 : vector<16x32xf32>
    %cst_94 = arith.constant 1.000000e+00 : f32
    %219 = vector.broadcast %cst_94 : f32 to vector<16x32xf32>
    %220 = arith.addf %219, %218 : vector<16x32xf32>
    %221 = arith.divf %219, %220 : vector<16x32xf32>
    %222 = arith.subf %206, %214 : vector<16x32xf32>
    %223 = arith.mulf %222, %221 : vector<16x32xf32>
    %224 = arith.addf %214, %223 : vector<16x32xf32>
    %225 = arith.index_cast %210 : i32 to index
    %c0_95 = arith.constant 0 : index
    %226 = vector.load %arg15[%225, %c0_95] : memref<128x32xf32, #tpu.memory_space<vmem>>, vector<16x32xf32>
    tpu.vector_store %arg15[%225, %c0_95], %224 {strides = array<i32>} : memref<128x32xf32, #tpu.memory_space<vmem>>, vector<16x32xf32>,
    %c8_i32 = arith.constant 8 : i32
    %c0_96 = arith.constant 0 : index
    %c0_97 = arith.constant 0 : index
    %227 = vector.load %arg15[%c0_96, %c0_97] : memref<128x32xf32, #tpu.memory_space<vmem>>, vector<128x32xf32>
    %c0_98 = arith.constant 0 : index
    %c0_99 = arith.constant 0 : index
    %228 = vector.load %arg11[%c0_98, %c0_99] : memref<128x32xf32, #tpu.memory_space<vmem>>, vector<128x32xf32>
    %cst_100 = arith.constant dense<0.000000e+00> : vector<128xf32>
    %229 = vector.multi_reduction <add>, %228, %cst_100 [1] : vector<128x32xf32> to vector<128xf32>
    %230 = vector.shape_cast %229 : vector<128xf32> to vector<128x1xf32>
    %cst_101 = arith.constant 3.200000e+01 : f32
    %231 = vector.broadcast %cst_101 : f32 to vector<128x1xf32>
    %232 = arith.divf %230, %231 : vector<128x1xf32>
    %233 = arith.mulf %228, %228 : vector<128x32xf32>
    %cst_102 = arith.constant dense<0.000000e+00> : vector<128xf32>
    %234 = vector.multi_reduction <add>, %233, %cst_102 [1] : vector<128x32xf32> to vector<128xf32>
    %235 = vector.shape_cast %234 : vector<128xf32> to vector<128x1xf32>
    %cst_103 = arith.constant 3.200000e+01 : f32
    %236 = vector.broadcast %cst_103 : f32 to vector<128x1xf32>
    %237 = arith.divf %235, %236 : vector<128x1xf32>
    %238 = arith.mulf %232, %232 : vector<128x1xf32>
    %239 = arith.subf %237, %238 : vector<128x1xf32>
    %cst_104 = arith.constant 0.000000e+00 : f32
    %240 = vector.broadcast %cst_104 : f32 to vector<128x1xf32>
    %241 = arith.maximumf %239, %240 : vector<128x1xf32>
    %242 = vector.broadcast %232 : vector<128x1xf32> to vector<128x32xf32>
    %243 = arith.subf %228, %242 : vector<128x32xf32>
    %cst_105 = arith.constant 9.99999974E-6 : f32
    %244 = vector.broadcast %cst_105 : f32 to vector<128x1xf32>
    %245 = arith.addf %241, %244 : vector<128x1xf32>
    %246 = math.rsqrt %245 : vector<128x1xf32>
    %247 = vector.broadcast %246 : vector<128x1xf32> to vector<128x32xf32>
    %248 = arith.mulf %243, %247 : vector<128x32xf32>
    %249 = vector.broadcast %2 : vector<1x32xf32> to vector<128x32xf32>
    %250 = arith.mulf %248, %249 : vector<128x32xf32>
    %251 = vector.broadcast %3 : vector<1x32xf32> to vector<128x32xf32>
    %252 = arith.addf %250, %251 : vector<128x32xf32>
    %cst_106 = arith.constant 1.1272403 : f32
    %253 = vector.broadcast %cst_106 : f32 to vector<128x32xf32>
    %254 = arith.mulf %252, %253 : vector<128x32xf32>
    %c0_107 = arith.constant 0 : index
    %c0_108 = arith.constant 0 : index
    %255 = vector.load %arg14[%c0_107, %c0_108] : memref<128x32xf32, #tpu.memory_space<vmem>>, vector<128x32xf32>
    %256 = vector.broadcast %5 : vector<1x32xf32> to vector<128x32xf32>
    %257 = arith.mulf %227, %256 : vector<128x32xf32>
    %258 = arith.addf %255, %257 : vector<128x32xf32>
    %259 = arith.negf %258 : vector<128x32xf32>
    %260 = math.exp %259 : vector<128x32xf32>
    %cst_109 = arith.constant 1.000000e+00 : f32
    %261 = vector.broadcast %cst_109 : f32 to vector<128x32xf32>
    %262 = arith.addf %261, %260 : vector<128x32xf32>
    %263 = arith.divf %261, %262 : vector<128x32xf32>
    %264 = math.tanh %227 : vector<128x32xf32>
    %265 = arith.subf %264, %254 : vector<128x32xf32>
    %266 = arith.mulf %265, %263 : vector<128x32xf32>
    %267 = arith.addf %266, %254 : vector<128x32xf32>
    %268 = vector.broadcast %8 : vector<1x32xf32> to vector<128x32xf32>
    %269 = arith.mulf %268, %228 : vector<128x32xf32>
    %cst_110 = arith.constant 1.000000e+00 : f32
    %270 = vector.broadcast %cst_110 : f32 to vector<1x32xf32>
    %271 = arith.subf %270, %8 : vector<1x32xf32>
    %272 = vector.broadcast %271 : vector<1x32xf32> to vector<128x32xf32>
    %273 = arith.mulf %272, %267 : vector<128x32xf32>
    %274 = arith.addf %269, %273 : vector<128x32xf32>
    %275 = arith.mulf %274, %274 : vector<128x32xf32>
    %cst_111 = arith.constant dense<0.000000e+00> : vector<128xf32>
    %276 = vector.multi_reduction <add>, %275, %cst_111 [1] : vector<128x32xf32> to vector<128xf32>
    %277 = vector.shape_cast %276 : vector<128xf32> to vector<128x1xf32>
    %cst_112 = arith.constant 3.200000e+01 : f32
    %278 = vector.broadcast %cst_112 : f32 to vector<128x1xf32>
    %279 = arith.divf %277, %278 : vector<128x1xf32>
    %cst_113 = arith.constant 9.99999997E-7 : f32
    %280 = vector.broadcast %cst_113 : f32 to vector<128x1xf32>
    %281 = arith.addf %279, %280 : vector<128x1xf32>
    %282 = math.rsqrt %281 : vector<128x1xf32>
    %283 = vector.broadcast %282 : vector<128x1xf32> to vector<128x32xf32>
    %284 = arith.mulf %274, %283 : vector<128x32xf32>
    %285 = vector.broadcast %9 : vector<1x32xf32> to vector<128x32xf32>
    %286 = arith.mulf %284, %285 : vector<128x32xf32>
    %c0_114 = arith.constant 0 : index
    %c0_115 = arith.constant 0 : index
    %c0_116 = arith.constant 0 : index
    %287 = vector.load %arg1[%c0_114, %c0_115, %c0_116] : memref<1x128x32xf32, #tpu.memory_space<vmem>>, vector<1x128x32xf32>
    %288 = vector.shape_cast %287 : vector<1x128x32xf32> to vector<128x32xf32>
    %289 = arith.mulf %286, %288 : vector<128x32xf32>
    %cst_117 = arith.constant dense<0.000000e+00> : vector<128xf32>
    %290 = vector.multi_reduction <add>, %289, %cst_117 [1] : vector<128x32xf32> to vector<128xf32>
    %291 = vector.shape_cast %290 : vector<128xf32> to vector<128x1xf32>
    %cst_118 = arith.constant 3.200000e+01 : f32
    %292 = vector.broadcast %cst_118 : f32 to vector<128x1xf32>
    %293 = arith.divf %291, %292 : vector<128x1xf32>
    %294 = arith.mulf %289, %289 : vector<128x32xf32>
    %cst_119 = arith.constant dense<0.000000e+00> : vector<128xf32>
    %295 = vector.multi_reduction <add>, %294, %cst_119 [1] : vector<128x32xf32> to vector<128xf32>
    %296 = vector.shape_cast %295 : vector<128xf32> to vector<128x1xf32>
    %cst_120 = arith.constant 3.200000e+01 : f32
    %297 = vector.broadcast %cst_120 : f32 to vector<128x1xf32>
    %298 = arith.divf %296, %297 : vector<128x1xf32>
    %299 = arith.mulf %293, %293 : vector<128x1xf32>
    %300 = arith.subf %298, %299 : vector<128x1xf32>
    %cst_121 = arith.constant 0.000000e+00 : f32
    %301 = vector.broadcast %cst_121 : f32 to vector<128x1xf32>
    %302 = arith.maximumf %300, %301 : vector<128x1xf32>
    %303 = vector.broadcast %293 : vector<128x1xf32> to vector<128x32xf32>
    %304 = arith.subf %289, %303 : vector<128x32xf32>
    %cst_122 = arith.constant 9.99999974E-6 : f32
    %305 = vector.broadcast %cst_122 : f32 to vector<128x1xf32>
    %306 = arith.addf %302, %305 : vector<128x1xf32>
    %307 = math.rsqrt %306 : vector<128x1xf32>
    %308 = vector.broadcast %307 : vector<128x1xf32> to vector<128x32xf32>
    %309 = arith.mulf %304, %308 : vector<128x32xf32>
    %310 = vector.broadcast %10 : vector<1x32xf32> to vector<128x32xf32>
    %311 = arith.mulf %309, %310 : vector<128x32xf32>
    %312 = vector.broadcast %11 : vector<1x32xf32> to vector<128x32xf32>
    %313 = arith.addf %311, %312 : vector<128x32xf32>
    %cst_123 = arith.constant 0.000000e+00 : f32
    %314 = vector.broadcast %cst_123 : f32 to vector<128x32xf32>
    %315 = arith.maximumf %313, %314 : vector<128x32xf32>
    %c0_124 = arith.constant 0 : index
    %c0_125 = arith.constant 0 : index
    %316 = vector.load %arg8[%c0_124, %c0_125] : memref<32x64xf32, #tpu.memory_space<vmem>>, vector<32x64xf32>
    %cst_126 = arith.constant dense<0.000000e+00> : vector<128x64xf32>
    %317 = tpu.matmul %315, %316, %cst_126 {dimension_numbers = #tpu.dot_dimension_numbers<[1], [0], [0], [1], [0, 0, 1, 1], [], []>} : vector<128x32xf32>, vector<32x64xf32>, vector<128x64xf32> -> vector<128x64xf32>
    %cst_127 = arith.constant dense<0.000000e+00> : vector<128xf32>
    %318 = vector.multi_reduction <add>, %317, %cst_127 [1] : vector<128x64xf32> to vector<128xf32>
    %319 = vector.shape_cast %318 : vector<128xf32> to vector<128x1xf32>
    %cst_128 = arith.constant 6.400000e+01 : f32
    %320 = vector.broadcast %cst_128 : f32 to vector<128x1xf32>
    %321 = arith.divf %319, %320 : vector<128x1xf32>
    %322 = arith.mulf %317, %317 : vector<128x64xf32>
    %cst_129 = arith.constant dense<0.000000e+00> : vector<128xf32>
    %323 = vector.multi_reduction <add>, %322, %cst_129 [1] : vector<128x64xf32> to vector<128xf32>
    %324 = vector.shape_cast %323 : vector<128xf32> to vector<128x1xf32>
    %cst_130 = arith.constant 6.400000e+01 : f32
    %325 = vector.broadcast %cst_130 : f32 to vector<128x1xf32>
    %326 = arith.divf %324, %325 : vector<128x1xf32>
    %327 = arith.mulf %321, %321 : vector<128x1xf32>
    %328 = arith.subf %326, %327 : vector<128x1xf32>
    %cst_131 = arith.constant 0.000000e+00 : f32
    %329 = vector.broadcast %cst_131 : f32 to vector<128x1xf32>
    %330 = arith.maximumf %328, %329 : vector<128x1xf32>
    %331 = vector.broadcast %321 : vector<128x1xf32> to vector<128x64xf32>
    %332 = arith.subf %317, %331 : vector<128x64xf32>
    %cst_132 = arith.constant 9.99999974E-6 : f32
    %333 = vector.broadcast %cst_132 : f32 to vector<128x1xf32>
    %334 = arith.addf %330, %333 : vector<128x1xf32>
    %335 = math.rsqrt %334 : vector<128x1xf32>
    %336 = vector.broadcast %335 : vector<128x1xf32> to vector<128x64xf32>
    %337 = arith.mulf %332, %336 : vector<128x64xf32>
    %338 = vector.broadcast %14 : vector<1x64xf32> to vector<128x64xf32>
    %339 = arith.mulf %337, %338 : vector<128x64xf32>
    %340 = vector.broadcast %15 : vector<1x64xf32> to vector<128x64xf32>
    %341 = arith.addf %339, %340 : vector<128x64xf32>
    %cst_133 = arith.constant 0.000000e+00 : f32
    %342 = vector.broadcast %cst_133 : f32 to vector<128x64xf32>
    %343 = arith.maximumf %341, %342 : vector<128x64xf32>
    %c0_134 = arith.constant 0 : index
    %c0_135 = arith.constant 0 : index
    %344 = vector.load %arg9[%c0_134, %c0_135] : memref<64x32xf32, #tpu.memory_space<vmem>>, vector<64x32xf32>
    %cst_136 = arith.constant dense<0.000000e+00> : vector<128x32xf32>
    %345 = tpu.matmul %343, %344, %cst_136 {dimension_numbers = #tpu.dot_dimension_numbers<[1], [0], [0], [1], [0, 0, 1, 1], [], []>} : vector<128x64xf32>, vector<64x32xf32>, vector<128x32xf32> -> vector<128x32xf32>
    %346 = vector.broadcast %12 : vector<1x32xf32> to vector<128x32xf32>
    %347 = arith.addf %345, %346 : vector<128x32xf32>
    %348 = arith.addf %347, %289 : vector<128x32xf32>
    %c0_137 = arith.constant 0 : index
    %c0_138 = arith.constant 0 : index
    %c0_139 = arith.constant 0 : index
    %349 = vector.load %arg10[%c0_137, %c0_138, %c0_139] : memref<1x128x32xf32, #tpu.memory_space<vmem>>, vector<1x128x32xf32>
    %350 = vector.shape_cast %349 : vector<1x128x32xf32> to vector<128x32xf32>
    %351 = vector.shape_cast %348 : vector<128x32xf32> to vector<1x128x32xf32>
    tpu.vector_store %arg10[%c0_137, %c0_138, %c0_139], %351 {strides = array<i32>} : memref<1x128x32xf32, #tpu.memory_space<vmem>>, vector<1x128x32xf32>,
    return
  }
  func.func @transform_0(%arg0: i32) -> (i32, i32, i32) {
    %c0_i32 = arith.constant 0 : i32
    %c0_i32_0 = arith.constant 0 : i32
    %c0_i32_1 = arith.constant 0 : i32
    return %arg0, %c0_i32, %c0_i32_0 : i32, i32, i32
  }
  func.func @transform_1(%arg0: i32) -> (i32, i32, i32) {
    %c0_i32 = arith.constant 0 : i32
    %c0_i32_0 = arith.constant 0 : i32
    %c0_i32_1 = arith.constant 0 : i32
    %c0_i32_2 = arith.constant 0 : i32
    return %c0_i32, %c0_i32_0, %c0_i32_1 : i32, i32, i32
  }
  func.func @transform_2(%arg0: i32) -> (i32, i32) {
    %c0_i32 = arith.constant 0 : i32
    %c0_i32_0 = arith.constant 0 : i32
    %c0_i32_1 = arith.constant 0 : i32
    return %c0_i32, %c0_i32_0 : i32, i32
  }
  func.func @transform_3(%arg0: i32) -> (i32, i32) {
    %c0_i32 = arith.constant 0 : i32
    %c0_i32_0 = arith.constant 0 : i32
    %c0_i32_1 = arith.constant 0 : i32
    return %c0_i32, %c0_i32_0 : i32, i32
  }
  func.func @transform_4(%arg0: i32) -> (i32, i32) {
    %c0_i32 = arith.constant 0 : i32
    %c0_i32_0 = arith.constant 0 : i32
    %c0_i32_1 = arith.constant 0 : i32
    return %c0_i32, %c0_i32_0 : i32, i32
  }
  func.func @transform_5(%arg0: i32) -> (i32, i32) {
    %c0_i32 = arith.constant 0 : i32
    %c0_i32_0 = arith.constant 0 : i32
    %c0_i32_1 = arith.constant 0 : i32
    return %c0_i32, %c0_i32_0 : i32, i32
  }
  func.func @transform_6(%arg0: i32) -> (i32, i32) {
    %c0_i32 = arith.constant 0 : i32
    %c0_i32_0 = arith.constant 0 : i32
    %c0_i32_1 = arith.constant 0 : i32
    return %c0_i32, %c0_i32_0 : i32, i32
  }
  func.func @transform_7(%arg0: i32) -> (i32, i32) {
    %c0_i32 = arith.constant 0 : i32
    %c0_i32_0 = arith.constant 0 : i32
    %c0_i32_1 = arith.constant 0 : i32
    return %c0_i32, %c0_i32_0 : i32, i32
  }
  func.func @transform_8(%arg0: i32) -> (i32, i32) {
    %c0_i32 = arith.constant 0 : i32
    %c0_i32_0 = arith.constant 0 : i32
    %c0_i32_1 = arith.constant 0 : i32
    return %c0_i32, %c0_i32_0 : i32, i32
  }
  func.func @transform_9(%arg0: i32) -> (i32, i32, i32) {
    %c0_i32 = arith.constant 0 : i32
    %c0_i32_0 = arith.constant 0 : i32
    %c0_i32_1 = arith.constant 0 : i32
    return %arg0, %c0_i32, %c0_i32_0 : i32, i32, i32
  }
}

</mosaic_0001>

<bundles_post_ra>
// kernel: tpu_custom_call.1
= control target key start
LH: loop header
LB: loop body
LE: loop exit
PB: predicated region body
PF: predicated region fallthrough
CT: control target
= control target key end

     0   :  { %14 = vsyncpa [#allocation8], 0  ;;  %s4651_s30 = smov [#allocation7]   ;;  %s6531_s0 = inlined_call_operand.vmem [shape: f32[1,128,32], index: 0, kind: input, shape index: {}]   ;;  %s6532_s1 = inlined_call_operand.vmem [shape: f32[3,32,32], index: 1, kind: input, shape index: {}]   ;;  %s6533_s2 = inlined_call_operand.hbm [shape: f32[12,32], index: 2, kind: input, shape index: {}]   ;;  %s6534_s3 = inlined_call_operand.vmem [shape: f32[2,64], index: 3, kind: input, shape index: {}]   ;;  %s6535_s4 = inlined_call_operand.vmem [shape: f32[32,32], index: 4, kind: input, shape index: {}]   ;;  %s6536_s5 = inlined_call_operand.vmem [shape: f32[32,32], index: 5, kind: input, shape index: {}]   ;;  %s6537_s6 = inlined_call_operand.vmem [shape: f32[32,32], index: 6, kind: input, shape index: {}]   ;;  %s6538_s7 = inlined_call_operand.vmem [shape: f32[32,64], index: 7, kind: input, shape index: {}]   ;;  %s6539_s8 = inlined_call_operand.vmem [shape: f32[64,32], index: 8, kind: input, shape index: {}]   ;;  %s6540_s9 = inlined_call_operand.vmem [shape: f32[1,128,32], index: 9, kind: output, shape index: {}]  }
   0x1   :  { %s24_s10 = sshll.u32 %s4651_s30, 4  ;;  %s25_s10 = int_to_ptr.vmem [resolvable:$true] %s24_s10 }
   0x2   :  { %s4637_s11 = scalar_lea.vmem %s25_s10, 256  ;;  %p4642_p1 = scmp.lt.s32.totalorder %s25_s10, %s25_s10 }
   0x3   :  { %p4638_p0 = scmp.ne.s32.totalorder %s25_s10, %s4637_s11  ;;  %p4643_p2 = scmp.lt.s32.totalorder %s4637_s11, %s4637_s11 }
   0x5   :  { %p4644_p3 = por %p4643_p2, %p4642_p1 }
   0x7   :  { %p4645_p4 = pnand %p4644_p3, %p4638_p0 }
   0x9   :  { %4648 = shalt.err (!%p4645_p4)
}
   0xa   :  { %s4652_s12 = smov 128   ;;  %s4653_s13 = smov 8  }
   0xb   :  { %30 = dma.hbm_to_vmem [thread:$0]  %s6533_s2, 256, %s25_s10, [#allocation8], %s4652_s12, %s4652_s12, %s4653_s13  }
   0xc   :  { %4649 = dma.done.wait [#allocation8], 256  }
   0xd   :  { %4650 = vsyncadd [#allocation8], 4294967040  ;;  %v3700_v0 = vld [vmem:[%s6532_s1 + $0x58] sm:$0xff]  ;;  %v3699_v2 = vld [vmem:[%s6532_s1 + $0x50] sm:$0xff]  ;;  %vm74_vm0 = vcmask 261120   ;;  %v70_v28 = vlaneseq  ;;  %vm3141_vm1 = vcmask 523264  }
   0xe   :  { %v299_v1 = vld [vmem:[%s6532_s1 + $0x18] sm:$0xff]  ;;  %4017 = vmatprep.subr.mxu0 %v3700_v0  ;;  %v298_v3 = vld [vmem:[%s6532_s1 + $0x10] sm:$0xff]  ;;  %v3698_v4 = vld [vmem:[%s6532_s1 + $0x48] sm:$0xff] }
   0xf   :  { %4049 = vmatprep.subr.mxu1 %v299_v1  ;;  %4018 = vmatpush3.msra.mxu0 %v3700_v0  ;;  %v297_v5 = vld [vmem:[%s6532_s1 + $0x8] sm:$0xff]  ;;  %v3697_v6 = vld [vmem:[%s6532_s1 + $0x40] sm:$0xff]  ;;  %v51_v10 = vld [vmem:[%s6531_s0 + $0x10] sm:$0xff]  ;;  %v4833_v29 = vshrl.u32 %v70_v28, 7 }
  0x10   :  { %4050 = vmatpush3.msra.mxu1 %v299_v1  ;;  %4019 = vmatprep.subr.mxu0 %v3699_v2  ;;  %v296_v7 = vld [vmem:[%s6532_s1] sm:$0xff]  ;;  %v50_v9 = vld [vmem:[%s6531_s0 + $0x8] sm:$0xff]  ;;  %v3732_v11 = vld [vmem:[%s6532_s1 + $0x38] sm:$0xff] }
  0x11   :  { %4051 = vmatprep.subr.mxu1 %v298_v3  ;;  %4020 = vmatpush3.msra.mxu0 %v3699_v2  ;;  %v49_v8 = vld [vmem:[%s6531_s0] sm:$0xff]  ;;  %v52_v12 = vld [vmem:[%s6531_s0 + $0x18] sm:$0xff]  ;;  %v3731_v14 = vld [vmem:[%s6532_s1 + $0x30] sm:$0xff]  ;;  %v4836_v30 = vsub.s32 0, %v4833_v29 }
  0x12   :  { %4052 = vmatpush3.msra.mxu1 %v298_v3  ;;  %4021 = vmatprep.subr.mxu0 %v3698_v4  ;;  %v53_v13 = vld [vmem:[%s6531_s0 + $0x20] sm:$0xff]  ;;  %v54_v15 = vld [vmem:[%s6531_s0 + $0x28] sm:$0xff]  ;;  %v55_v16 = vld [vmem:[%s6531_s0 + $0x30] sm:$0xff] }
  0x13   :  { %4053 = vmatprep.subr.mxu1 %v297_v5  ;;  %4022 = vmatpush3.msra.mxu0 %v3698_v4  ;;  %v3730_v17 = vld [vmem:[%s6532_s1 + $0x28] sm:$0xff]  ;;  %v56_v18 = vld [vmem:[%s6531_s0 + $0x38] sm:$0xff]  ;;  %v57_v19 = vld [vmem:[%s6531_s0 + $0x40] sm:$0xff] }
  0x14   :  { %4054 = vmatpush3.msra.mxu1 %v297_v5  ;;  %4023 = vmatprep.subr.mxu0 %v3697_v6  ;;  %v3729_v20 = vld [vmem:[%s6532_s1 + $0x20] sm:$0xff]  ;;  %v58_v21 = vld [vmem:[%s6531_s0 + $0x48] sm:$0xff]  ;;  %v59_v22 = vld [vmem:[%s6531_s0 + $0x50] sm:$0xff] }
  0x15   :  { %4055 = vmatprep.subr.mxu1 %v296_v7  ;;  %4024 = vmatpush3.msra.mxu0 %v3697_v6  ;;  %v60_v23 = vld [vmem:[%s6531_s0 + $0x58] sm:$0xff]  ;;  %v61_v24 = vld [vmem:[%s6531_s0 + $0x60] sm:$0xff]  ;;  %v62_v25 = vld [vmem:[%s6531_s0 + $0x68] sm:$0xff] }
  0x16   :  { %4025 = vmatprep.mubr.msk.f32.mxu0 %vm74_vm0, %v49_v8  ;;  %4056 = vmatpush3.msra.mxu1 %v296_v7  ;;  %v63_v26 = vld [vmem:[%s6531_s0 + $0x70] sm:$0xff]  ;;  %v64_v27 = vld [vmem:[%s6531_s0 + $0x78] sm:$0xff]  ;;  %v4838_v31 = vld [vmem:[#allocation7] sm:$0xff] }
  0x17   :  { %4057 = vmatprep.mubr.msk.f32.mxu1 %vm74_vm0, %v49_v8  ;;  %4026 = vmatmul.mubr.msk.f32.vlgmr.msra.gmra.mxu0 %vm74_vm0, %v50_v9  ;;  %v4842_v32 = vrot.slane %v4838_v31, %v4836_v30 }
  0x18   :  { %4058 = vmatmul.mubr.msk.f32.vlgmr.msra.gmra.mxu1 %vm74_vm0, %v50_v9  ;;  %4028 = vmatprep.mubr.msk.f32.mxu0 %vm74_vm0, %v51_v10 }
  0x19   :  { %4060 = vmatprep.mubr.msk.f32.mxu1 %vm74_vm0, %v51_v10  ;;  %4075 = vmatprep.subr.mxu1 %v3732_v11 }
  0x1a   :  { %4076 = vmatpush3.msra.mxu1 %v3732_v11 }
  0x1b   :  { %4029 = vmatmul.mubr.msk.f32.gmra.mxu0 %vm74_vm0, %v52_v12  ;;  %4077 = vmatprep.subr.mxu1 %v3731_v14 }
  0x1c   :  { %4061 = vmatmul.mubr.msk.f32.gmra.mxu1 %vm74_vm0, %v52_v12  ;;  %4031 = vmatprep.mubr.msk.f32.mxu0 %vm74_vm0, %v53_v13 }
  0x1d   :  { %4063 = vmatprep.mubr.msk.f32.mxu1 %vm74_vm0, %v53_v13  ;;  %4078 = vmatpush3.msra.mxu1 %v3731_v14 }
  0x1e   :  { %4079 = vmatprep.subr.mxu1 %v3730_v17 }
  0x1f   :  { %4032 = vmatmul.mubr.msk.f32.gmra.mxu0 %vm74_vm0, %v54_v15  ;;  %4080 = vmatpush3.msra.mxu1 %v3730_v17 }
  0x20   :  { %4064 = vmatmul.mubr.msk.f32.gmra.mxu1 %vm74_vm0, %v54_v15  ;;  %4034 = vmatprep.mubr.msk.f32.mxu0 %vm74_vm0, %v55_v16 }
  0x21   :  { %4066 = vmatprep.mubr.msk.f32.mxu1 %vm74_vm0, %v55_v16  ;;  %4081 = vmatprep.subr.mxu1 %v3729_v20 }
  0x22   :  { %4082 = vmatpush3.msra.mxu1 %v3729_v20 }
  0x23   :  { %4035 = vmatmul.mubr.msk.f32.gmra.mxu0 %vm74_vm0, %v56_v18 }
  0x24   :  { %4067 = vmatmul.mubr.msk.f32.gmra.mxu1 %vm74_vm0, %v56_v18  ;;  %4037 = vmatprep.mubr.msk.f32.mxu0 %vm74_vm0, %v57_v19 }
  0x25   :  { %4069 = vmatprep.mubr.msk.f32.mxu1 %vm74_vm0, %v57_v19 }
  0x27   :  { %4038 = vmatmul.mubr.msk.f32.gmra.mxu0 %vm74_vm0, %v58_v21 }
  0x28   :  { %4070 = vmatmul.mubr.msk.f32.gmra.mxu1 %vm74_vm0, %v58_v21  ;;  %4040 = vmatprep.mubr.msk.f32.mxu0 %vm74_vm0, %v59_v22 }
  0x29   :  { %4072 = vmatprep.mubr.msk.f32.mxu1 %vm74_vm0, %v59_v22 }
  0x2b   :  { %4041 = vmatmul.mubr.msk.f32.gmra.mxu0 %vm74_vm0, %v60_v23 }
  0x2c   :  { %4073 = vmatmul.mubr.msk.f32.gmra.mxu1 %vm74_vm0, %v60_v23  ;;  %4043 = vmatprep.mubr.msk.f32.mxu0 %vm74_vm0, %v61_v24 }
  0x2d   :  { %4083 = vmatprep.mubr.msk.f32.mxu1 %vm74_vm0, %v49_v8 }
  0x2f   :  { %4044 = vmatmul.mubr.msk.f32.gmra.mxu0 %vm74_vm0, %v62_v25 }
  0x30   :  { %4084 = vmatmul.mubr.msk.f32.vlgmr.msra.gmra.mxu1 %vm74_vm0, %v50_v9  ;;  %4046 = vmatprep.mubr.msk.f32.mxu0 %vm74_vm0, %v63_v26 }
  0x31   :  { %4086 = vmatprep.mubr.msk.f32.mxu1 %vm74_vm0, %v51_v10 }
  0x33   :  { %4047 = vmatmul.mubr.msk.f32.gmra.mxu0 %vm74_vm0, %v64_v27 }
  0x34   :  { %4087 = vmatmul.mubr.msk.f32.gmra.mxu1 %vm74_vm0, %v52_v12 }
  0x35   :  { %4089 = vmatprep.mubr.msk.f32.mxu1 %vm74_vm0, %v53_v13 }
  0x38   :  { %4090 = vmatmul.mubr.msk.f32.gmra.mxu1 %vm74_vm0, %v54_v15 }
  0x39   :  { %4092 = vmatprep.mubr.msk.f32.mxu1 %vm74_vm0, %v55_v16 }
  0x3c   :  { %4093 = vmatmul.mubr.msk.f32.gmra.mxu1 %vm74_vm0, %v56_v18 }
  0x3d   :  { %4095 = vmatprep.mubr.msk.f32.mxu1 %vm74_vm0, %v57_v19 }
  0x40   :  { %4096 = vmatmul.mubr.msk.f32.gmra.mxu1 %vm74_vm0, %v58_v21 }
  0x41   :  { %4098 = vmatprep.mubr.msk.f32.mxu1 %vm74_vm0, %v59_v22 }
  0x44   :  { %4099 = vmatmul.mubr.msk.f32.gmra.mxu1 %vm74_vm0, %v60_v23 }
  0x45   :  { %4101 = vmatprep.mubr.msk.f32.mxu1 %vm74_vm0, %v61_v24 }
  0x48   :  { %4102 = vmatmul.mubr.msk.f32.gmra.mxu1 %vm74_vm0, %v62_v25 }
  0xd7   :  { %v4027_v33 = vpop.f32.mrf.mxu0 }
  0xd8   :  { %v4059_v34 = vpop.f32.mrf.mxu1  ;;  %v195_v35 = vadd.f32 %v4027_v33, %v4842_v32 }
  0xd9   :  { %v189_v36 = vpop.f32.mrf.mxu0 }
  0xda   :  { %v402_v37 = vpop.f32.mrf.mxu1  ;;  %269 = vst.msk [vmem:[#allocation2 + $0x8] sm:$0xff] %vm74_vm0, %v195_v35  ;;  %v190_v38 = vadd.f32 %v189_v36, %v4842_v32 }
  0xdb   :  { %v4030_v39 = vpop.f32.mrf.mxu0 }
  0xdc   :  { %v4062_v40 = vpop.f32.mrf.mxu1  ;;  %268 = vst.msk [vmem:[#allocation2] sm:$0xff] %vm74_vm0, %v190_v38  ;;  %v205_v41 = vadd.f32 %v4030_v39, %v4842_v32 }
  0xdd   :  { %v199_v42 = vpop.f32.mrf.mxu0 }
  0xde   :  { %v412_v43 = vpop.f32.mrf.mxu1  ;;  %271 = vst.msk [vmem:[#allocation2 + $0x18] sm:$0xff] %vm74_vm0, %v205_v41  ;;  %v200_v44 = vadd.f32 %v199_v42, %v4842_v32 }
  0xdf   :  { %v4033_v45 = vpop.f32.mrf.mxu0 }
  0xe0   :  { %v4851_v46 = vpop.f32.mrf.mxu1  ;;  %270 = vst.msk [vmem:[#allocation2 + $0x10] sm:$0xff] %vm74_vm0, %v200_v44  ;;  %v215_v47 = vadd.f32 %v4033_v45, %v4842_v32 }
  0xe1   :  { %v209_v48 = vpop.f32.mrf.mxu0  ;;  %v4863_v54 = vld [vmem:[#allocation2 + $0x8] sm:$0xff] }
  0xe2   :  { %v4855_v49 = vpop.f32.mrf.mxu1  ;;  %273 = vst.msk [vmem:[#allocation2 + $0x28] sm:$0xff] %vm74_vm0, %v215_v47  ;;  %v210_v50 = vadd.f32 %v209_v48, %v4842_v32  ;;  %v817_v62 = vmul.f32 %v4863_v54, %v4863_v54  ;;  %v4890_v2 = vsel %vm74_vm0, %v4863_v54, 0.0 }
  0xe3   :  { %v4036_v51 = vpop.f32.mrf.mxu0  ;;  %v4861_v53 = vld [vmem:[#allocation2] sm:$0xff] }
  0xe4   :  { %v4859_v52 = vpop.f32.mrf.mxu1  ;;  %272 = vst.msk [vmem:[#allocation2 + $0x20] sm:$0xff] %vm74_vm0, %v210_v50  ;;  %v225_v55 = vadd.f32 %v4036_v51, %v4842_v32  ;;  %v4869_v56 = vsel %vm74_vm0, %v4861_v53, 0.0  ;;  %v816_v57 = vmul.f32 %v4861_v53, %v4861_v53  ;;  %v4898_v8 = vsel %vm74_vm0, %v817_v62, 0.0 }
  0xe5   :  { %v219_v58 = vpop.f32.mrf.mxu0  ;;  %752 = vadd.xlane.f32.xlu0 %v4869_v56  ;;  %v694_v17 = vld [vmem:[#allocation2 + $0x18] sm:$0xff] }
  0xe6   :  { %v4873_v59 = vpop.f32.mrf.mxu1  ;;  %275 = vst.msk [vmem:[#allocation2 + $0x38] sm:$0xff] %vm74_vm0, %v225_v55  ;;  %v220_v60 = vadd.f32 %v219_v58, %v4842_v32  ;;  %v4879_v61 = vsel %vm74_vm0, %v816_v57, 0.0 }
  0xe7   :  { %v4039_v63 = vpop.f32.mrf.mxu0  ;;  %833 = vadd.xlane.f32.xlu1 %v4879_v61  ;;  %v693_v23 = vld [vmem:[#allocation2 + $0x10] sm:$0xff] }
  0xe8   :  { %v4883_v0 = vpop.f32.mrf.mxu1  ;;  %274 = vst.msk [vmem:[#allocation2 + $0x30] sm:$0xff] %vm74_vm0, %v220_v60  ;;  %v235_v1 = vadd.f32 %v4039_v63, %v4842_v32 }
  0xe9   :  { %v462_v3 = vld [vmem:[#allocation2 + $0x28] sm:$0xff]  ;;  %v229_v4 = vpop.f32.mrf.mxu0  ;;  %755 = vadd.xlane.f32.xlu0 %v4890_v2 }
  0xea   :  { %v4892_v5 = vpop.f32.mrf.mxu1  ;;  %v474_v6 = vadd.f32 %v4059_v34, %v462_v3  ;;  %277 = vst.msk [vmem:[#allocation2 + $0x48] sm:$0xff] %vm74_vm0, %v235_v1  ;;  %v230_v7 = vadd.f32 %v229_v4, %v4842_v32 }
  0xeb   :  { %v461_v9 = vld [vmem:[#allocation2 + $0x20] sm:$0xff]  ;;  %v4042_v10 = vpop.f32.mrf.mxu0  ;;  %836 = vadd.xlane.f32.xlu1 %v4898_v8 }
  0xec   :  { %v4900_v11 = vpop.f32.mrf.mxu1  ;;  %486 = vst.msk [vmem:[#allocation2 + $0x28] sm:$0xff] %vm74_vm0, %v474_v6  ;;  %v473_v12 = vadd.f32 %v461_v9, %v402_v37  ;;  %276 = vst.msk [vmem:[#allocation2 + $0x40] sm:$0xff] %vm74_vm0, %v230_v7  ;;  %v245_v13 = vadd.f32 %v4042_v10, %v4842_v32  ;;  %v1264_v6 = vld [vmem:[%s6536_s5 + $0x18] sm:$0xff] }
  0xed   :  { %v464_v14 = vld [vmem:[#allocation2 + $0x38] sm:$0xff]  ;;  %v239_v15 = vpop.f32.mrf.mxu0  ;;  %4136 = vmatprep.subr.mxu1 %v1264_v6 }
  0xee   :  { %v4906_v16 = vpop.f32.mrf.mxu1  ;;  %485 = vst.msk [vmem:[#allocation2 + $0x20] sm:$0xff] %vm74_vm0, %v473_v12  ;;  %v476_v18 = vadd.f32 %v4062_v40, %v464_v14  ;;  %279 = vst.msk [vmem:[#allocation2 + $0x58] sm:$0xff] %vm74_vm0, %v245_v13  ;;  %v240_v19 = vadd.f32 %v239_v15, %v4842_v32  ;;  %4137 = vmatpush3.msra.mxu1 %v1264_v6  ;;  %v1050_v6 = vld [vmem:[%s6535_s4 + $0x10] sm:$0xff] }
  0xef   :  { %v463_v20 = vld [vmem:[#allocation2 + $0x30] sm:$0xff]  ;;  %v4045_v21 = vpop.f32.mrf.mxu0 }
  0xf0   :  { %v4085_v22 = vpop.f32.mrf.mxu1  ;;  %488 = vst.msk [vmem:[#allocation2 + $0x38] sm:$0xff] %vm74_vm0, %v476_v18  ;;  %v475_v24 = vadd.f32 %v463_v20, %v412_v43  ;;  %278 = vst.msk [vmem:[#allocation2 + $0x50] sm:$0xff] %vm74_vm0, %v240_v19  ;;  %v255_v25 = vadd.f32 %v4045_v21, %v4842_v32 }
  0xf1   :  { %v708_v26 = vadd.f32 %v4085_v22, %v694_v17  ;;  %v466_v27 = vld [vmem:[#allocation2 + $0x48] sm:$0xff]  ;;  %v249_v28 = vpop.f32.mrf.mxu0 }
  0xf2   :  { %v624_v33 = vpop.f32.mrf.mxu1  ;;  %487 = vst.msk [vmem:[#allocation2 + $0x30] sm:$0xff] %vm74_vm0, %v475_v24  ;;  %v478_v34 = vadd.f32 %v4851_v46, %v466_v27  ;;  %281 = vst.msk [vmem:[#allocation2 + $0x68] sm:$0xff] %vm74_vm0, %v255_v25  ;;  %v250_v35 = vadd.f32 %v249_v28, %v4842_v32 }
  0xf3   :  { %722 = vst.msk [vmem:[#allocation2 + $0x18] sm:$0xff] %vm74_vm0, %v708_v26  ;;  %v707_v36 = vadd.f32 %v693_v23, %v624_v33  ;;  %v465_v37 = vld [vmem:[#allocation2 + $0x40] sm:$0xff]  ;;  %v4048_v38 = vpop.f32.mrf.mxu0  ;;  %v696_v40 = vld [vmem:[#allocation2 + $0x28] sm:$0xff] }
  0xf4   :  { %v4088_v39 = vpop.f32.mrf.mxu1  ;;  %490 = vst.msk [vmem:[#allocation2 + $0x48] sm:$0xff] %vm74_vm0, %v478_v34  ;;  %v477_v41 = vadd.f32 %v465_v37, %v4855_v49  ;;  %280 = vst.msk [vmem:[#allocation2 + $0x60] sm:$0xff] %vm74_vm0, %v250_v35  ;;  %v265_v42 = vadd.f32 %v4048_v38, %v4842_v32 }
  0xf5   :  { %721 = vst.msk [vmem:[#allocation2 + $0x10] sm:$0xff] %vm74_vm0, %v707_v36  ;;  %v710_v43 = vadd.f32 %v4088_v39, %v696_v40  ;;  %v468_v44 = vld [vmem:[#allocation2 + $0x58] sm:$0xff]  ;;  %v259_v45 = vpop.f32.mrf.mxu0  ;;  %v695_v47 = vld [vmem:[#allocation2 + $0x20] sm:$0xff] }
  0xf6   :  { %v634_v46 = vpop.f32.mrf.mxu1  ;;  %489 = vst.msk [vmem:[#allocation2 + $0x40] sm:$0xff] %vm74_vm0, %v477_v41  ;;  %v480_v48 = vadd.f32 %v4859_v52, %v468_v44  ;;  %283 = vst.msk [vmem:[#allocation2 + $0x78] sm:$0xff] %vm74_vm0, %v265_v42  ;;  %v260_v49 = vadd.f32 %v259_v45, %v4842_v32 }
  0xf7   :  { %724 = vst.msk [vmem:[#allocation2 + $0x28] sm:$0xff] %vm74_vm0, %v710_v43  ;;  %v709_v50 = vadd.f32 %v695_v47, %v634_v46  ;;  %v467_v51 = vld [vmem:[#allocation2 + $0x50] sm:$0xff]  ;;  %v698_v57 = vld [vmem:[#allocation2 + $0x38] sm:$0xff] }
  0xf8   :  { %v4091_v55 = vpop.f32.mrf.mxu1  ;;  %492 = vst.msk [vmem:[#allocation2 + $0x58] sm:$0xff] %vm74_vm0, %v480_v48  ;;  %v479_v58 = vadd.f32 %v467_v51, %v4873_v59  ;;  %282 = vst.msk [vmem:[#allocation2 + $0x70] sm:$0xff] %vm74_vm0, %v260_v49 }
  0xf9   :  { %723 = vst.msk [vmem:[#allocation2 + $0x20] sm:$0xff] %vm74_vm0, %v709_v50  ;;  %v712_v60 = vadd.f32 %v4091_v55, %v698_v57  ;;  %v470_v52 = vld [vmem:[#allocation2 + $0x68] sm:$0xff]  ;;  %v697_v63 = vld [vmem:[#allocation2 + $0x30] sm:$0xff] }
  0xfa   :  { %v644_v62 = vpop.f32.mrf.mxu1  ;;  %v4933_v1 = vld [vmem:[#allocation2 + $0x18] sm:$0xff]  ;;  %491 = vst.msk [vmem:[#allocation2 + $0x50] sm:$0xff] %vm74_vm0, %v479_v58  ;;  %v482_v32 = vadd.f32 %v4883_v0, %v470_v52 }
  0xfb   :  { %726 = vst.msk [vmem:[#allocation2 + $0x38] sm:$0xff] %vm74_vm0, %v712_v60  ;;  %v711_v3 = vadd.f32 %v697_v63, %v644_v62  ;;  %v4940_v59 = vsel %vm74_vm0, %v4933_v1, 0.0  ;;  %v819_v4 = vmul.f32 %v4933_v1, %v4933_v1  ;;  %v469_v7 = vld [vmem:[#allocation2 + $0x60] sm:$0xff]  ;;  %v700_v10 = vld [vmem:[#allocation2 + $0x48] sm:$0xff]  ;;  %v1051_v58 = vld [vmem:[%s6535_s4 + $0x18] sm:$0xff] }
  0xfc   :  { %v4094_v9 = vpop.f32.mrf.mxu1  ;;  %761 = vadd.xlane.f32.xlu1 %v4940_v59  ;;  %v4948_v0 = vld [vmem:[#allocation2 + $0x10] sm:$0xff]  ;;  %494 = vst.msk [vmem:[#allocation2 + $0x68] sm:$0xff] %vm74_vm0, %v482_v32  ;;  %v481_v12 = vadd.f32 %v469_v7, %v4892_v5  ;;  %4104 = vmatprep.subr.mxu0 %v1051_v58  ;;  %v1262_v32 = vld [vmem:[%s6536_s5 + $0x8] sm:$0xff] }
  0xfd   :  { %725 = vst.msk [vmem:[#allocation2 + $0x30] sm:$0xff] %vm74_vm0, %v711_v3  ;;  %v714_v13 = vadd.f32 %v4094_v9, %v700_v10  ;;  %v4955_v14 = vsel %vm74_vm0, %v4948_v0, 0.0  ;;  %v4958_v15 = vsel %vm74_vm0, %v819_v4, 0.0  ;;  %v472_v17 = vld [vmem:[#allocation2 + $0x78] sm:$0xff]  ;;  %v699_v19 = vld [vmem:[#allocation2 + $0x40] sm:$0xff]  ;;  %v818_v20 = vmul.f32 %v4948_v0, %v4948_v0  ;;  %v1263_v63 = vld [vmem:[%s6536_s5 + $0x10] sm:$0xff]  ;;  %4105 = vmatpush3.msra.mxu0 %v1051_v58 }
  0xfe   :  { %v654_v18 = vpop.f32.mrf.mxu1  ;;  %758 = vadd.xlane.f32.xlu0 %v4955_v14  ;;  %493 = vst.msk [vmem:[#allocation2 + $0x60] sm:$0xff] %vm74_vm0, %v481_v12  ;;  %v484_v5 = vadd.f32 %v4900_v11, %v472_v17  ;;  %v4970_v26 = vld [vmem:[#allocation2 + $0x28] sm:$0xff]  ;;  %4138 = vmatprep.subr.mxu1 %v1263_v63  ;;  %v1261_v10 = vld [vmem:[%s6536_s5] sm:$0xff] }
  0xff   :  { %728 = vst.msk [vmem:[#allocation2 + $0x48] sm:$0xff] %vm74_vm0, %v714_v13  ;;  %v713_v21 = vadd.f32 %v699_v19, %v654_v18  ;;  %v471_v22 = vld [vmem:[#allocation2 + $0x70] sm:$0xff]  ;;  %v702_v24 = vld [vmem:[#allocation2 + $0x58] sm:$0xff]  ;;  %v4968_v25 = vsel %vm74_vm0, %v818_v20, 0.0  ;;  %v4982_v36 = vsel %vm74_vm0, %v4970_v26, 0.0  ;;  %4139 = vmatpush3.msra.mxu1 %v1263_v63  ;;  %4106 = vmatprep.subr.mxu0 %v1050_v6  ;;  %v1049_v12 = vld [vmem:[%s6535_s4 + $0x8] sm:$0xff] }
 0x100   :  { %v4097_v23 = vpop.f32.mrf.mxu1  ;;  %842 = vadd.xlane.f32.xlu1 %v4958_v15  ;;  %496 = vst.msk [vmem:[#allocation2 + $0x78] sm:$0xff] %vm74_vm0, %v484_v5  ;;  %v483_v27 = vadd.f32 %v471_v22, %v4906_v16  ;;  %v4976_v34 = vld [vmem:[#allocation2 + $0x20] sm:$0xff]  ;;  %v821_v16 = vmul.f32 %v4970_v26, %v4970_v26  ;;  %4140 = vmatprep.subr.mxu1 %v1262_v32 }
 0x101   :  { %727 = vst.msk [vmem:[#allocation2 + $0x40] sm:$0xff] %vm74_vm0, %v713_v21  ;;  %v716_v11 = vadd.f32 %v4097_v23, %v702_v24  ;;  %v701_v33 = vld [vmem:[#allocation2 + $0x50] sm:$0xff]  ;;  %v4990_v40 = vsel %vm74_vm0, %v4976_v34, 0.0  ;;  %v820_v41 = vmul.f32 %v4976_v34, %v4976_v34  ;;  %4141 = vmatpush3.msra.mxu1 %v1262_v32  ;;  %4107 = vmatpush3.msra.mxu0 %v1050_v6  ;;  %v1048_v18 = vld [vmem:[%s6535_s4] sm:$0xff] }
 0x102   :  { %v664_v28 = vpop.f32.mrf.mxu1  ;;  %839 = vadd.xlane.f32.xlu0 %v4968_v25  ;;  %495 = vst.msk [vmem:[#allocation2 + $0x70] sm:$0xff] %vm74_vm0, %v483_v27  ;;  %v4997_v45 = vsel %vm74_vm0, %v821_v16, 0.0  ;;  %v5000_v48 = vld [vmem:[#allocation2 + $0x38] sm:$0xff]  ;;  %4142 = vmatprep.subr.mxu1 %v1261_v10 }
 0x103   :  { %730 = vst.msk [vmem:[#allocation2 + $0x58] sm:$0xff] %vm74_vm0, %v716_v11  ;;  %v715_v35 = vadd.f32 %v701_v33, %v664_v28  ;;  %v704_v38 = vld [vmem:[#allocation2 + $0x68] sm:$0xff]  ;;  %v5004_v50 = vsel %vm74_vm0, %v820_v41, 0.0  ;;  %v5015_v52 = vsel %vm74_vm0, %v5000_v48, 0.0  ;;  %v823_v62 = vmul.f32 %v5000_v48, %v5000_v48  ;;  %4143 = vmatpush3.msra.mxu1 %v1261_v10  ;;  %4108 = vmatprep.subr.mxu0 %v1049_v12 }
 0x104   :  { %v4100_v37 = vpop.f32.mrf.mxu1  ;;  %767 = vadd.xlane.f32.xlu1 %v4982_v36  ;;  %v5007_v57 = vld [vmem:[#allocation2 + $0x30] sm:$0xff]  ;;  %4109 = vmatpush3.msra.mxu0 %v1049_v12  ;;  %v5137_v10 = vsub.s32 1, %v4833_v29  ;;  %v1030_v12 = vsub.s32 2, %v4833_v29 }
 0x105   :  { %729 = vst.msk [vmem:[#allocation2 + $0x50] sm:$0xff] %vm74_vm0, %v715_v35  ;;  %v718_v39 = vadd.f32 %v4100_v37, %v704_v38  ;;  %v703_v43 = vld [vmem:[#allocation2 + $0x60] sm:$0xff]  ;;  %v5029_v3 = vsel %vm74_vm0, %v5007_v57, 0.0  ;;  %v822_v4 = vmul.f32 %v5007_v57, %v5007_v57  ;;  %v5038_v7 = vsel %vm74_vm0, %v823_v62, 0.0  ;;  %4110 = vmatprep.subr.mxu0 %v1048_v18 }
 0x106   :  { %v674_v42 = vpop.f32.mrf.mxu1  ;;  %764 = vadd.xlane.f32.xlu0 %v4990_v40  ;;  %v5041_v9 = vld [vmem:[#allocation2 + $0x48] sm:$0xff]  ;;  %4111 = vmatpush3.msra.mxu0 %v1048_v18  ;;  %v5142_v18 = vrot.slane %v4838_v31, %v5137_v10 }
 0x107   :  { %732 = vst.msk [vmem:[#allocation2 + $0x68] sm:$0xff] %vm74_vm0, %v718_v39  ;;  %v717_v44 = vadd.f32 %v703_v43, %v674_v42  ;;  %v706_v47 = vld [vmem:[#allocation2 + $0x78] sm:$0xff]  ;;  %v5050_v13 = vsel %vm74_vm0, %v822_v4, 0.0  ;;  %v5060_v19 = vsel %vm74_vm0, %v5041_v9, 0.0  ;;  %v825_v20 = vmul.f32 %v5041_v9, %v5041_v9 }
 0x108   :  { %v4103_v46 = vpop.f32.mrf.mxu1  ;;  %848 = vadd.xlane.f32.xlu1 %v4997_v45  ;;  %v5053_v17 = vld [vmem:[#allocation2 + $0x40] sm:$0xff] }
 0x109   :  { %731 = vst.msk [vmem:[#allocation2 + $0x60] sm:$0xff] %vm74_vm0, %v717_v44  ;;  %v720_v49 = vadd.f32 %v4103_v46, %v706_v47  ;;  %v705_v55 = vld [vmem:[#allocation2 + $0x70] sm:$0xff]  ;;  %v775_v5 = vsel %vm74_vm0, %v5053_v17, 0.0  ;;  %v824_v21 = vmul.f32 %v5053_v17, %v5053_v17  ;;  %v859_v22 = vsel %vm74_vm0, %v825_v20, 0.0 }
 0x10a   :  { %v684_v51 = vpop.f32.mrf.mxu1  ;;  %845 = vadd.xlane.f32.xlu0 %v5004_v50  ;;  %v5070_v23 = vld [vmem:[#allocation2 + $0x58] sm:$0xff] }
 0x10b   :  { %734 = vst.msk [vmem:[#allocation2 + $0x78] sm:$0xff] %vm74_vm0, %v720_v49  ;;  %v719_v60 = vadd.f32 %v705_v55, %v684_v51  ;;  %v856_v24 = vsel %vm74_vm0, %v824_v21, 0.0  ;;  %v784_v11 = vsel %vm74_vm0, %v5070_v23, 0.0  ;;  %v827_v28 = vmul.f32 %v5070_v23, %v5070_v23 }
 0x10c   :  { %773 = vadd.xlane.f32.xlu1 %v5015_v52  ;;  %v5073_v27 = vld [vmem:[#allocation2 + $0x50] sm:$0xff] }
 0x10d   :  { %733 = vst.msk [vmem:[#allocation2 + $0x70] sm:$0xff] %vm74_vm0, %v719_v60  ;;  %v781_v33 = vsel %vm74_vm0, %v5073_v27, 0.0  ;;  %v826_v35 = vmul.f32 %v5073_v27, %v5073_v27  ;;  %v865_v16 = vsel %vm74_vm0, %v827_v28, 0.0 }
 0x10e   :  { %770 = vadd.xlane.f32.xlu0 %v5029_v3  ;;  %v5084_v37 = vld [vmem:[#allocation2 + $0x68] sm:$0xff] }
 0x10f   :  { %v862_v38 = vsel %vm74_vm0, %v826_v35, 0.0  ;;  %v790_v41 = vsel %vm74_vm0, %v5084_v37, 0.0  ;;  %v829_v42 = vmul.f32 %v5084_v37, %v5084_v37 }
 0x110   :  { %854 = vadd.xlane.f32.xlu1 %v5038_v7  ;;  %v5087_v39 = vld [vmem:[#allocation2 + $0x60] sm:$0xff] }
 0x111   :  { %v787_v43 = vsel %vm74_vm0, %v5087_v39, 0.0  ;;  %v828_v44 = vmul.f32 %v5087_v39, %v5087_v39  ;;  %v871_v46 = vsel %vm74_vm0, %v829_v42, 0.0 }
 0x112   :  { %851 = vadd.xlane.f32.xlu0 %v5050_v13  ;;  %v5098_v47 = vld [vmem:[#allocation2 + $0x78] sm:$0xff] }
 0x113   :  { %v868_v49 = vsel %vm74_vm0, %v828_v44, 0.0  ;;  %v796_v55 = vsel %vm74_vm0, %v5098_v47, 0.0  ;;  %v831_v58 = vmul.f32 %v5098_v47, %v5098_v47 }
 0x114   :  { %779 = vadd.xlane.f32.xlu1 %v5060_v19  ;;  %v5101_v51 = vld [vmem:[#allocation2 + $0x70] sm:$0xff] }
 0x115   :  { %v793_v60 = vsel %vm74_vm0, %v5101_v51, 0.0  ;;  %v830_v62 = vmul.f32 %v5101_v51, %v5101_v51  ;;  %v877_v63 = vsel %vm74_vm0, %v831_v58, 0.0 }
 0x116   :  { %776 = vadd.xlane.f32.xlu0 %v775_v5 }
 0x117   :  { %v874_v32 = vsel %vm74_vm0, %v830_v62, 0.0 }
 0x118   :  { %860 = vadd.xlane.f32.xlu1 %v859_v22 }
 0x11a   :  { %857 = vadd.xlane.f32.xlu0 %v856_v24 }
 0x11c   :  { %785 = vadd.xlane.f32.xlu1 %v784_v11 }
 0x11e   :  { %782 = vadd.xlane.f32.xlu0 %v781_v33 }
 0x120   :  { %866 = vadd.xlane.f32.xlu1 %v865_v16 }
 0x122   :  { %863 = vadd.xlane.f32.xlu0 %v862_v38 }
 0x124   :  { %791 = vadd.xlane.f32.xlu1 %v790_v41 }
 0x126   :  { %788 = vadd.xlane.f32.xlu0 %v787_v43 }
 0x128   :  { %872 = vadd.xlane.f32.xlu1 %v871_v46 }
 0x12a   :  { %869 = vadd.xlane.f32.xlu0 %v868_v49 }
 0x12c   :  { %797 = vadd.xlane.f32.xlu1 %v796_v55 }
 0x12e   :  { %794 = vadd.xlane.f32.xlu0 %v793_v60 }
 0x130   :  { %878 = vadd.xlane.f32.xlu1 %v877_v63 }
 0x132   :  { %875 = vadd.xlane.f32.xlu0 %v874_v32 }
 0x134   :  { %1883 = vadd.xlane.f32.xlu1 %v4890_v2 }
 0x136   :  { %1880 = vadd.xlane.f32.xlu0 %v4869_v56  ;;  %v5133_v56 = vld [vmem:[%s6537_s6 + $0x18] sm:$0xff] }
 0x137   :  { %4168 = vmatprep.subr.mxu0 %v5133_v56 }
 0x138   :  { %1963 = vadd.xlane.f32.xlu1 %v4898_v8 }
 0x13a   :  { %1960 = vadd.xlane.f32.xlu0 %v4879_v61 }
 0x13c   :  { %1889 = vadd.xlane.f32.xlu1 %v4940_v59 }
 0x13e   :  { %1886 = vadd.xlane.f32.xlu0 %v4955_v14 }
 0x140   :  { %1969 = vadd.xlane.f32.xlu1 %v4958_v15 }
 0x142   :  { %1966 = vadd.xlane.f32.xlu0 %v4968_v25 }
 0x144   :  { %1895 = vadd.xlane.f32.xlu1 %v4982_v36 }
 0x146   :  { %1892 = vadd.xlane.f32.xlu0 %v4990_v40 }
 0x148   :  { %1975 = vadd.xlane.f32.xlu1 %v4997_v45 }
 0x14a   :  { %1972 = vadd.xlane.f32.xlu0 %v5004_v50 }
 0x14c   :  { %1901 = vadd.xlane.f32.xlu1 %v5015_v52 }
 0x14e   :  { %1898 = vadd.xlane.f32.xlu0 %v5029_v3 }
 0x150   :  { %1981 = vadd.xlane.f32.xlu1 %v5038_v7 }
 0x152   :  { %1978 = vadd.xlane.f32.xlu0 %v5050_v13 }
 0x154   :  { %1907 = vadd.xlane.f32.xlu1 %v5060_v19 }
 0x156   :  { %1904 = vadd.xlane.f32.xlu0 %v775_v5 }
 0x158   :  { %1987 = vadd.xlane.f32.xlu1 %v859_v22  ;;  %v5150_v22 = vrot.slane %v4838_v31, %v1030_v12 }
 0x15a   :  { %1984 = vadd.xlane.f32.xlu0 %v856_v24 }
 0x15c   :  { %1913 = vadd.xlane.f32.xlu1 %v784_v11 }
 0x15e   :  { %1910 = vadd.xlane.f32.xlu0 %v781_v33 }
 0x160   :  { %1993 = vadd.xlane.f32.xlu1 %v865_v16 }
 0x162   :  { %1990 = vadd.xlane.f32.xlu0 %v862_v38 }
 0x164   :  { %1919 = vadd.xlane.f32.xlu1 %v790_v41 }
 0x166   :  { %1916 = vadd.xlane.f32.xlu0 %v787_v43 }
 0x168   :  { %1999 = vadd.xlane.f32.xlu1 %v871_v46 }
 0x16a   :  { %1996 = vadd.xlane.f32.xlu0 %v868_v49 }
 0x16c   :  { %1925 = vadd.xlane.f32.xlu1 %v796_v55 }
 0x16e   :  { %1922 = vadd.xlane.f32.xlu0 %v793_v60  ;;  %v753_v61 = vpop.xlane.xlu0 %752 }
 0x16f   :  { %v800_v2 = vmul.f32 0.03125, %v753_v61 }
 0x170   :  { %2005 = vadd.xlane.f32.xlu1 %v877_v63  ;;  %v834_v8 = vpop.xlane.xlu1 %833 }
 0x171   :  { %v896_v59 = vmul.f32 %v800_v2, %v800_v2  ;;  %v880_v14 = vmul.f32 0.03125, %v834_v8  ;;  %v944_v19 = vsub.f32 %v4861_v53, %v800_v2 }
 0x172   :  { %2002 = vadd.xlane.f32.xlu0 %v874_v32  ;;  %v756_v15 = vpop.xlane.xlu0 %755 }
 0x173   :  { %v912_v25 = vsub.f32 %v880_v14, %v896_v59  ;;  %v801_v36 = vmul.f32 0.03125, %v756_v15 }
 0x174   :  { %v837_v40 = vpop.xlane.xlu1 %836 }
 0x175   :  { %v928_v45 = vmax.f32 %v912_v25, 0.0  ;;  %v897_v50 = vmul.f32 %v801_v36, %v801_v36  ;;  %v881_v52 = vmul.f32 0.03125, %v837_v40  ;;  %v945_v35 = vsub.f32 %v4863_v54, %v801_v36  ;;  %v1432_v25 = vld [vmem:[%s6537_s6 + $0x10] sm:$0xff] }
 0x177   :  { %v960_v3 = vadd.f32 1e-05, %v928_v45  ;;  %v913_v4 = vsub.f32 %v881_v52, %v897_v50  ;;  %v1431_v52 = vld [vmem:[%s6537_s6 + $0x8] sm:$0xff] }
 0x179   :  { %4291 = vrsqrt.f32 %v960_v3  ;;  %v929_v6 = vmax.f32 %v913_v4, 0.0 }
 0x17b   :  { %v961_v7 = vadd.f32 1e-05, %v929_v6 }
 0x17d   :  { %4293 = vrsqrt.f32 %v961_v7 }
 0x185   :  { %v762_v13 = vpop.xlane.xlu1 %761 }
 0x186   :  { %v5145_v20 = vmul.f32 0.03125, %v762_v13  ;;  %v4292_v5 = vpop.eup %4291  ;;  %v1430_v13 = vld [vmem:[%s6537_s6] sm:$0xff] }
 0x187   :  { %v759_v21 = vpop.xlane.xlu0 %758  ;;  %v992_v28 = vmul.f32 %v4292_v5, %v944_v19 }
 0x188   :  { %v899_v24 = vmul.f32 %v5145_v20, %v5145_v20  ;;  %v5154_v11 = vmul.f32 0.03125, %v759_v21 }
 0x189   :  { %v843_v33 = vpop.xlane.xlu1 %842  ;;  %v1012_v38 = vmul.f32 %v5142_v18, %v992_v28 }
 0x18a   :  { %v898_v53 = vmul.f32 %v5154_v11, %v5154_v11  ;;  %v883_v16 = vmul.f32 0.03125, %v843_v33  ;;  %v4294_v41 = vpop.eup %4293 }
 0x18b   :  { %v840_v42 = vpop.xlane.xlu0 %839  ;;  %v993_v43 = vmul.f32 %v4294_v41, %v945_v35  ;;  %v5161_v46 = vadd.f32 %v5150_v22, %v1012_v38 }
 0x18c   :  { %v915_v31 = vsub.f32 %v883_v16, %v899_v24  ;;  %v882_v44 = vmul.f32 0.03125, %v840_v42 }
 0x18d   :  { %v768_v49 = vpop.xlane.xlu1 %767  ;;  %4112 = vmatprep.mubr.msk.f32.mxu0 %vm74_vm0, %v5161_v46  ;;  %4144 = vmatprep.mubr.msk.f32.mxu1 %vm74_vm0, %v5161_v46  ;;  %v1013_v54 = vmul.f32 %v5142_v18, %v993_v43 }
 0x18e   :  { %v931_v55 = vmax.f32 %v915_v31, 0.0  ;;  %v914_v58 = vsub.f32 %v882_v44, %v898_v53  ;;  %v5163_v60 = vmul.f32 0.03125, %v768_v49 }
 0x18f   :  { %v765_v62 = vpop.xlane.xlu0 %764  ;;  %v5173_v8 = vadd.f32 %v5150_v22, %v1013_v54  ;;  %v946_v54 = vsub.f32 %v4948_v0, %v5154_v11 }
 0x190   :  { %v963_v63 = vadd.f32 1e-05, %v931_v55  ;;  %v930_v32 = vmax.f32 %v914_v58, 0.0  ;;  %v5170_v61 = vmul.f32 0.03125, %v765_v62  ;;  %v901_v14 = vmul.f32 %v5163_v60, %v5163_v60 }
 0x191   :  { %v849_v2 = vpop.xlane.xlu1 %848  ;;  %4113 = vmatmul.mubr.msk.f32.vlgmr.msra.gmra.mxu0 %vm74_vm0, %v5173_v8  ;;  %4145 = vmatmul.mubr.msk.f32.vlgmr.msra.gmra.mxu1 %vm74_vm0, %v5173_v8  ;;  %v947_v55 = vsub.f32 %v4933_v1, %v5145_v20 }
 0x192   :  { %4295 = vrsqrt.f32 %v963_v63  ;;  %v962_v59 = vadd.f32 1e-05, %v930_v32  ;;  %v885_v15 = vmul.f32 0.03125, %v849_v2  ;;  %v900_v40 = vmul.f32 %v5170_v61, %v5170_v61  ;;  %4169 = vmatpush3.msra.mxu0 %v5133_v56 }
 0x193   :  { %v846_v36 = vpop.xlane.xlu0 %845  ;;  %4170 = vmatprep.subr.mxu0 %v1432_v25 }
 0x194   :  { %4297 = vrsqrt.f32 %v962_v59  ;;  %v917_v45 = vsub.f32 %v885_v15, %v901_v14  ;;  %v884_v50 = vmul.f32 0.03125, %v846_v36  ;;  %4171 = vmatpush3.msra.mxu0 %v1432_v25 }
 0x195   :  { %v774_v3 = vpop.xlane.xlu1 %773  ;;  %4172 = vmatprep.subr.mxu0 %v1431_v52 }
 0x196   :  { %v933_v4 = vmax.f32 %v917_v45, 0.0  ;;  %v916_v6 = vsub.f32 %v884_v50, %v900_v40  ;;  %v5190_v7 = vmul.f32 0.03125, %v774_v3  ;;  %4173 = vmatpush3.msra.mxu0 %v1431_v52 }
 0x197   :  { %v771_v19 = vpop.xlane.xlu0 %770  ;;  %4174 = vmatprep.subr.mxu0 %v1430_v13 }
 0x198   :  { %v965_v5 = vadd.f32 1e-05, %v933_v4  ;;  %v932_v21 = vmax.f32 %v916_v6, 0.0  ;;  %v5195_v56 = vmul.f32 0.03125, %v771_v19  ;;  %v903_v33 = vmul.f32 %v5190_v7, %v5190_v7  ;;  %4175 = vmatpush3.msra.mxu0 %v1430_v13 }
 0x199   :  { %v855_v24 = vpop.xlane.xlu1 %854 }
 0x19a   :  { %4299 = vrsqrt.f32 %v965_v5  ;;  %v964_v28 = vadd.f32 1e-05, %v932_v21  ;;  %v887_v35 = vmul.f32 0.03125, %v855_v24  ;;  %v902_v16 = vmul.f32 %v5195_v56, %v5195_v56 }
 0x19b   :  { %v852_v53 = vpop.xlane.xlu0 %851  ;;  %v949_v5 = vsub.f32 %v4970_v26, %v5163_v60 }
 0x19c   :  { %4301 = vrsqrt.f32 %v964_v28  ;;  %v919_v38 = vsub.f32 %v887_v35, %v903_v33  ;;  %v886_v41 = vmul.f32 0.03125, %v852_v53  ;;  %v948_v28 = vsub.f32 %v4976_v34, %v5170_v61 }
 0x19d   :  { %v780_v42 = vpop.xlane.xlu1 %779 }
 0x19e   :  { %v935_v43 = vmax.f32 %v919_v38, 0.0  ;;  %v918_v31 = vsub.f32 %v886_v41, %v902_v16  ;;  %v5201_v44 = vmul.f32 0.03125, %v780_v42 }
 0x19f   :  { %v4296_v49 = vpop.eup %4295  ;;  %v777_v58 = vpop.xlane.xlu0 %776 }
 0x1a0   :  { %v967_v62 = vadd.f32 1e-05, %v935_v43  ;;  %v934_v63 = vmax.f32 %v918_v31, 0.0  ;;  %v905_v2 = vmul.f32 %v5201_v44, %v5201_v44  ;;  %v5209_v59 = vmul.f32 0.03125, %v777_v58 }
 0x1a1   :  { %v4298_v32 = vpop.eup %4297  ;;  %v861_v14 = vpop.xlane.xlu1 %860  ;;  %v995_v15 = vmul.f32 %v4296_v49, %v947_v55 }
 0x1a2   :  { %4303 = vrsqrt.f32 %v967_v62  ;;  %v966_v25 = vadd.f32 1e-05, %v934_v63  ;;  %v889_v36 = vmul.f32 0.03125, %v861_v14  ;;  %v994_v40 = vmul.f32 %v4298_v32, %v946_v54 }
 0x1a3   :  { %v904_v1 = vmul.f32 %v5209_v59, %v5209_v59  ;;  %v858_v20 = vpop.xlane.xlu0 %857  ;;  %v1015_v0 = vmul.f32 %v5142_v18, %v995_v15  ;;  %v951_v15 = vsub.f32 %v5000_v48, %v5190_v7 }
 0x1a4   :  { %4305 = vrsqrt.f32 %v966_v25  ;;  %v921_v11 = vsub.f32 %v889_v36, %v905_v2  ;;  %v888_v45 = vmul.f32 0.03125, %v858_v20  ;;  %v1014_v50 = vmul.f32 %v5142_v18, %v994_v40 }
 0x1a5   :  { %v786_v52 = vpop.xlane.xlu1 %785  ;;  %v5223_v24 = vadd.f32 %v5150_v22, %v1015_v0  ;;  %v950_v40 = vsub.f32 %v5007_v57, %v5195_v56 }
 0x1a6   :  { %v937_v3 = vmax.f32 %v921_v11, 0.0  ;;  %v920_v4 = vsub.f32 %v888_v45, %v904_v1  ;;  %v5215_v6 = vmul.f32 0.03125, %v786_v52  ;;  %v5218_v13 = vadd.f32 %v5150_v22, %v1014_v50 }
 0x1a7   :  { %v4300_v19 = vpop.eup %4299  ;;  %v783_v21 = vpop.xlane.xlu0 %782 }
 0x1a8   :  { %v969_v33 = vadd.f32 1e-05, %v937_v3  ;;  %v936_v35 = vmax.f32 %v920_v4, 0.0  ;;  %4115 = vmatprep.mubr.msk.f32.mxu0 %vm74_vm0, %v5218_v13  ;;  %4147 = vmatprep.mubr.msk.f32.mxu1 %vm74_vm0, %v5218_v13  ;;  %v907_v16 = vmul.f32 %v5215_v6, %v5215_v6  ;;  %v5233_v26 = vmul.f32 0.03125, %v783_v21 }
 0x1a9   :  { %v4302_v53 = vpop.eup %4301  ;;  %v867_v60 = vpop.xlane.xlu1 %866  ;;  %4116 = vmatmul.mubr.msk.f32.gmra.mxu0 %vm74_vm0, %v5223_v24  ;;  %4148 = vmatmul.mubr.msk.f32.gmra.mxu1 %vm74_vm0, %v5223_v24  ;;  %v997_v34 = vmul.f32 %v4300_v19, %v949_v5 }
 0x1aa   :  { %4307 = vrsqrt.f32 %v969_v33  ;;  %v968_v61 = vadd.f32 1e-05, %v936_v35  ;;  %v891_v38 = vmul.f32 0.03125, %v867_v60  ;;  %v996_v41 = vmul.f32 %v4302_v53, %v948_v28 }
 0x1ab   :  { %v906_v42 = vmul.f32 %v5233_v26, %v5233_v26  ;;  %v864_v43 = vpop.xlane.xlu0 %863  ;;  %v1017_v31 = vmul.f32 %v5142_v18, %v997_v34  ;;  %v953_v34 = vsub.f32 %v5041_v9, %v5201_v44 }
 0x1ac   :  { %4309 = vrsqrt.f32 %v968_v61  ;;  %v923_v49 = vsub.f32 %v891_v38, %v907_v16  ;;  %v890_v55 = vmul.f32 0.03125, %v864_v43  ;;  %v1016_v58 = vmul.f32 %v5142_v18, %v996_v41 }
 0x1ad   :  { %v792_v54 = vpop.xlane.xlu1 %791  ;;  %v5251_v36 = vadd.f32 %v5150_v22, %v1017_v31  ;;  %v952_v41 = vsub.f32 %v5053_v17, %v5209_v59 }
 0x1ae   :  { %v939_v62 = vmax.f32 %v923_v49, 0.0  ;;  %v922_v63 = vsub.f32 %v890_v55, %v906_v42  ;;  %v5243_v32 = vmul.f32 0.03125, %v792_v54  ;;  %v5246_v2 = vadd.f32 %v5150_v22, %v1016_v58 }
 0x1af   :  { %v4304_v14 = vpop.eup %4303  ;;  %v789_v25 = vpop.xlane.xlu0 %788 }
 0x1b0   :  { %v971_v1 = vadd.f32 1e-05, %v939_v62  ;;  %v938_v20 = vmax.f32 %v922_v63, 0.0  ;;  %4118 = vmatprep.mubr.msk.f32.mxu0 %vm74_vm0, %v5246_v2  ;;  %4150 = vmatprep.mubr.msk.f32.mxu1 %vm74_vm0, %v5246_v2  ;;  %v909_v11 = vmul.f32 %v5243_v32, %v5243_v32  ;;  %v5261_v48 = vmul.f32 0.03125, %v789_v25 }
 0x1b1   :  { %v4306_v0 = vpop.eup %4305  ;;  %v873_v7 = vpop.xlane.xlu1 %872  ;;  %4119 = vmatmul.mubr.msk.f32.gmra.mxu0 %vm74_vm0, %v5251_v36  ;;  %4151 = vmatmul.mubr.msk.f32.gmra.mxu1 %vm74_vm0, %v5251_v36  ;;  %v999_v57 = vmul.f32 %v4304_v14, %v951_v15 }
 0x1b2   :  { %4311 = vrsqrt.f32 %v971_v1  ;;  %v970_v56 = vadd.f32 1e-05, %v938_v20  ;;  %v893_v45 = vmul.f32 0.03125, %v873_v7  ;;  %v998_v50 = vmul.f32 %v4306_v0, %v950_v40 }
 0x1b3   :  { %v908_v52 = vmul.f32 %v5261_v48, %v5261_v48  ;;  %v870_v3 = vpop.xlane.xlu0 %869  ;;  %v1019_v4 = vmul.f32 %v5142_v18, %v999_v57  ;;  %v954_v57 = vsub.f32 %v5073_v27, %v5233_v26 }
 0x1b4   :  { %4313 = vrsqrt.f32 %v970_v56  ;;  %v925_v19 = vsub.f32 %v893_v45, %v909_v11  ;;  %v892_v5 = vmul.f32 0.03125, %v870_v3  ;;  %v1018_v21 = vmul.f32 %v5142_v18, %v998_v50 }
 0x1b5   :  { %v798_v28 = vpop.xlane.xlu1 %797  ;;  %v5279_v38 = vadd.f32 %v5150_v22, %v1019_v4  ;;  %v955_v11 = vsub.f32 %v5070_v23, %v5215_v6 }
 0x1b6   :  { %v941_v33 = vmax.f32 %v925_v19, 0.0  ;;  %v924_v35 = vsub.f32 %v892_v5, %v908_v52  ;;  %v5271_v53 = vmul.f32 0.03125, %v798_v28  ;;  %v5274_v16 = vadd.f32 %v5150_v22, %v1018_v21 }
 0x1b7   :  { %v4308_v60 = vpop.eup %4307  ;;  %v795_v61 = vpop.xlane.xlu0 %794  ;;  %v957_v19 = vsub.f32 %v5084_v37, %v5243_v32  ;;  %v956_v21 = vsub.f32 %v5087_v39, %v5261_v48 }
 0x1b8   :  { %v973_v42 = vadd.f32 1e-05, %v941_v33  ;;  %v940_v43 = vmax.f32 %v924_v35, 0.0  ;;  %4121 = vmatprep.mubr.msk.f32.mxu0 %vm74_vm0, %v5274_v16  ;;  %4153 = vmatprep.mubr.msk.f32.mxu1 %vm74_vm0, %v5274_v16  ;;  %v911_v49 = vmul.f32 %v5271_v53, %v5271_v53  ;;  %v5289_v9 = vmul.f32 0.03125, %v795_v61 }
 0x1b9   :  { %v4310_v31 = vpop.eup %4309  ;;  %v879_v44 = vpop.xlane.xlu1 %878  ;;  %4122 = vmatmul.mubr.msk.f32.gmra.mxu0 %vm74_vm0, %v5279_v38  ;;  %4154 = vmatmul.mubr.msk.f32.gmra.mxu1 %vm74_vm0, %v5279_v38  ;;  %v1001_v17 = vmul.f32 %v4308_v60, %v953_v34  ;;  %v959_v39 = vsub.f32 %v5098_v47, %v5271_v53 }
 0x1ba   :  { %4315 = vrsqrt.f32 %v973_v42  ;;  %v972_v59 = vadd.f32 1e-05, %v940_v43  ;;  %v895_v55 = vmul.f32 0.03125, %v879_v44  ;;  %v1000_v58 = vmul.f32 %v4310_v31, %v952_v41 }
 0x1bb   :  { %v910_v54 = vmul.f32 %v5289_v9, %v5289_v9  ;;  %v876_v62 = vpop.xlane.xlu0 %875  ;;  %v1021_v63 = vmul.f32 %v5142_v18, %v1001_v17  ;;  %v958_v61 = vsub.f32 %v5101_v51, %v5289_v9  ;;  %v1267_v51 = vsub.s32 5, %v4833_v29 }
 0x1bc   :  { %4317 = vrsqrt.f32 %v972_v59  ;;  %v927_v14 = vsub.f32 %v895_v55, %v911_v49  ;;  %v894_v15 = vmul.f32 0.03125, %v876_v62  ;;  %v1020_v25 = vmul.f32 %v5142_v18, %v1000_v58 }
 0x1bd   :  { %v1041_v7 = vadd.f32 %v5150_v22, %v1021_v63 }
 0x1be   :  { %v943_v40 = vmax.f32 %v927_v14, 0.0  ;;  %v926_v1 = vsub.f32 %v894_v15, %v910_v54  ;;  %v1040_v20 = vadd.f32 %v5150_v22, %v1020_v25 }
 0x1bf   :  { %v4312_v0 = vpop.eup %4311 }
 0x1c0   :  { %v975_v56 = vadd.f32 1e-05, %v943_v40  ;;  %v942_v45 = vmax.f32 %v926_v1, 0.0  ;;  %4124 = vmatprep.mubr.msk.f32.mxu0 %vm74_vm0, %v1040_v20  ;;  %4156 = vmatprep.mubr.msk.f32.mxu1 %vm74_vm0, %v1040_v20  ;;  %v1003_v52 = vmul.f32 %v4312_v0, %v955_v11 }
 0x1c1   :  { %v4314_v50 = vpop.eup %4313  ;;  %4125 = vmatmul.mubr.msk.f32.gmra.mxu0 %vm74_vm0, %v1041_v7  ;;  %4157 = vmatmul.mubr.msk.f32.gmra.mxu1 %vm74_vm0, %v1041_v7 }
 0x1c2   :  { %4319 = vrsqrt.f32 %v975_v56  ;;  %v974_v3 = vadd.f32 1e-05, %v942_v45  ;;  %v1002_v23 = vmul.f32 %v4314_v50, %v954_v57  ;;  %v1023_v6 = vmul.f32 %v5142_v18, %v1003_v52 }
 0x1c4   :  { %4321 = vrsqrt.f32 %v974_v3  ;;  %v1022_v27 = vmul.f32 %v5142_v18, %v1002_v23  ;;  %v1043_v5 = vadd.f32 %v5150_v22, %v1023_v6 }
 0x1c6   :  { %v1042_v26 = vadd.f32 %v5150_v22, %v1022_v27 }
 0x1c7   :  { %v4316_v4 = vpop.eup %4315 }
 0x1c8   :  { %4127 = vmatprep.mubr.msk.f32.mxu0 %vm74_vm0, %v1042_v26  ;;  %4159 = vmatprep.mubr.msk.f32.mxu1 %vm74_vm0, %v1042_v26  ;;  %v1005_v33 = vmul.f32 %v4316_v4, %v957_v19 }
 0x1c9   :  { %v4318_v28 = vpop.eup %4317  ;;  %4128 = vmatmul.mubr.msk.f32.gmra.mxu0 %vm74_vm0, %v1043_v5  ;;  %4160 = vmatmul.mubr.msk.f32.gmra.mxu1 %vm74_vm0, %v1043_v5 }
 0x1ca   :  { %v1004_v35 = vmul.f32 %v4318_v28, %v956_v21  ;;  %v1025_v60 = vmul.f32 %v5142_v18, %v1005_v33 }
 0x1cc   :  { %v1024_v37 = vmul.f32 %v5142_v18, %v1004_v35  ;;  %v1045_v48 = vadd.f32 %v5150_v22, %v1025_v60 }
 0x1ce   :  { %v1044_v32 = vadd.f32 %v5150_v22, %v1024_v37 }
 0x1cf   :  { %v4320_v34 = vpop.eup %4319 }
 0x1d0   :  { %4130 = vmatprep.mubr.msk.f32.mxu0 %vm74_vm0, %v1044_v32  ;;  %4162 = vmatprep.mubr.msk.f32.mxu1 %vm74_vm0, %v1044_v32  ;;  %v1007_v42 = vmul.f32 %v4320_v34, %v959_v39 }
 0x1d1   :  { %v4322_v41 = vpop.eup %4321  ;;  %4131 = vmatmul.mubr.msk.f32.gmra.mxu0 %vm74_vm0, %v1045_v48  ;;  %4163 = vmatmul.mubr.msk.f32.gmra.mxu1 %vm74_vm0, %v1045_v48 }
 0x1d2   :  { %v1006_v43 = vmul.f32 %v4322_v41, %v958_v61  ;;  %v1027_v31 = vmul.f32 %v5142_v18, %v1007_v42 }
 0x1d4   :  { %v1026_v47 = vmul.f32 %v5142_v18, %v1006_v43  ;;  %v1047_v49 = vadd.f32 %v5150_v22, %v1027_v31 }
 0x1d6   :  { %v1046_v53 = vadd.f32 %v5150_v22, %v1026_v47 }
 0x1d8   :  { %4133 = vmatprep.mubr.msk.f32.mxu0 %vm74_vm0, %v1046_v53  ;;  %4165 = vmatprep.mubr.msk.f32.mxu1 %vm74_vm0, %v1046_v53 }
 0x1d9   :  { %4134 = vmatmul.mubr.msk.f32.gmra.mxu0 %vm74_vm0, %v1047_v49  ;;  %4166 = vmatmul.mubr.msk.f32.gmra.mxu1 %vm74_vm0, %v1047_v49 }
 0x1da   :  { %4176 = vmatprep.mubr.msk.f32.mxu0 %vm74_vm0, %v5161_v46  ;;  %v5366_v46 = vld [vmem:[#allocation7] sm:$0xff] }
 0x1dd   :  { %4177 = vmatmul.mubr.msk.f32.vlgmr.msra.gmra.mxu0 %vm74_vm0, %v5173_v8  ;;  %v5369_v8 = vrot.slane %v5366_v46, %v1267_v51 }
 0x1de   :  { %4179 = vmatprep.mubr.msk.f32.mxu0 %vm74_vm0, %v5218_v13  ;;  %v1601_v13 = vsub.s32 3, %v4833_v29 }
 0x1e0   :  { %v5378_v9 = vrot.slane %v5366_v46, %v1601_v13 }
 0x1e1   :  { %4180 = vmatmul.mubr.msk.f32.gmra.mxu0 %vm74_vm0, %v5223_v24 }
 0x1e2   :  { %4182 = vmatprep.mubr.msk.f32.mxu0 %vm74_vm0, %v5246_v2  ;;  %v1607_v17 = vmul.f32 0.0, %v5378_v9 }
 0x1e5   :  { %4183 = vmatmul.mubr.msk.f32.gmra.mxu0 %vm74_vm0, %v5251_v36 }
 0x1e6   :  { %4185 = vmatprep.mubr.msk.f32.mxu0 %vm74_vm0, %v5274_v16 }
 0x1e9   :  { %4186 = vmatmul.mubr.msk.f32.gmra.mxu0 %vm74_vm0, %v5279_v38 }
 0x1ea   :  { %4188 = vmatprep.mubr.msk.f32.mxu0 %vm74_vm0, %v1040_v20 }
 0x1ed   :  { %4189 = vmatmul.mubr.msk.f32.gmra.mxu0 %vm74_vm0, %v1041_v7 }
 0x1ee   :  { %4191 = vmatprep.mubr.msk.f32.mxu0 %vm74_vm0, %v1042_v26 }
 0x1f1   :  { %4192 = vmatmul.mubr.msk.f32.gmra.mxu0 %vm74_vm0, %v1043_v5 }
 0x1f2   :  { %4194 = vmatprep.mubr.msk.f32.mxu0 %vm74_vm0, %v1044_v32 }
 0x1f5   :  { %4195 = vmatmul.mubr.msk.f32.gmra.mxu0 %vm74_vm0, %v1045_v48 }
 0x1f6   :  { %4197 = vmatprep.mubr.msk.f32.mxu0 %vm74_vm0, %v1046_v53 }
 0x1f9   :  { %4198 = vmatmul.mubr.msk.f32.gmra.mxu0 %vm74_vm0, %v1047_v49 }
 0x251   :  { %v4114_v24 = vpop.f32.mrf.mxu0  ;;  %v4146_v2 = vpop.f32.mrf.mxu1 }
 0x252   :  { %1246 = vst.msk [vmem:[#allocation3 + $0x8] sm:$0xff] %vm74_vm0, %v4114_v24  ;;  %v1341_v36 = vadd.f32 %v4146_v2, %v5369_v8 }
 0x253   :  { %v1166_v16 = vpop.f32.mrf.mxu0  ;;  %v1335_v38 = vpop.f32.mrf.mxu1 }
 0x254   :  { %1415 = vst.msk [vmem:[#allocation4 + $0x8] sm:$0xff] %vm74_vm0, %v1341_v36  ;;  %1245 = vst.msk [vmem:[#allocation3] sm:$0xff] %vm74_vm0, %v1166_v16  ;;  %v1336_v44 = vadd.f32 %v1335_v38, %v5369_v8 }
 0x256   :  { %1414 = vst.msk [vmem:[#allocation4] sm:$0xff] %vm74_vm0, %v1336_v44 }
 0x259   :  { %v1606_v4 = vld [vmem:[#allocation3 + $0x8] sm:$0xff] }
 0x25a   :  { %v1623_v33 = vsub.f32 0.0, %v1606_v4 }
 0x25b   :  { %v1604_v59 = vld [vmem:[#allocation4 + $0x8] sm:$0xff]  ;;  %v1605_v28 = vld [vmem:[#allocation3] sm:$0xff] }
 0x25c   :  { %v1609_v55 = vadd.f32 %v1607_v17, %v1604_v59  ;;  %v1622_v60 = vsub.f32 0.0, %v1605_v28 }
 0x25d   :  { %v1603_v58 = vld [vmem:[#allocation4] sm:$0xff] }
 0x25e   :  { %v3796_v54 = vmul.f32 -1.442695, %v1609_v55  ;;  %v1608_v62 = vadd.f32 %v1607_v17, %v1603_v58 }
 0x260   :  { %4323 = vpow2.f32 %v3796_v54  ;;  %v3795_v63 = vmul.f32 -1.442695, %v1608_v62  ;;  %v1884_v62 = vpop.xlane.xlu1 %1883 }
 0x262   :  { %4325 = vpow2.f32 %v3795_v63 }
 0x269   :  { %v4117_v14 = vpop.f32.mrf.mxu0  ;;  %v4149_v15 = vpop.f32.mrf.mxu1 }
 0x26a   :  { %1248 = vst.msk [vmem:[#allocation3 + $0x18] sm:$0xff] %vm74_vm0, %v4117_v14  ;;  %v1351_v25 = vadd.f32 %v4149_v15, %v5369_v8  ;;  %v1881_v15 = vpop.xlane.xlu0 %1880 }
 0x26b   :  { %v1176_v40 = vpop.f32.mrf.mxu0  ;;  %v1345_v1 = vpop.f32.mrf.mxu1 }
 0x26c   :  { %1417 = vst.msk [vmem:[#allocation4 + $0x18] sm:$0xff] %vm74_vm0, %v1351_v25  ;;  %1247 = vst.msk [vmem:[#allocation3 + $0x10] sm:$0xff] %vm74_vm0, %v1176_v40  ;;  %v1346_v20 = vadd.f32 %v1345_v1, %v5369_v8 }
 0x26d   :  { %v4324_v0 = vpop.eup %4323 }
 0x26e   :  { %1416 = vst.msk [vmem:[#allocation4 + $0x10] sm:$0xff] %vm74_vm0, %v1346_v20  ;;  %v1617_v11 = vadd.f32 1.0, %v4324_v0  ;;  %v1964_v0 = vpop.xlane.xlu1 %1963 }
 0x26f   :  { %v4326_v7 = vpop.eup %4325 }
 0x270   :  { %4327 = vrcp.f32 %v1617_v11  ;;  %v1616_v45 = vadd.f32 1.0, %v4326_v7  ;;  %v1436_v11 = vsub.s32 6, %v4833_v29 }
 0x271   :  { %v4120_v57 = vpop.f32.mrf.mxu0  ;;  %v4152_v56 = vpop.f32.mrf.mxu1 }
 0x272   :  { %1250 = vst.msk [vmem:[#allocation3 + $0x28] sm:$0xff] %vm74_vm0, %v4120_v57  ;;  %v1361_v50 = vadd.f32 %v4152_v56, %v5369_v8  ;;  %4329 = vrcp.f32 %v1616_v45  ;;  %v5433_v57 = vmul.f32 0.03125, %v1884_v62  ;;  %v1961_v56 = vpop.xlane.xlu0 %1960 }
 0x273   :  { %v1186_v52 = vpop.f32.mrf.mxu0  ;;  %v1355_v3 = vpop.f32.mrf.mxu1  ;;  %v1632_v49 = vld [vmem:[#allocation4 + $0x18] sm:$0xff] }
 0x274   :  { %1419 = vst.msk [vmem:[#allocation4 + $0x28] sm:$0xff] %vm74_vm0, %v1361_v50  ;;  %1249 = vst.msk [vmem:[#allocation3 + $0x20] sm:$0xff] %vm74_vm0, %v1186_v52  ;;  %v1356_v23 = vadd.f32 %v1355_v3, %v5369_v8  ;;  %v5435_v52 = vmul.f32 0.03125, %v1881_v15  ;;  %v2008_v3 = vmul.f32 0.03125, %v1964_v0 }
 0x275   :  { %v1631_v2 = vld [vmem:[#allocation4 + $0x10] sm:$0xff] }
 0x276   :  { %1418 = vst.msk [vmem:[#allocation4 + $0x20] sm:$0xff] %vm74_vm0, %v1356_v23 }
 0x279   :  { %v4123_v6 = vpop.f32.mrf.mxu0  ;;  %v4155_v27 = vpop.f32.mrf.mxu1 }
 0x27a   :  { %1252 = vst.msk [vmem:[#allocation3 + $0x38] sm:$0xff] %vm74_vm0, %v4123_v6  ;;  %v1371_v26 = vadd.f32 %v4155_v27, %v5369_v8 }
 0x27b   :  { %v1196_v19 = vpop.f32.mrf.mxu0  ;;  %v1365_v5 = vpop.f32.mrf.mxu1 }
 0x27c   :  { %1421 = vst.msk [vmem:[#allocation4 + $0x38] sm:$0xff] %vm74_vm0, %v1371_v26  ;;  %1251 = vst.msk [vmem:[#allocation3 + $0x30] sm:$0xff] %vm74_vm0, %v1196_v19  ;;  %v1366_v21 = vadd.f32 %v1365_v5, %v5369_v8  ;;  %v2024_v19 = vmul.f32 %v5433_v57, %v5433_v57  ;;  %v2007_v5 = vmul.f32 0.03125, %v1961_v56 }
 0x27d   :  { %v4328_v35 = vpop.eup %4327 }
 0x27e   :  { %1420 = vst.msk [vmem:[#allocation4 + $0x30] sm:$0xff] %vm74_vm0, %v1366_v21  ;;  %v1625_v37 = vmul.f32 %v4328_v35, %v1623_v33  ;;  %v2023_v35 = vmul.f32 %v5435_v52, %v5435_v52 }
 0x27f   :  { %v4330_v32 = vpop.eup %4329 }
 0x280   :  { %v5402_v48 = vadd.f32 %v1625_v37, %v1606_v4  ;;  %v1624_v61 = vmul.f32 %v4330_v32, %v1622_v60  ;;  %v5440_v4 = vrot.slane %v5366_v46, %v1436_v11  ;;  %v2040_v60 = vsub.f32 %v2008_v3, %v2024_v19  ;;  %v1890_v32 = vpop.xlane.xlu1 %1889 }
 0x281   :  { %v4126_v34 = vpop.f32.mrf.mxu0  ;;  %v4158_v39 = vpop.f32.mrf.mxu1 }
 0x282   :  { %1254 = vst.msk [vmem:[#allocation3 + $0x48] sm:$0xff] %vm74_vm0, %v4126_v34  ;;  %v1381_v41 = vadd.f32 %v4158_v39, %v5369_v8  ;;  %1629 = vst.msk [vmem:[#allocation6 + $0x8] sm:$0xff] %vm74_vm0, %v5402_v48  ;;  %v1637_v31 = vmul.f32 %v5402_v48, %v5378_v9  ;;  %v5410_v47 = vadd.f32 %v1624_v61, %v1605_v28  ;;  %v1887_v34 = vpop.xlane.xlu0 %1886  ;;  %v2201_v61 = vsub.s32 4, %v4833_v29 }
 0x283   :  { %v1206_v42 = vpop.f32.mrf.mxu0  ;;  %v1375_v43 = vpop.f32.mrf.mxu1 }
 0x284   :  { %1423 = vst.msk [vmem:[#allocation4 + $0x48] sm:$0xff] %vm74_vm0, %v1381_v41  ;;  %1253 = vst.msk [vmem:[#allocation3 + $0x40] sm:$0xff] %vm74_vm0, %v1206_v42  ;;  %v1376_v53 = vadd.f32 %v1375_v43, %v5369_v8  ;;  %v1639_v51 = vadd.f32 %v1637_v31, %v1632_v49  ;;  %v1636_v24 = vmul.f32 %v5410_v47, %v5378_v9 }
 0x285   :  { %1628 = vst.msk [vmem:[#allocation6] sm:$0xff] %vm74_vm0, %v5410_v47  ;;  %v2039_v41 = vsub.f32 %v2007_v5, %v2023_v35  ;;  %v5457_v49 = vrot.slane %v5366_v46, %v2201_v61 }
 0x286   :  { %1422 = vst.msk [vmem:[#allocation4 + $0x40] sm:$0xff] %vm74_vm0, %v1376_v53  ;;  %v3798_v36 = vmul.f32 -1.442695, %v1639_v51  ;;  %v1638_v16 = vadd.f32 %v1636_v24, %v1631_v2 }
 0x287   :  { %v2055_v51 = vmax.f32 %v2039_v41, 0.0 }
 0x288   :  { %4331 = vpow2.f32 %v3798_v36  ;;  %v3797_v17 = vmul.f32 -1.442695, %v1638_v16  ;;  %v1970_v36 = vpop.xlane.xlu1 %1969  ;;  %v1967_v16 = vpop.xlane.xlu0 %1966 }
 0x289   :  { %v4129_v38 = vpop.f32.mrf.mxu0  ;;  %v4161_v44 = vpop.f32.mrf.mxu1  ;;  %v5459_v2 = vld [vmem:[#allocation6 + $0x8] sm:$0xff] }
 0x28a   :  { %1256 = vst.msk [vmem:[#allocation3 + $0x58] sm:$0xff] %vm74_vm0, %v4129_v38  ;;  %v1391_v59 = vadd.f32 %v4161_v44, %v5369_v8  ;;  %4333 = vpow2.f32 %v3797_v17  ;;  %v5463_v17 = vmul.f32 0.03125, %v1890_v32 }
 0x28b   :  { %v1216_v55 = vpop.f32.mrf.mxu0  ;;  %v1385_v58 = vpop.f32.mrf.mxu1 }
 0x28c   :  { %1425 = vst.msk [vmem:[#allocation4 + $0x58] sm:$0xff] %vm74_vm0, %v1391_v59  ;;  %1255 = vst.msk [vmem:[#allocation3 + $0x50] sm:$0xff] %vm74_vm0, %v1216_v55  ;;  %v1386_v54 = vadd.f32 %v1385_v58, %v5369_v8  ;;  %v5465_v59 = vmul.f32 0.03125, %v1887_v34  ;;  %v1635_v55 = vld [vmem:[#allocation3 + $0x18] sm:$0xff]  ;;  %v2026_v3 = vmul.f32 %v5463_v17, %v5463_v17 }
 0x28e   :  { %1424 = vst.msk [vmem:[#allocation4 + $0x50] sm:$0xff] %vm74_vm0, %v1386_v54  ;;  %v1653_v54 = vsub.f32 %v5402_v48, %v1635_v55 }
 0x291   :  { %v4132_v63 = vpop.f32.mrf.mxu0  ;;  %v4164_v14 = vpop.f32.mrf.mxu1 }
 0x292   :  { %1258 = vst.msk [vmem:[#allocation3 + $0x68] sm:$0xff] %vm74_vm0, %v4132_v63  ;;  %v1401_v25 = vadd.f32 %v4164_v14, %v5369_v8  ;;  %v2204_v63 = vmul.f32 %v5457_v49, %v5459_v2  ;;  %v5472_v14 = vld [vmem:[#allocation6] sm:$0xff] }
 0x293   :  { %v1226_v40 = vpop.f32.mrf.mxu0  ;;  %v1395_v1 = vpop.f32.mrf.mxu1 }
 0x294   :  { %1427 = vst.msk [vmem:[#allocation4 + $0x68] sm:$0xff] %vm74_vm0, %v1401_v25  ;;  %1257 = vst.msk [vmem:[#allocation3 + $0x60] sm:$0xff] %vm74_vm0, %v1226_v40  ;;  %v1396_v20 = vadd.f32 %v1395_v1, %v5369_v8  ;;  %v2087_v25 = vadd.f32 1e-05, %v2055_v51  ;;  %v2010_v40 = vmul.f32 0.03125, %v1970_v36  ;;  %v2009_v1 = vmul.f32 0.03125, %v1967_v16 }
 0x295   :  { %v4332_v7 = vpop.eup %4331 }
 0x296   :  { %1426 = vst.msk [vmem:[#allocation4 + $0x60] sm:$0xff] %vm74_vm0, %v1396_v20  ;;  %v1647_v45 = vadd.f32 1.0, %v4332_v7  ;;  %v1634_v20 = vld [vmem:[#allocation3 + $0x10] sm:$0xff] }
 0x297   :  { %v4334_v50 = vpop.eup %4333  ;;  %v1652_v7 = vsub.f32 %v5410_v47, %v1634_v20 }
 0x298   :  { %4335 = vrcp.f32 %v1647_v45  ;;  %v1646_v27 = vadd.f32 1.0, %v4334_v50 }
 0x299   :  { %v4135_v23 = vpop.f32.mrf.mxu0  ;;  %v4167_v6 = vpop.f32.mrf.mxu1 }
 0x29a   :  { %1260 = vst.msk [vmem:[#allocation3 + $0x78] sm:$0xff] %vm74_vm0, %v4135_v23  ;;  %v1411_v26 = vadd.f32 %v4167_v6, %v5369_v8  ;;  %4337 = vrcp.f32 %v1646_v27  ;;  %v2025_v23 = vmul.f32 %v5465_v59, %v5465_v59 }
 0x29b   :  { %v1236_v21 = vpop.f32.mrf.mxu0  ;;  %v1405_v28 = vpop.f32.mrf.mxu1 }
 0x29c   :  { %1429 = vst.msk [vmem:[#allocation4 + $0x78] sm:$0xff] %vm74_vm0, %v1411_v26  ;;  %1259 = vst.msk [vmem:[#allocation3 + $0x70] sm:$0xff] %vm74_vm0, %v1236_v21  ;;  %v1406_v33 = vadd.f32 %v1405_v28, %v5369_v8  ;;  %v2056_v8 = vmax.f32 %v2040_v60, 0.0  ;;  %v2203_v26 = vmul.f32 %v5457_v49, %v5472_v14  ;;  %v2042_v28 = vsub.f32 %v2010_v40, %v2026_v3 }
 0x29d   :  { %v4178_v37 = vpop.f32.mrf.mxu0  ;;  %v2041_v60 = vsub.f32 %v2009_v1, %v2025_v23 }
 0x29e   :  { %1428 = vst.msk [vmem:[#allocation4 + $0x70] sm:$0xff] %vm74_vm0, %v1406_v33  ;;  %v1510_v39 = vadd.f32 %v4178_v37, %v5440_v4  ;;  %v2088_v44 = vadd.f32 1e-05, %v2056_v8 }
 0x29f   :  { %v1504_v42 = vpop.f32.mrf.mxu0 }
 0x2a0   :  { %1584 = vst.msk [vmem:[#allocation5 + $0x8] sm:$0xff] %vm74_vm0, %v1510_v39  ;;  %v1505_v43 = vadd.f32 %v1504_v42, %v5440_v4  ;;  %4339 = vrsqrt.f32 %v2088_v44  ;;  %v1663_v39 = vld [vmem:[#allocation4 + $0x28] sm:$0xff] }
 0x2a1   :  { %v4181_v31 = vpop.f32.mrf.mxu0  ;;  %4341 = vrsqrt.f32 %v2087_v25 }
 0x2a2   :  { %1583 = vst.msk [vmem:[#allocation5] sm:$0xff] %vm74_vm0, %v1505_v43  ;;  %v1520_v53 = vadd.f32 %v4181_v31, %v5440_v4  ;;  %v2058_v31 = vmax.f32 %v2042_v28, 0.0 }
 0x2a3   :  { %v1514_v24 = vpop.f32.mrf.mxu0 }
 0x2a4   :  { %1586 = vst.msk [vmem:[#allocation5 + $0x18] sm:$0xff] %vm74_vm0, %v1520_v53  ;;  %v1515_v38 = vadd.f32 %v1514_v24, %v5440_v4  ;;  %v1662_v53 = vld [vmem:[#allocation4 + $0x20] sm:$0xff]  ;;  %v2057_v24 = vmax.f32 %v2041_v60, 0.0 }
 0x2a5   :  { %v4184_v58 = vpop.f32.mrf.mxu0  ;;  %v4336_v15 = vpop.eup %4335 }
 0x2a6   :  { %1585 = vst.msk [vmem:[#allocation5 + $0x10] sm:$0xff] %vm74_vm0, %v1515_v38  ;;  %v1530_v62 = vadd.f32 %v4184_v58, %v5440_v4  ;;  %v1655_v56 = vmul.f32 %v4336_v15, %v1653_v54  ;;  %v2090_v54 = vadd.f32 1e-05, %v2058_v31  ;;  %v2089_v15 = vadd.f32 1e-05, %v2057_v24 }
 0x2a7   :  { %v1524_v0 = vpop.f32.mrf.mxu0  ;;  %v2184_v11 = vld [vmem:[#allocation5 + $0x8] sm:$0xff]  ;;  %v4338_v50 = vpop.eup %4337 }
 0x2a8   :  { %1588 = vst.msk [vmem:[#allocation5 + $0x28] sm:$0xff] %vm74_vm0, %v1530_v62  ;;  %v1525_v48 = vadd.f32 %v1524_v0, %v5440_v4  ;;  %v2220_v45 = vadd.f32 %v2204_v63, %v2184_v11  ;;  %v5483_v47 = vadd.f32 %v1655_v56, %v1635_v55  ;;  %v1654_v19 = vmul.f32 %v4338_v50, %v1652_v7 }
 0x2a9   :  { %v4187_v6 = vpop.f32.mrf.mxu0  ;;  %v2183_v27 = vld [vmem:[#allocation5] sm:$0xff] }
 0x2aa   :  { %1587 = vst.msk [vmem:[#allocation5 + $0x20] sm:$0xff] %vm74_vm0, %v1525_v48  ;;  %v1540_v5 = vadd.f32 %v4187_v6, %v5440_v4  ;;  %v3812_v21 = vmul.f32 -1.442695, %v2220_v45  ;;  %v2219_v35 = vadd.f32 %v2203_v26, %v2183_v27  ;;  %1660 = vst.msk [vmem:[#allocation6 + $0x18] sm:$0xff] %vm74_vm0, %v5483_v47  ;;  %v1668_v37 = vmul.f32 %v5483_v47, %v5378_v9  ;;  %v5519_v26 = vld [vmem:[#allocation2 + $0x8] sm:$0xff] }
 0x2ab   :  { %v1534_v33 = vpop.f32.mrf.mxu0  ;;  %v5491_v32 = vadd.f32 %v1654_v19, %v1634_v20  ;;  %v2186_v20 = vld [vmem:[#allocation5 + $0x18] sm:$0xff]  ;;  %v2072_v19 = vsub.f32 %v5519_v26, %v5433_v57 }
 0x2ac   :  { %1590 = vst.msk [vmem:[#allocation5 + $0x38] sm:$0xff] %vm74_vm0, %v1540_v5  ;;  %v1535_v34 = vadd.f32 %v1534_v33, %v5440_v4  ;;  %4343 = vpow2.f32 %v3812_v21  ;;  %v3811_v41 = vmul.f32 -1.442695, %v2219_v35  ;;  %v1670_v42 = vadd.f32 %v1668_v37, %v1663_v39  ;;  %v5526_v35 = vld [vmem:[#allocation2] sm:$0xff] }
 0x2ad   :  { %v4190_v61 = vpop.f32.mrf.mxu0  ;;  %1659 = vst.msk [vmem:[#allocation6 + $0x10] sm:$0xff] %vm74_vm0, %v5491_v32  ;;  %v1667_v43 = vmul.f32 %v5491_v32, %v5378_v9  ;;  %v4340_v11 = vpop.eup %4339  ;;  %v2185_v50 = vld [vmem:[#allocation5 + $0x10] sm:$0xff]  ;;  %v2071_v60 = vsub.f32 %v5526_v35, %v5435_v52 }
 0x2ae   :  { %1589 = vst.msk [vmem:[#allocation5 + $0x30] sm:$0xff] %vm74_vm0, %v1535_v34  ;;  %v1550_v8 = vadd.f32 %v4190_v61, %v5440_v4  ;;  %4345 = vpow2.f32 %v3811_v41  ;;  %v3800_v36 = vmul.f32 -1.442695, %v1670_v42  ;;  %v4342_v3 = vpop.eup %4341  ;;  %v2120_v34 = vmul.f32 %v4340_v11, %v2072_v19 }
 0x2af   :  { %v1544_v51 = vpop.f32.mrf.mxu0  ;;  %v1669_v16 = vadd.f32 %v1667_v43, %v1662_v53  ;;  %v2119_v61 = vmul.f32 %v4342_v3, %v2071_v60 }
 0x2b0   :  { %1592 = vst.msk [vmem:[#allocation5 + $0x48] sm:$0xff] %vm74_vm0, %v1550_v8  ;;  %v1545_v38 = vadd.f32 %v1544_v51, %v5440_v4  ;;  %4347 = vpow2.f32 %v3800_v36  ;;  %v2136_v43 = vmul.f32 %v2120_v34, %v5142_v18 }
 0x2b1   :  { %v4193_v44 = vpop.f32.mrf.mxu0  ;;  %v3799_v55 = vmul.f32 -1.442695, %v1669_v16  ;;  %v5505_v63 = vld [vmem:[#allocation6 + $0x18] sm:$0xff]  ;;  %v2135_v31 = vmul.f32 %v2119_v61, %v5142_v18 }
 0x2b2   :  { %1591 = vst.msk [vmem:[#allocation5 + $0x40] sm:$0xff] %vm74_vm0, %v1545_v38  ;;  %v1560_v58 = vadd.f32 %v4193_v44, %v5440_v4  ;;  %v2206_v40 = vmul.f32 %v5457_v49, %v5505_v63  ;;  %v2152_v53 = vadd.f32 %v2136_v43, %v5150_v22  ;;  %v5538_v16 = vld [vmem:[#allocation2 + $0x18] sm:$0xff]  ;;  %v1896_v44 = vpop.xlane.xlu1 %1895 }
 0x2b3   :  { %v1554_v62 = vpop.f32.mrf.mxu0  ;;  %4349 = vpow2.f32 %v3799_v55  ;;  %v2151_v24 = vadd.f32 %v2135_v31, %v5150_v22  ;;  %v2074_v38 = vsub.f32 %v5538_v16, %v5463_v17  ;;  %v2397_v55 = vsub.s32 7, %v4833_v29 }
 0x2b4   :  { %1594 = vst.msk [vmem:[#allocation5 + $0x58] sm:$0xff] %vm74_vm0, %v1560_v58  ;;  %v1555_v25 = vadd.f32 %v1554_v62, %v5440_v4  ;;  %v5511_v0 = vld [vmem:[#allocation6 + $0x10] sm:$0xff]  ;;  %v2222_v56 = vadd.f32 %v2206_v40, %v2186_v20  ;;  %4351 = vrsqrt.f32 %v2090_v54  ;;  %v2168_v54 = vmul.f32 1.1272403, %v2152_v53 }
 0x2b5   :  { %v4196_v1 = vpop.f32.mrf.mxu0  ;;  %v2205_v48 = vmul.f32 %v5457_v49, %v5511_v0  ;;  %4353 = vrsqrt.f32 %v2089_v15  ;;  %v2415_v62 = vsub.f32 1.0, %v5366_v46 }
 0x2b6   :  { %1593 = vst.msk [vmem:[#allocation5 + $0x50] sm:$0xff] %vm74_vm0, %v1555_v25  ;;  %v1570_v7 = vadd.f32 %v4196_v1, %v5440_v4  ;;  %v3814_v6 = vmul.f32 -1.442695, %v2222_v56  ;;  %4355 = vtanh.f32 %v5459_v2  ;;  %v5545_v25 = vld [vmem:[#allocation2 + $0x10] sm:$0xff]  ;;  %v1893_v1 = vpop.xlane.xlu0 %1892  ;;  %v2167_v56 = vmul.f32 1.1272403, %v2151_v24 }
 0x2b7   :  { %v1564_v45 = vpop.f32.mrf.mxu0  ;;  %v2221_v27 = vadd.f32 %v2205_v48, %v2185_v50  ;;  %v2073_v40 = vsub.f32 %v5545_v25, %v5465_v59 }
 0x2b8   :  { %1596 = vst.msk [vmem:[#allocation5 + $0x68] sm:$0xff] %vm74_vm0, %v1570_v7  ;;  %v1565_v23 = vadd.f32 %v1564_v45, %v5440_v4  ;;  %4357 = vpow2.f32 %v3814_v6 }
 0x2b9   :  { %v4199_v5 = vpop.f32.mrf.mxu0  ;;  %v4344_v21 = vpop.eup %4343  ;;  %v3813_v33 = vmul.f32 -1.442695, %v2221_v27  ;;  %4359 = vtanh.f32 %v5472_v14 }
 0x2ba   :  { %1595 = vst.msk [vmem:[#allocation5 + $0x60] sm:$0xff] %vm74_vm0, %v1565_v23  ;;  %v1580_v28 = vadd.f32 %v4199_v5, %v5440_v4  ;;  %v2284_v39 = vadd.f32 1.0, %v4344_v21  ;;  %v5553_v23 = vrot.slane %v2415_v62, %v2397_v55  ;;  %v1976_v27 = vpop.xlane.xlu1 %1975  ;;  %v1666_v5 = vld [vmem:[#allocation3 + $0x28] sm:$0xff] }
 0x2bb   :  { %v1574_v37 = vpop.f32.mrf.mxu0  ;;  %v4346_v57 = vpop.eup %4345  ;;  %4361 = vpow2.f32 %v3813_v33 }
 0x2bc   :  { %1598 = vst.msk [vmem:[#allocation5 + $0x78] sm:$0xff] %vm74_vm0, %v1580_v28  ;;  %v1575_v2 = vadd.f32 %v1574_v37, %v5440_v4  ;;  %4363 = vrcp.f32 %v2284_v39  ;;  %v2283_v41 = vadd.f32 1.0, %v4346_v57  ;;  %v1973_v33 = vpop.xlane.xlu0 %1972  ;;  %v5562_v39 = vmul.f32 0.03125, %v1893_v1 }
 0x2bd   :  { %v4348_v42 = vpop.eup %4347  ;;  %v2012_v57 = vmul.f32 0.03125, %v1976_v27  ;;  %v2011_v31 = vmul.f32 0.03125, %v1973_v33 }
 0x2be   :  { %1597 = vst.msk [vmem:[#allocation5 + $0x70] sm:$0xff] %vm74_vm0, %v1575_v2  ;;  %4365 = vrcp.f32 %v2283_v41  ;;  %v1678_v52 = vadd.f32 1.0, %v4348_v42  ;;  %v1665_v2 = vld [vmem:[#allocation3 + $0x20] sm:$0xff] }
 0x2bf   :  { %v1683_v42 = vsub.f32 %v5491_v32, %v1665_v2 }
 0x2c0   :  { %v4350_v8 = vpop.eup %4349  ;;  %4367 = vrcp.f32 %v1678_v52 }
 0x2c1   :  { %v1677_v14 = vadd.f32 1.0, %v4350_v8  ;;  %v4352_v51 = vpop.eup %4351 }
 0x2c2   :  { %v4354_v4 = vpop.eup %4353  ;;  %v2122_v20 = vmul.f32 %v4352_v51, %v2074_v38 }
 0x2c3   :  { %4369 = vrcp.f32 %v1677_v14  ;;  %v4356_v36 = vpop.eup %4355  ;;  %v2121_v45 = vmul.f32 %v4354_v4, %v2073_v40  ;;  %v1694_v40 = vld [vmem:[#allocation4 + $0x38] sm:$0xff] }
 0x2c4   :  { %4371 = vtanh.f32 %v5505_v63  ;;  %v2348_v7 = vsub.f32 %v4356_v36, %v2168_v54  ;;  %v5551_v63 = vrot.slane %v5366_v46, %v2397_v55  ;;  %v2138_v19 = vmul.f32 %v2122_v20, %v5142_v18 }
 0x2c5   :  { %v4358_v58 = vpop.eup %4357  ;;  %4373 = vtanh.f32 %v5511_v0  ;;  %v5556_v0 = vmul.f32 0.03125, %v1896_v44  ;;  %v1684_v46 = vsub.f32 %v5483_v47, %v1666_v5  ;;  %v2137_v37 = vmul.f32 %v2121_v45, %v5142_v18 }
 0x2c6   :  { %v4360_v15 = vpop.eup %4359  ;;  %v2286_v11 = vadd.f32 1.0, %v4358_v58  ;;  %v2400_v60 = vmul.f32 %v5519_v26, %v5551_v63  ;;  %v2399_v52 = vmul.f32 %v5526_v35, %v5551_v63  ;;  %v2154_v47 = vadd.f32 %v2138_v19, %v5150_v22 }
 0x2c7   :  { %v2347_v6 = vsub.f32 %v4360_v15, %v2167_v56  ;;  %v2028_v26 = vmul.f32 %v5556_v0, %v5556_v0  ;;  %v2153_v32 = vadd.f32 %v2137_v37, %v5150_v22  ;;  %v2027_v35 = vmul.f32 %v5562_v39, %v5562_v39 }
 0x2c8   :  { %v4362_v17 = vpop.eup %4361  ;;  %4375 = vrcp.f32 %v2286_v11  ;;  %v2402_v37 = vmul.f32 %v5538_v16, %v5551_v63 }
 0x2c9   :  { %v4364_v48 = vpop.eup %4363  ;;  %v2285_v50 = vadd.f32 1.0, %v4362_v17  ;;  %v2044_v36 = vsub.f32 %v2012_v57, %v2028_v26  ;;  %v2043_v15 = vsub.f32 %v2011_v31, %v2027_v35  ;;  %v2187_v31 = vld [vmem:[#allocation5 + $0x20] sm:$0xff] }
 0x2ca   :  { %v2364_v3 = vmul.f32 %v4364_v48, %v2348_v7 }
 0x2cb   :  { %v4366_v59 = vpop.eup %4365  ;;  %4377 = vrcp.f32 %v2285_v50  ;;  %v2060_v45 = vmax.f32 %v2044_v36, 0.0  ;;  %v1693_v50 = vld [vmem:[#allocation4 + $0x30] sm:$0xff] }
 0x2cc   :  { %v2380_v21 = vadd.f32 %v2364_v3, %v2168_v54  ;;  %v2363_v28 = vmul.f32 %v4366_v59, %v2347_v6  ;;  %v2170_v54 = vmul.f32 1.1272403, %v2154_v47 }
 0x2cd   :  { %v4368_v34 = vpop.eup %4367 }
 0x2ce   :  { %v2421_v61 = vmul.f32 %v5553_v23, %v2380_v21  ;;  %v2379_v41 = vadd.f32 %v2363_v28, %v2167_v56  ;;  %v1686_v43 = vmul.f32 %v4368_v34, %v1684_v46  ;;  %v2169_v56 = vmul.f32 1.1272403, %v2153_v32 }
 0x2cf   :  { %v2059_v21 = vmax.f32 %v2043_v15, 0.0 }
 0x2d0   :  { %v4370_v8 = vpop.eup %4369  ;;  %v5571_v14 = vadd.f32 %v2421_v61, %v2400_v60  ;;  %v2420_v53 = vmul.f32 %v5553_v23, %v2379_v41  ;;  %v5574_v51 = vadd.f32 %v1686_v43, %v1666_v5  ;;  %v2092_v60 = vadd.f32 1e-05, %v2060_v45  ;;  %v2188_v43 = vld [vmem:[#allocation5 + $0x28] sm:$0xff]  ;;  %v1899_v45 = vpop.xlane.xlu0 %1898 }
 0x2d1   :  { %v1685_v4 = vmul.f32 %v4370_v8, %v1683_v42  ;;  %v4372_v24 = vpop.eup %4371  ;;  %v2091_v41 = vadd.f32 1e-05, %v2059_v21  ;;  %v2401_v42 = vmul.f32 %v5545_v25, %v5551_v63  ;;  %v1697_v21 = vld [vmem:[#allocation3 + $0x38] sm:$0xff] }
 0x2d2   :  { %v2453_v38 = vmul.f32 %v5571_v14, %v5571_v14  ;;  %v5581_v44 = vadd.f32 %v2420_v53, %v2399_v52  ;;  %1691 = vst.msk [vmem:[#allocation6 + $0x28] sm:$0xff] %vm74_vm0, %v5574_v51  ;;  %v1699_v55 = vmul.f32 %v5574_v51, %v5378_v9  ;;  %v4374_v62 = vpop.eup %4373  ;;  %v2350_v7 = vsub.f32 %v4372_v24, %v2170_v54 }
 0x2d3   :  { %v5587_v58 = vadd.f32 %v1685_v4, %v1665_v2  ;;  %v2349_v19 = vsub.f32 %v4374_v62, %v2169_v56 }
 0x2d4   :  { %v2471_v1 = vsel %vm74_vm0, %v2453_v38, 0.0  ;;  %v2452_v20 = vmul.f32 %v5581_v44, %v5581_v44  ;;  %v1701_v11 = vadd.f32 %v1699_v55, %v1694_v40 }
 0x2d5   :  { %1690 = vst.msk [vmem:[#allocation6 + $0x20] sm:$0xff] %vm74_vm0, %v5587_v58  ;;  %v1698_v17 = vmul.f32 %v5587_v58, %v5378_v9  ;;  %2472 = vadd.xlane.f32.xlu1 %v2471_v1  ;;  %v4376_v48 = vpop.eup %4375 }
 0x2d6   :  { %v2468_v3 = vsel %vm74_vm0, %v2452_v20, 0.0  ;;  %v3802_v6 = vmul.f32 -1.442695, %v1701_v11  ;;  %v2366_v27 = vmul.f32 %v4376_v48, %v2350_v7  ;;  %v5615_v20 = vld [vmem:[#allocation2 + $0x28] sm:$0xff] }
 0x2d7   :  { %v1700_v59 = vadd.f32 %v1698_v17, %v1693_v50  ;;  %2469 = vadd.xlane.f32.xlu0 %v2468_v3  ;;  %v2076_v11 = vsub.f32 %v5615_v20, %v5556_v0  ;;  %v1902_v17 = vpop.xlane.xlu1 %1901 }
 0x2d8   :  { %v4378_v5 = vpop.eup %4377  ;;  %4379 = vpow2.f32 %v3802_v6  ;;  %v2382_v33 = vadd.f32 %v2366_v27, %v2170_v54  ;;  %v5624_v0 = vmul.f32 0.03125, %v1902_v17 }
 0x2d9   :  { %v3801_v28 = vmul.f32 -1.442695, %v1700_v59  ;;  %v2365_v46 = vmul.f32 %v4378_v5, %v2349_v19  ;;  %v1852_v34 = vld [vmem:[#allocation6 + $0x28] sm:$0xff] }
 0x2da   :  { %v2423_v57 = vmul.f32 %v5553_v23, %v2382_v33  ;;  %v2208_v61 = vmul.f32 %v5457_v49, %v1852_v34  ;;  %v1715_v33 = vsub.f32 %v5574_v51, %v1697_v21 }
 0x2db   :  { %4381 = vpow2.f32 %v3801_v28  ;;  %v2381_v2 = vadd.f32 %v2365_v46, %v2169_v56  ;;  %v5619_v56 = vld [vmem:[#allocation2 + $0x20] sm:$0xff]  ;;  %v1982_v19 = vpop.xlane.xlu1 %1981  ;;  %v1979_v28 = vpop.xlane.xlu0 %1978 }
 0x2dc   :  { %v1851_v52 = vld [vmem:[#allocation6 + $0x20] sm:$0xff]  ;;  %v5603_v47 = vadd.f32 %v2423_v57, %v2402_v37  ;;  %v2224_v26 = vadd.f32 %v2208_v61, %v2188_v43  ;;  %4383 = vrsqrt.f32 %v2092_v60  ;;  %v2075_v48 = vsub.f32 %v5619_v56, %v5562_v39 }
 0x2dd   :  { %v2422_v8 = vmul.f32 %v5553_v23, %v2381_v2  ;;  %v2207_v16 = vmul.f32 %v5457_v49, %v1851_v52  ;;  %4385 = vrsqrt.f32 %v2091_v41  ;;  %v5628_v60 = vmul.f32 0.03125, %v1899_v45 }
 0x2de   :  { %v2455_v53 = vmul.f32 %v5603_v47, %v5603_v47  ;;  %v3816_v32 = vmul.f32 -1.442695, %v2224_v26  ;;  %v2014_v37 = vmul.f32 0.03125, %v1982_v19  ;;  %v2013_v43 = vmul.f32 0.03125, %v1979_v28 }
 0x2df   :  { %v5609_v4 = vadd.f32 %v2422_v8, %v2401_v42  ;;  %v2223_v24 = vadd.f32 %v2207_v16, %v2187_v31  ;;  %v2030_v42 = vmul.f32 %v5624_v0, %v5624_v0  ;;  %v2029_v16 = vmul.f32 %v5628_v60, %v5628_v60 }
 0x2e0   :  { %v2477_v25 = vsel %vm74_vm0, %v2455_v53, 0.0  ;;  %4387 = vpow2.f32 %v3816_v32 }
 0x2e1   :  { %v2454_v35 = vmul.f32 %v5609_v4, %v5609_v4  ;;  %v3815_v36 = vmul.f32 -1.442695, %v2223_v24  ;;  %2478 = vadd.xlane.f32.xlu1 %v2477_v25  ;;  %v2046_v31 = vsub.f32 %v2014_v37, %v2030_v42  ;;  %v2045_v25 = vsub.f32 %v2013_v43, %v2029_v16 }
 0x2e3   :  { %v2474_v38 = vsel %vm74_vm0, %v2454_v35, 0.0  ;;  %4389 = vpow2.f32 %v3815_v36  ;;  %v1725_v35 = vld [vmem:[#allocation4 + $0x48] sm:$0xff]  ;;  %v2061_v45 = vmax.f32 %v2045_v25, 0.0 }
 0x2e4   :  { %2475 = vadd.xlane.f32.xlu0 %v2474_v38 }
 0x2e5   :  { %v4380_v55 = vpop.eup %4379 }
 0x2e6   :  { %v1709_v54 = vadd.f32 1.0, %v4380_v55 }
 0x2e8   :  { %v4382_v62 = vpop.eup %4381  ;;  %4391 = vrcp.f32 %v1709_v54 }
 0x2e9   :  { %v1708_v15 = vadd.f32 1.0, %v4382_v62  ;;  %v4384_v40 = vpop.eup %4383 }
 0x2ea   :  { %v4386_v1 = vpop.eup %4385  ;;  %v2124_v50 = vmul.f32 %v4384_v40, %v2076_v11  ;;  %v1724_v40 = vld [vmem:[#allocation4 + $0x40] sm:$0xff] }
 0x2eb   :  { %4393 = vrcp.f32 %v1708_v15  ;;  %v2123_v59 = vmul.f32 %v4386_v1, %v2075_v48  ;;  %v2062_v15 = vmax.f32 %v2046_v31, 0.0 }
 0x2ec   :  { %4395 = vtanh.f32 %v1852_v34  ;;  %v2140_v5 = vmul.f32 %v2124_v50, %v5142_v18  ;;  %v1696_v34 = vld [vmem:[#allocation3 + $0x30] sm:$0xff] }
 0x2ed   :  { %v4388_v7 = vpop.eup %4387  ;;  %4397 = vtanh.f32 %v1851_v52  ;;  %v2139_v39 = vmul.f32 %v2123_v59, %v5142_v18  ;;  %v1714_v57 = vsub.f32 %v5587_v58, %v1696_v34  ;;  %v2094_v59 = vadd.f32 1e-05, %v2062_v15 }
 0x2ee   :  { %v2288_v3 = vadd.f32 1.0, %v4388_v7  ;;  %v2156_v61 = vadd.f32 %v2140_v5, %v5150_v22 }
 0x2ef   :  { %v2155_v8 = vadd.f32 %v2139_v39, %v5150_v22  ;;  %v2403_v39 = vmul.f32 %v5619_v56, %v5551_v63 }
 0x2f0   :  { %v4390_v6 = vpop.eup %4389  ;;  %4399 = vrcp.f32 %v2288_v3  ;;  %v2172_v32 = vmul.f32 1.1272403, %v2156_v61  ;;  %v2189_v61 = vld [vmem:[#allocation5 + $0x30] sm:$0xff] }
 0x2f1   :  { %v2287_v27 = vadd.f32 1.0, %v4390_v6  ;;  %v2171_v54 = vmul.f32 1.1272403, %v2155_v8 }
 0x2f3   :  { %4401 = vrcp.f32 %v2287_v27  ;;  %v2404_v27 = vmul.f32 %v5615_v20, %v5551_v63 }
 0x2f5   :  { %v4392_v46 = vpop.eup %4391 }
 0x2f6   :  { %v1717_v2 = vmul.f32 %v4392_v46, %v1715_v33  ;;  %v2093_v33 = vadd.f32 1e-05, %v2061_v45  ;;  %v2190_v46 = vld [vmem:[#allocation5 + $0x38] sm:$0xff] }
 0x2f8   :  { %v4394_v41 = vpop.eup %4393  ;;  %v5634_v52 = vadd.f32 %v1717_v2, %v1697_v21 }
 0x2f9   :  { %v1716_v51 = vmul.f32 %v4394_v41, %v1714_v57  ;;  %v4396_v26 = vpop.eup %4395 }
 0x2fa   :  { %1722 = vst.msk [vmem:[#allocation6 + $0x38] sm:$0xff] %vm74_vm0, %v5634_v52  ;;  %v1730_v58 = vmul.f32 %v5634_v52, %v5378_v9  ;;  %v4398_v24 = vpop.eup %4397  ;;  %v2352_v55 = vsub.f32 %v4396_v26, %v2172_v32 }
 0x2fb   :  { %v5643_v53 = vadd.f32 %v1716_v51, %v1696_v34  ;;  %v2351_v7 = vsub.f32 %v4398_v24, %v2171_v54 }
 0x2fc   :  { %v1732_v36 = vadd.f32 %v1730_v58, %v1725_v35 }
 0x2fd   :  { %1721 = vst.msk [vmem:[#allocation6 + $0x30] sm:$0xff] %vm74_vm0, %v5643_v53  ;;  %v1729_v38 = vmul.f32 %v5643_v53, %v5378_v9  ;;  %v4400_v62 = vpop.eup %4399 }
 0x2fe   :  { %v3804_v1 = vmul.f32 -1.442695, %v1732_v36  ;;  %v2368_v17 = vmul.f32 %v4400_v62, %v2352_v55  ;;  %v5667_v36 = vld [vmem:[#allocation2 + $0x38] sm:$0xff]  ;;  %v1908_v55 = vpop.xlane.xlu1 %1907  ;;  %v5671_v62 = vld [vmem:[#allocation2 + $0x30] sm:$0xff] }
 0x2ff   :  { %v1731_v11 = vadd.f32 %v1729_v38, %v1724_v40  ;;  %v2078_v38 = vsub.f32 %v5667_v36, %v5624_v0  ;;  %v2077_v15 = vsub.f32 %v5671_v62, %v5628_v60  ;;  %v1905_v40 = vpop.xlane.xlu0 %1904  ;;  %v5676_v0 = vmul.f32 0.03125, %v1908_v55 }
 0x300   :  { %v4402_v48 = vpop.eup %4401  ;;  %4403 = vpow2.f32 %v3804_v1  ;;  %v2384_v3 = vadd.f32 %v2368_v17, %v2172_v32 }
 0x301   :  { %v3803_v50 = vmul.f32 -1.442695, %v1731_v11  ;;  %v2367_v6 = vmul.f32 %v4402_v48, %v2351_v7  ;;  %v1854_v19 = vld [vmem:[#allocation6 + $0x38] sm:$0xff] }
 0x302   :  { %v2425_v5 = vmul.f32 %v5553_v23, %v2384_v3  ;;  %v2210_v28 = vmul.f32 %v5457_v49, %v1854_v19  ;;  %v1988_v45 = vpop.xlane.xlu1 %1987  ;;  %v1728_v3 = vld [vmem:[#allocation3 + $0x48] sm:$0xff] }
 0x303   :  { %4405 = vpow2.f32 %v3803_v50  ;;  %v2383_v21 = vadd.f32 %v2367_v6, %v2171_v54  ;;  %v1985_v6 = vpop.xlane.xlu0 %1984 }
 0x304   :  { %v1853_v37 = vld [vmem:[#allocation6 + $0x30] sm:$0xff]  ;;  %v5655_v34 = vadd.f32 %v2425_v5, %v2404_v27  ;;  %v2226_v2 = vadd.f32 %v2210_v28, %v2190_v46  ;;  %4407 = vrsqrt.f32 %v2094_v59  ;;  %v1746_v59 = vsub.f32 %v5634_v52, %v1728_v3 }
 0x305   :  { %v2424_v57 = vmul.f32 %v5553_v23, %v2383_v21  ;;  %v2209_v20 = vmul.f32 %v5457_v49, %v1853_v37  ;;  %4409 = vrsqrt.f32 %v2093_v33  ;;  %v2016_v5 = vmul.f32 0.03125, %v1988_v45  ;;  %v1727_v21 = vld [vmem:[#allocation3 + $0x40] sm:$0xff] }
 0x306   :  { %v2457_v41 = vmul.f32 %v5655_v34, %v5655_v34  ;;  %v3818_v43 = vmul.f32 -1.442695, %v2226_v2  ;;  %v1745_v28 = vsub.f32 %v5643_v53, %v1727_v21 }
 0x307   :  { %v5661_v42 = vadd.f32 %v2424_v57, %v2403_v39  ;;  %v2225_v51 = vadd.f32 %v2209_v20, %v2189_v61  ;;  %v2015_v57 = vmul.f32 0.03125, %v1985_v6 }
 0x308   :  { %v2483_v56 = vsel %vm74_vm0, %v2457_v41, 0.0  ;;  %4411 = vpow2.f32 %v3818_v43 }
 0x309   :  { %v2456_v8 = vmul.f32 %v5661_v42, %v5661_v42  ;;  %v3817_v26 = vmul.f32 -1.442695, %v2225_v51  ;;  %2484 = vadd.xlane.f32.xlu1 %v2483_v56 }
 0x30b   :  { %v2480_v16 = vsel %vm74_vm0, %v2456_v8, 0.0  ;;  %4413 = vpow2.f32 %v3817_v26 }
 0x30c   :  { %2481 = vadd.xlane.f32.xlu0 %v2480_v16  ;;  %v1756_v16 = vld [vmem:[#allocation4 + $0x58] sm:$0xff] }
 0x30d   :  { %v4404_v31 = vpop.eup %4403 }
 0x30e   :  { %v1740_v58 = vadd.f32 1.0, %v4404_v31 }
 0x310   :  { %v4406_v32 = vpop.eup %4405  ;;  %4415 = vrcp.f32 %v1740_v58 }
 0x311   :  { %v1739_v24 = vadd.f32 1.0, %v4406_v32  ;;  %v4408_v25 = vpop.eup %4407 }
 0x312   :  { %v4410_v35 = vpop.eup %4409  ;;  %v2126_v1 = vmul.f32 %v4408_v25, %v2078_v38  ;;  %v1755_v38 = vld [vmem:[#allocation4 + $0x50] sm:$0xff] }
 0x313   :  { %4417 = vrcp.f32 %v1739_v24  ;;  %v2125_v7 = vmul.f32 %v4410_v35, %v2077_v15 }
 0x314   :  { %4419 = vtanh.f32 %v1854_v19  ;;  %v2142_v50 = vmul.f32 %v2126_v1, %v5142_v18  ;;  %v5680_v19 = vmul.f32 0.03125, %v1905_v40 }
 0x315   :  { %v4412_v54 = vpop.eup %4411  ;;  %4421 = vtanh.f32 %v1853_v37  ;;  %v2141_v60 = vmul.f32 %v2125_v7, %v5142_v18  ;;  %v2032_v37 = vmul.f32 %v5676_v0, %v5676_v0 }
 0x316   :  { %v2290_v11 = vadd.f32 1.0, %v4412_v54  ;;  %v2158_v39 = vadd.f32 %v2142_v50, %v5150_v22  ;;  %v2031_v41 = vmul.f32 %v5680_v19, %v5680_v19  ;;  %v2406_v50 = vmul.f32 %v5667_v36, %v5551_v63 }
 0x317   :  { %v2157_v20 = vadd.f32 %v2141_v60, %v5150_v22  ;;  %v2048_v43 = vsub.f32 %v2016_v5, %v2032_v37  ;;  %v2405_v5 = vmul.f32 %v5671_v62, %v5551_v63  ;;  %v2191_v37 = vld [vmem:[#allocation5 + $0x40] sm:$0xff] }
 0x318   :  { %v4414_v17 = vpop.eup %4413  ;;  %4423 = vrcp.f32 %v2290_v11  ;;  %v2174_v56 = vmul.f32 1.1272403, %v2158_v39  ;;  %v2047_v26 = vsub.f32 %v2015_v57, %v2031_v41 }
 0x319   :  { %v2289_v48 = vadd.f32 1.0, %v4414_v17  ;;  %v2173_v24 = vmul.f32 1.1272403, %v2157_v20  ;;  %v2064_v35 = vmax.f32 %v2048_v43, 0.0 }
 0x31a   :  { %v2063_v11 = vmax.f32 %v2047_v26, 0.0 }
 0x31b   :  { %4425 = vrcp.f32 %v2289_v48  ;;  %v2096_v45 = vadd.f32 1e-05, %v2064_v35 }
 0x31d   :  { %v4416_v27 = vpop.eup %4415 }
 0x31e   :  { %v1748_v33 = vmul.f32 %v4416_v27, %v1746_v59  ;;  %v2095_v27 = vadd.f32 1e-05, %v2063_v11 }
 0x320   :  { %v4418_v46 = vpop.eup %4417  ;;  %v5686_v2 = vadd.f32 %v1748_v33, %v1728_v3 }
 0x321   :  { %v1747_v52 = vmul.f32 %v4418_v46, %v1745_v28  ;;  %v4420_v61 = vpop.eup %4419 }
 0x322   :  { %1753 = vst.msk [vmem:[#allocation6 + $0x48] sm:$0xff] %vm74_vm0, %v5686_v2  ;;  %v1761_v53 = vmul.f32 %v5686_v2, %v5378_v9  ;;  %v4422_v8 = vpop.eup %4421  ;;  %v2354_v32 = vsub.f32 %v4420_v61, %v2174_v56 }
 0x323   :  { %v5695_v51 = vadd.f32 %v1747_v52, %v1727_v21  ;;  %v2353_v40 = vsub.f32 %v4422_v8, %v2173_v24  ;;  %v2192_v21 = vld [vmem:[#allocation5 + $0x48] sm:$0xff] }
 0x324   :  { %v1763_v31 = vadd.f32 %v1761_v53, %v1756_v16 }
 0x325   :  { %1752 = vst.msk [vmem:[#allocation6 + $0x40] sm:$0xff] %vm74_vm0, %v5695_v51  ;;  %v1760_v58 = vmul.f32 %v5695_v51, %v5378_v9  ;;  %v4424_v25 = vpop.eup %4423 }
 0x326   :  { %v3806_v55 = vmul.f32 -1.442695, %v1763_v31  ;;  %v2370_v15 = vmul.f32 %v4424_v25, %v2354_v32  ;;  %v5719_v32 = vld [vmem:[#allocation2 + $0x48] sm:$0xff]  ;;  %v1914_v25 = vpop.xlane.xlu1 %1913 }
 0x327   :  { %v1762_v54 = vadd.f32 %v1760_v58, %v1755_v38  ;;  %v5723_v38 = vld [vmem:[#allocation2 + $0x40] sm:$0xff] }
 0x328   :  { %v4426_v1 = vpop.eup %4425  ;;  %4427 = vpow2.f32 %v3806_v55  ;;  %v2386_v7 = vadd.f32 %v2370_v15, %v2174_v56  ;;  %v2079_v55 = vsub.f32 %v5723_v38, %v5680_v19 }
 0x329   :  { %v3805_v17 = vmul.f32 -1.442695, %v1762_v54  ;;  %v2369_v48 = vmul.f32 %v4426_v1, %v2353_v40  ;;  %v1856_v3 = vld [vmem:[#allocation6 + $0x48] sm:$0xff]  ;;  %v1911_v54 = vpop.xlane.xlu0 %1910 }
 0x32a   :  { %v2427_v6 = vmul.f32 %v5553_v23, %v2386_v7  ;;  %v2212_v60 = vmul.f32 %v5457_v49, %v1856_v3  ;;  %v1994_v7 = vpop.xlane.xlu1 %1993 }
 0x32b   :  { %4429 = vpow2.f32 %v3805_v17  ;;  %v2385_v59 = vadd.f32 %v2369_v48, %v2173_v24  ;;  %v2080_v24 = vsub.f32 %v5719_v32, %v5676_v0  ;;  %v5728_v0 = vmul.f32 0.03125, %v1914_v25 }
 0x32c   :  { %v1855_v28 = vld [vmem:[#allocation6 + $0x40] sm:$0xff]  ;;  %v5707_v33 = vadd.f32 %v2427_v6, %v2406_v50  ;;  %v2228_v46 = vadd.f32 %v2212_v60, %v2192_v21  ;;  %4431 = vrsqrt.f32 %v2096_v45  ;;  %v1759_v45 = vld [vmem:[#allocation3 + $0x58] sm:$0xff]  ;;  %v2018_v60 = vmul.f32 0.03125, %v1994_v7 }
 0x32d   :  { %v2426_v39 = vmul.f32 %v5553_v23, %v2385_v59  ;;  %v2211_v36 = vmul.f32 %v5457_v49, %v1855_v28  ;;  %4433 = vrsqrt.f32 %v2095_v27  ;;  %v1991_v50 = vpop.xlane.xlu0 %1990  ;;  %v5732_v59 = vmul.f32 0.03125, %v1911_v54  ;;  %v1758_v27 = vld [vmem:[#allocation3 + $0x50] sm:$0xff] }
 0x32e   :  { %v2459_v57 = vmul.f32 %v5707_v33, %v5707_v33  ;;  %v3820_v20 = vmul.f32 -1.442695, %v2228_v46  ;;  %v2034_v46 = vmul.f32 %v5728_v0, %v5728_v0 }
 0x32f   :  { %v5713_v52 = vadd.f32 %v2426_v39, %v2405_v5  ;;  %v2227_v61 = vadd.f32 %v2211_v36, %v2191_v37  ;;  %v1776_v5 = vsub.f32 %v5695_v51, %v1758_v27  ;;  %v2017_v36 = vmul.f32 0.03125, %v1991_v50 }
 0x330   :  { %v2489_v62 = vsel %vm74_vm0, %v2459_v57, 0.0  ;;  %4435 = vpow2.f32 %v3820_v20  ;;  %v2408_v50 = vmul.f32 %v5719_v32, %v5551_v63 }
 0x331   :  { %v2458_v41 = vmul.f32 %v5713_v52, %v5713_v52  ;;  %v3819_v43 = vmul.f32 -1.442695, %v2227_v61  ;;  %2490 = vadd.xlane.f32.xlu1 %v2489_v62  ;;  %v2033_v61 = vmul.f32 %v5732_v59, %v5732_v59  ;;  %v2050_v62 = vsub.f32 %v2018_v60, %v2034_v46 }
 0x333   :  { %v2486_v53 = vsel %vm74_vm0, %v2458_v41, 0.0  ;;  %4437 = vpow2.f32 %v3819_v43  ;;  %v2066_v25 = vmax.f32 %v2050_v62, 0.0 }
 0x334   :  { %2487 = vadd.xlane.f32.xlu0 %v2486_v53 }
 0x335   :  { %v4428_v56 = vpop.eup %4427 }
 0x336   :  { %v1771_v8 = vadd.f32 1.0, %v4428_v56  ;;  %v2049_v56 = vsub.f32 %v2017_v36, %v2033_v61 }
 0x338   :  { %v4430_v26 = vpop.eup %4429  ;;  %4439 = vrcp.f32 %v1771_v8  ;;  %v1787_v8 = vld [vmem:[#allocation4 + $0x68] sm:$0xff] }
 0x339   :  { %v1770_v16 = vadd.f32 1.0, %v4430_v26  ;;  %v4432_v31 = vpop.eup %4431 }
 0x33a   :  { %v4434_v58 = vpop.eup %4433  ;;  %v2128_v15 = vmul.f32 %v4432_v31, %v2080_v24 }
 0x33b   :  { %4441 = vrcp.f32 %v1770_v16  ;;  %v2127_v11 = vmul.f32 %v4434_v58, %v2079_v55 }
 0x33c   :  { %4443 = vtanh.f32 %v1856_v3  ;;  %v2144_v48 = vmul.f32 %v2128_v15, %v5142_v18  ;;  %v1777_v3 = vsub.f32 %v5686_v2, %v1759_v45 }
 0x33d   :  { %v4436_v35 = vpop.eup %4435  ;;  %4445 = vtanh.f32 %v1855_v28  ;;  %v2143_v19 = vmul.f32 %v2127_v11, %v5142_v18  ;;  %v2065_v11 = vmax.f32 %v2049_v56, 0.0 }
 0x33e   :  { %v2292_v40 = vadd.f32 1.0, %v4436_v35  ;;  %v2160_v28 = vadd.f32 %v2144_v48, %v5150_v22  ;;  %v1786_v35 = vld [vmem:[#allocation4 + $0x60] sm:$0xff] }
 0x33f   :  { %v2159_v57 = vadd.f32 %v2143_v19, %v5150_v22 }
 0x340   :  { %v4438_v1 = vpop.eup %4437  ;;  %4447 = vrcp.f32 %v2292_v40  ;;  %v2176_v43 = vmul.f32 1.1272403, %v2160_v28 }
 0x341   :  { %v2291_v17 = vadd.f32 1.0, %v4438_v1  ;;  %v2175_v58 = vmul.f32 1.1272403, %v2159_v57 }
 0x343   :  { %4449 = vrcp.f32 %v2291_v17 }
 0x345   :  { %v4440_v6 = vpop.eup %4439 }
 0x346   :  { %v1779_v21 = vmul.f32 %v4440_v6, %v1777_v3 }
 0x348   :  { %v4442_v39 = vpop.eup %4441  ;;  %v5738_v37 = vadd.f32 %v1779_v21, %v1759_v45  ;;  %v2098_v45 = vadd.f32 1e-05, %v2066_v25  ;;  %v2194_v21 = vld [vmem:[#allocation5 + $0x58] sm:$0xff] }
 0x349   :  { %v1778_v2 = vmul.f32 %v4442_v39, %v1776_v5  ;;  %v4444_v20 = vpop.eup %4443  ;;  %v2407_v5 = vmul.f32 %v5723_v38, %v5551_v63 }
 0x34a   :  { %1784 = vst.msk [vmem:[#allocation6 + $0x58] sm:$0xff] %vm74_vm0, %v5738_v37  ;;  %v1792_v51 = vmul.f32 %v5738_v37, %v5378_v9  ;;  %v4446_v53 = vpop.eup %4445  ;;  %v2356_v31 = vsub.f32 %v4444_v20, %v2176_v43 }
 0x34b   :  { %v5747_v41 = vadd.f32 %v1778_v2, %v1758_v27  ;;  %v2355_v40 = vsub.f32 %v4446_v53, %v2175_v58  ;;  %v2097_v27 = vadd.f32 1e-05, %v2065_v11  ;;  %v2193_v2 = vld [vmem:[#allocation5 + $0x50] sm:$0xff] }
 0x34c   :  { %v1794_v26 = vadd.f32 %v1792_v51, %v1787_v8 }
 0x34d   :  { %1783 = vst.msk [vmem:[#allocation6 + $0x50] sm:$0xff] %vm74_vm0, %v5747_v41  ;;  %v1791_v16 = vmul.f32 %v5747_v41, %v5378_v9  ;;  %v4448_v24 = vpop.eup %4447 }
 0x34e   :  { %v3808_v55 = vmul.f32 -1.442695, %v1794_v26  ;;  %v2372_v15 = vmul.f32 %v4448_v24, %v2356_v31  ;;  %v5771_v24 = vld [vmem:[#allocation2 + $0x58] sm:$0xff] }
 0x34f   :  { %v1793_v54 = vadd.f32 %v1791_v16, %v1786_v35  ;;  %v2082_v25 = vsub.f32 %v5771_v24, %v5728_v0  ;;  %v1920_v35 = vpop.xlane.xlu1 %1919 }
 0x350   :  { %v4450_v1 = vpop.eup %4449  ;;  %4451 = vpow2.f32 %v3808_v55  ;;  %v2388_v7 = vadd.f32 %v2372_v15, %v2176_v43  ;;  %v5780_v0 = vmul.f32 0.03125, %v1920_v35 }
 0x351   :  { %v3807_v17 = vmul.f32 -1.442695, %v1793_v54  ;;  %v2371_v48 = vmul.f32 %v4450_v1, %v2355_v40  ;;  %v1858_v3 = vld [vmem:[#allocation6 + $0x58] sm:$0xff]  ;;  %v5775_v54 = vld [vmem:[#allocation2 + $0x50] sm:$0xff]  ;;  %v1917_v40 = vpop.xlane.xlu0 %1916 }
 0x352   :  { %v2429_v19 = vmul.f32 %v5553_v23, %v2388_v7  ;;  %v2214_v60 = vmul.f32 %v5457_v49, %v1858_v3  ;;  %v2081_v15 = vsub.f32 %v5775_v54, %v5732_v59 }
 0x353   :  { %4453 = vpow2.f32 %v3807_v17  ;;  %v2387_v6 = vadd.f32 %v2371_v48, %v2175_v58 }
 0x354   :  { %v1857_v28 = vld [vmem:[#allocation6 + $0x50] sm:$0xff]  ;;  %v5759_v39 = vadd.f32 %v2429_v19, %v2408_v50  ;;  %v2230_v36 = vadd.f32 %v2214_v60, %v2194_v21  ;;  %4455 = vrsqrt.f32 %v2098_v45  ;;  %v2000_v45 = vpop.xlane.xlu1 %1999  ;;  %v1789_v21 = vld [vmem:[#allocation3 + $0x60] sm:$0xff] }
 0x355   :  { %v2428_v46 = vmul.f32 %v5553_v23, %v2387_v6  ;;  %v2213_v32 = vmul.f32 %v5457_v49, %v1857_v28  ;;  %4457 = vrsqrt.f32 %v2097_v27  ;;  %v1997_v19 = vpop.xlane.xlu0 %1996  ;;  %v5784_v27 = vmul.f32 0.03125, %v1917_v40  ;;  %v1817_v40 = vld [vmem:[#allocation4 + $0x70] sm:$0xff] }
 0x356   :  { %v2461_v57 = vmul.f32 %v5759_v39, %v5759_v39  ;;  %v3822_v61 = vmul.f32 -1.442695, %v2230_v36 }
 0x357   :  { %v5765_v20 = vadd.f32 %v2428_v46, %v2407_v5  ;;  %v2229_v62 = vadd.f32 %v2213_v32, %v2193_v2  ;;  %v2020_v5 = vmul.f32 0.03125, %v2000_v45  ;;  %v2036_v2 = vmul.f32 %v5780_v0, %v5780_v0 }
 0x358   :  { %v2495_v38 = vsel %vm74_vm0, %v2461_v57, 0.0  ;;  %4459 = vpow2.f32 %v3822_v61  ;;  %v2019_v57 = vmul.f32 0.03125, %v1997_v19 }
 0x359   :  { %v2460_v51 = vmul.f32 %v5765_v20, %v5765_v20  ;;  %v3821_v43 = vmul.f32 -1.442695, %v2229_v62  ;;  %2496 = vadd.xlane.f32.xlu1 %v2495_v38 }
 0x35b   :  { %v2492_v53 = vsel %vm74_vm0, %v2460_v51, 0.0  ;;  %4461 = vpow2.f32 %v3821_v43  ;;  %v2035_v51 = vmul.f32 %v5784_v27, %v5784_v27  ;;  %v2052_v43 = vsub.f32 %v2020_v5, %v2036_v2 }
 0x35c   :  { %2493 = vadd.xlane.f32.xlu0 %v2492_v53 }
 0x35d   :  { %v4452_v56 = vpop.eup %4451 }
 0x35e   :  { %v1802_v8 = vadd.f32 1.0, %v4452_v56 }
 0x360   :  { %v4454_v26 = vpop.eup %4453  ;;  %4463 = vrcp.f32 %v1802_v8 }
 0x361   :  { %v1801_v16 = vadd.f32 1.0, %v4454_v26  ;;  %v4456_v31 = vpop.eup %4455  ;;  %v2051_v26 = vsub.f32 %v2019_v57, %v2035_v51 }
 0x362   :  { %v4458_v58 = vpop.eup %4457  ;;  %v2130_v1 = vmul.f32 %v4456_v31, %v2082_v25 }
 0x363   :  { %4465 = vrcp.f32 %v1801_v16  ;;  %v2129_v7 = vmul.f32 %v4458_v58, %v2081_v15  ;;  %v1818_v16 = vld [vmem:[#allocation4 + $0x78] sm:$0xff]  ;;  %v2068_v15 = vmax.f32 %v2052_v43, 0.0  ;;  %v2067_v45 = vmax.f32 %v2051_v26, 0.0 }
 0x364   :  { %4467 = vtanh.f32 %v1858_v3  ;;  %v2146_v50 = vmul.f32 %v2130_v1, %v5142_v18  ;;  %v1790_v3 = vld [vmem:[#allocation3 + $0x68] sm:$0xff] }
 0x365   :  { %v4460_v55 = vpop.eup %4459  ;;  %4469 = vtanh.f32 %v1857_v28  ;;  %v1808_v6 = vsub.f32 %v5738_v37, %v1790_v3  ;;  %v2145_v59 = vmul.f32 %v2129_v7, %v5142_v18  ;;  %v1807_v28 = vsub.f32 %v5747_v41, %v1789_v21 }
 0x366   :  { %v2294_v11 = vadd.f32 1.0, %v4460_v55  ;;  %v2162_v36 = vadd.f32 %v2146_v50, %v5150_v22 }
 0x367   :  { %v2161_v62 = vadd.f32 %v2145_v59, %v5150_v22  ;;  %v2410_v59 = vmul.f32 %v5771_v24, %v5551_v63 }
 0x368   :  { %v4462_v17 = vpop.eup %4461  ;;  %4471 = vrcp.f32 %v2294_v11  ;;  %v2178_v56 = vmul.f32 1.1272403, %v2162_v36  ;;  %v2196_v36 = vld [vmem:[#allocation5 + $0x68] sm:$0xff] }
 0x369   :  { %v2293_v48 = vadd.f32 1.0, %v4462_v17  ;;  %v2177_v35 = vmul.f32 1.1272403, %v2161_v62  ;;  %v2195_v62 = vld [vmem:[#allocation5 + $0x60] sm:$0xff] }
 0x36b   :  { %4473 = vrcp.f32 %v2293_v48 }
 0x36d   :  { %v4464_v60 = vpop.eup %4463 }
 0x36e   :  { %v1810_v46 = vmul.f32 %v4464_v60, %v1808_v6  ;;  %v2100_v6 = vadd.f32 1e-05, %v2068_v15  ;;  %v4624_v15 = vld [vmem:[#allocation2 + $0x68] sm:$0xff] }
 0x370   :  { %v4466_v32 = vpop.eup %4465  ;;  %v5790_v61 = vadd.f32 %v1810_v46, %v1790_v3  ;;  %v2409_v46 = vmul.f32 %v5775_v54, %v5551_v63 }
 0x371   :  { %v1809_v37 = vmul.f32 %v4466_v32, %v1807_v28  ;;  %v4468_v38 = vpop.eup %4467  ;;  %v2099_v28 = vadd.f32 1e-05, %v2067_v45 }
 0x372   :  { %1815 = vst.msk [vmem:[#allocation6 + $0x68] sm:$0xff] %vm74_vm0, %v5790_v61  ;;  %v1823_v41 = vmul.f32 %v5790_v61, %v5378_v9  ;;  %v4470_v8 = vpop.eup %4469  ;;  %v2358_v25 = vsub.f32 %v4468_v38, %v2178_v56 }
 0x373   :  { %v5799_v53 = vadd.f32 %v1809_v37, %v1789_v21  ;;  %v2357_v7 = vsub.f32 %v4470_v8, %v2177_v35 }
 0x374   :  { %v1825_v31 = vadd.f32 %v1823_v41, %v1818_v16 }
 0x375   :  { %1814 = vst.msk [vmem:[#allocation6 + $0x60] sm:$0xff] %vm74_vm0, %v5799_v53  ;;  %v1822_v58 = vmul.f32 %v5799_v53, %v5378_v9  ;;  %v4472_v55 = vpop.eup %4471 }
 0x376   :  { %v3810_v1 = vmul.f32 -1.442695, %v1825_v31  ;;  %v2374_v17 = vmul.f32 %v4472_v55, %v2358_v25 }
 0x377   :  { %v1824_v11 = vadd.f32 %v1822_v58, %v1817_v40  ;;  %v2084_v40 = vsub.f32 %v4624_v15, %v5780_v0  ;;  %v1821_v0 = vld [vmem:[#allocation3 + $0x78] sm:$0xff] }
 0x378   :  { %v4474_v48 = vpop.eup %4473  ;;  %4475 = vpow2.f32 %v3810_v1  ;;  %v2390_v3 = vadd.f32 %v2374_v17, %v2178_v56  ;;  %v1926_v1 = vpop.xlane.xlu1 %1925  ;;  %v4625_v17 = vld [vmem:[#allocation2 + $0x60] sm:$0xff] }
 0x379   :  { %v3809_v50 = vmul.f32 -1.442695, %v1824_v11  ;;  %v2373_v19 = vmul.f32 %v4474_v48, %v2357_v7  ;;  %v1860_v9 = vld [vmem:[#allocation6 + $0x68] sm:$0xff]  ;;  %v2083_v7 = vsub.f32 %v4625_v17, %v5784_v27  ;;  %v1923_v48 = vpop.xlane.xlu0 %1922 }
 0x37a   :  { %v2431_v60 = vmul.f32 %v5553_v23, %v2390_v3  ;;  %v2216_v21 = vmul.f32 %v5457_v49, %v1860_v9 }
 0x37b   :  { %4477 = vpow2.f32 %v3809_v50  ;;  %v2389_v5 = vadd.f32 %v2373_v19, %v2177_v35 }
 0x37c   :  { %v1859_v32 = vld [vmem:[#allocation6 + $0x60] sm:$0xff]  ;;  %v5811_v2 = vadd.f32 %v2431_v60, %v2410_v59  ;;  %v2232_v37 = vadd.f32 %v2216_v21, %v2196_v36  ;;  %4479 = vrsqrt.f32 %v2100_v6  ;;  %v2006_v59 = vpop.xlane.xlu1 %2005  ;;  %v1839_v21 = vsub.f32 %v5790_v61, %v1821_v0 }
 0x37d   :  { %v2430_v57 = vmul.f32 %v5553_v23, %v2389_v5  ;;  %v2215_v24 = vmul.f32 %v5457_v49, %v1859_v32  ;;  %4481 = vrsqrt.f32 %v2099_v28  ;;  %v5826_v5 = vmul.f32 0.03125, %v1926_v1 }
 0x37e   :  { %v2463_v38 = vmul.f32 %v5811_v2, %v5811_v2  ;;  %v3824_v43 = vmul.f32 -1.442695, %v2232_v37  ;;  %v2022_v36 = vmul.f32 0.03125, %v2006_v59 }
 0x37f   :  { %v5817_v51 = vadd.f32 %v2430_v57, %v2409_v46  ;;  %v2231_v41 = vadd.f32 %v2215_v24, %v2195_v62  ;;  %v5830_v46 = vmul.f32 0.03125, %v1923_v48 }
 0x380   :  { %v2501_v54 = vsel %vm74_vm0, %v2463_v38, 0.0  ;;  %4483 = vpow2.f32 %v3824_v43  ;;  %v2038_v38 = vmul.f32 %v5826_v5, %v5826_v5 }
 0x381   :  { %v2462_v56 = vmul.f32 %v5817_v51, %v5817_v51  ;;  %v3823_v8 = vmul.f32 -1.442695, %v2231_v41  ;;  %2502 = vadd.xlane.f32.xlu1 %v2501_v54 }
 0x383   :  { %v2498_v26 = vsel %vm74_vm0, %v2462_v56, 0.0  ;;  %4485 = vpow2.f32 %v3823_v8  ;;  %v2037_v8 = vmul.f32 %v5830_v46, %v5830_v46 }
 0x384   :  { %2499 = vadd.xlane.f32.xlu0 %v2498_v26  ;;  %v2054_v26 = vsub.f32 %v2022_v36, %v2038_v38 }
 0x385   :  { %v4476_v16 = vpop.eup %4475 }
 0x386   :  { %v1833_v31 = vadd.f32 1.0, %v4476_v16 }
 0x388   :  { %v4478_v58 = vpop.eup %4477  ;;  %4487 = vrcp.f32 %v1833_v31 }
 0x389   :  { %v1832_v25 = vadd.f32 1.0, %v4478_v58  ;;  %v4480_v35 = vpop.eup %4479 }
 0x38a   :  { %v4482_v55 = vpop.eup %4481  ;;  %v2132_v45 = vmul.f32 %v4480_v35, %v2084_v40  ;;  %v2070_v40 = vmax.f32 %v2054_v26, 0.0 }
 0x38b   :  { %4489 = vrcp.f32 %v1832_v25  ;;  %v2131_v19 = vmul.f32 %v4482_v55, %v2083_v7 }
 0x38c   :  { %4491 = vtanh.f32 %v1860_v9  ;;  %v2148_v60 = vmul.f32 %v2132_v45, %v5142_v18  ;;  %v2003_v9 = vpop.xlane.xlu0 %2002 }
 0x38d   :  { %v4484_v11 = vpop.eup %4483  ;;  %4493 = vtanh.f32 %v1859_v32  ;;  %v2147_v27 = vmul.f32 %v2131_v19, %v5142_v18  ;;  %v1820_v32 = vld [vmem:[#allocation3 + $0x70] sm:$0xff]  ;;  %v2021_v43 = vmul.f32 0.03125, %v2003_v9 }
 0x38e   :  { %v2296_v50 = vadd.f32 1.0, %v4484_v11  ;;  %v1838_v37 = vsub.f32 %v5799_v53, %v1820_v32  ;;  %v2164_v24 = vadd.f32 %v2148_v60, %v5150_v22 }
 0x38f   :  { %v2163_v61 = vadd.f32 %v2147_v27, %v5150_v22  ;;  %v2053_v58 = vsub.f32 %v2021_v43, %v2037_v8  ;;  %v2198_v27 = vld [vmem:[#allocation5 + $0x78] sm:$0xff] }
 0x390   :  { %v4486_v3 = vpop.eup %4485  ;;  %4495 = vrcp.f32 %v2296_v50  ;;  %v2180_v53 = vmul.f32 1.1272403, %v2164_v24  ;;  %v2197_v24 = vld [vmem:[#allocation5 + $0x70] sm:$0xff] }
 0x391   :  { %v2295_v6 = vadd.f32 1.0, %v4486_v3  ;;  %v2179_v35 = vmul.f32 1.1272403, %v2163_v61  ;;  %v2069_v48 = vmax.f32 %v2053_v58, 0.0  ;;  %v2102_v3 = vadd.f32 1e-05, %v2070_v40  ;;  %v2473_v61 = vpop.xlane.xlu1 %2472 }
 0x392   :  { %v2517_v8 = vmul.f32 0.03125, %v2473_v61  ;;  %v4626_v58 = vld [vmem:[#allocation2 + $0x78] sm:$0xff] }
 0x393   :  { %4497 = vrcp.f32 %v2295_v6  ;;  %v2412_v6 = vmul.f32 %v4624_v15, %v5551_v63  ;;  %v2101_v9 = vadd.f32 1e-05, %v2069_v48 }
 0x394   :  { %4499 = vrsqrt.f32 %v2102_v3 }
 0x395   :  { %v4488_v28 = vpop.eup %4487  ;;  %4501 = vrsqrt.f32 %v2101_v9  ;;  %v2479_v40 = vpop.xlane.xlu1 %2478 }
 0x396   :  { %v1841_v57 = vmul.f32 %v4488_v28, %v1839_v21  ;;  %v2411_v21 = vmul.f32 %v4625_v17, %v5551_v63  ;;  %v2519_v3 = vmul.f32 0.03125, %v2479_v40  ;;  %v2414_v40 = vmul.f32 %v4626_v58, %v5551_v63 }
 0x398   :  { %v4490_v62 = vpop.eup %4489  ;;  %v1843_v41 = vadd.f32 %v1841_v57, %v1821_v0 }
 0x399   :  { %v1840_v54 = vmul.f32 %v4490_v62, %v1838_v37  ;;  %v4492_v56 = vpop.eup %4491  ;;  %v2485_v9 = vpop.xlane.xlu1 %2484 }
 0x39a   :  { %1846 = vst.msk [vmem:[#allocation6 + $0x78] sm:$0xff] %vm74_vm0, %v1843_v41  ;;  %v4494_v31 = vpop.eup %4493  ;;  %v2360_v25 = vsub.f32 %v4492_v56, %v2180_v53  ;;  %v2470_v56 = vpop.xlane.xlu0 %2469 }
 0x39b   :  { %v1842_v16 = vadd.f32 %v1840_v54, %v1820_v32  ;;  %v2359_v11 = vsub.f32 %v4494_v31, %v2179_v35  ;;  %v2516_v26 = vmul.f32 0.03125, %v2470_v56 }
 0x39d   :  { %1845 = vst.msk [vmem:[#allocation6 + $0x70] sm:$0xff] %vm74_vm0, %v1842_v16  ;;  %v4496_v55 = vpop.eup %4495 }
 0x39e   :  { %v2376_v1 = vmul.f32 %v4496_v55, %v2360_v25  ;;  %v2086_v25 = vsub.f32 %v4626_v58, %v5826_v5  ;;  %v2532_v55 = vadd.f32 1e-06, %v2516_v26  ;;  %v2601_v58 = vld [vmem:[%s6531_s0 + $0x8] sm:$0xff] }
 0x3a0   :  { %v4498_v7 = vpop.eup %4497  ;;  %v2392_v45 = vadd.f32 %v2376_v1, %v2180_v53  ;;  %v2533_v53 = vadd.f32 1e-06, %v2517_v8  ;;  %v4627_v1 = vld [vmem:[#allocation2 + $0x70] sm:$0xff] }
 0x3a1   :  { %v2375_v50 = vmul.f32 %v4498_v7, %v2359_v11  ;;  %v1862_v19 = vld [vmem:[#allocation6 + $0x78] sm:$0xff]  ;;  %v4500_v16 = vpop.eup %4499  ;;  %v2085_v11 = vsub.f32 %v4627_v1, %v5830_v46 }
 0x3a2   :  { %v2433_v59 = vmul.f32 %v5553_v23, %v2392_v45  ;;  %v2218_v0 = vmul.f32 %v5457_v49, %v1862_v19  ;;  %v4502_v31 = vpop.eup %4501  ;;  %v2134_v7 = vmul.f32 %v4500_v16, %v2086_v25 }
 0x3a3   :  { %v2391_v60 = vadd.f32 %v2375_v50, %v2179_v35  ;;  %v2476_v50 = vpop.xlane.xlu0 %2475 }
 0x3a4   :  { %v1861_v28 = vld [vmem:[#allocation6 + $0x70] sm:$0xff]  ;;  %v5845_v36 = vadd.f32 %v2433_v59, %v2412_v6  ;;  %v2234_v57 = vadd.f32 %v2218_v0, %v2198_v27  ;;  %v2133_v6 = vmul.f32 %v4502_v31, %v2085_v11  ;;  %v2150_v5 = vmul.f32 %v2134_v7, %v5142_v18 }
 0x3a5   :  { %v2432_v32 = vmul.f32 %v5553_v23, %v2391_v60  ;;  %v2217_v37 = vmul.f32 %v5457_v49, %v1861_v28  ;;  %v2518_v60 = vmul.f32 0.03125, %v2476_v50 }
 0x3a6   :  { %v2465_v15 = vmul.f32 %v5845_v36, %v5845_v36  ;;  %v3826_v38 = vmul.f32 -1.442695, %v2234_v57  ;;  %v2149_v0 = vmul.f32 %v2133_v6, %v5142_v18  ;;  %v2413_v6 = vmul.f32 %v4627_v1, %v5551_v63  ;;  %v2600_v63 = vld [vmem:[%s6531_s0] sm:$0xff] }
 0x3a7   :  { %v5851_v62 = vadd.f32 %v2432_v32, %v2411_v21  ;;  %v2233_v43 = vadd.f32 %v2217_v37, %v2197_v24  ;;  %v2534_v46 = vadd.f32 1e-06, %v2518_v60  ;;  %v2166_v21 = vadd.f32 %v2150_v5, %v5150_v22  ;;  %v2482_v27 = vpop.xlane.xlu0 %2481 }
 0x3a8   :  { %v2507_v17 = vsel %vm74_vm0, %v2465_v15, 0.0  ;;  %4503 = vpow2.f32 %v3826_v38  ;;  %v2165_v32 = vadd.f32 %v2149_v0, %v5150_v22  ;;  %v2520_v37 = vmul.f32 0.03125, %v2482_v27 }
 0x3a9   :  { %v2464_v41 = vmul.f32 %v5851_v62, %v5851_v62  ;;  %v3825_v54 = vmul.f32 -1.442695, %v2233_v43  ;;  %2508 = vadd.xlane.f32.xlu1 %v2507_v17  ;;  %v2182_v24 = vmul.f32 1.1272403, %v2166_v21 }
 0x3aa   :  { %v2536_v56 = vadd.f32 1e-06, %v2520_v37 }
 0x3ab   :  { %v2504_v49 = vsel %vm74_vm0, %v2464_v41, 0.0  ;;  %4505 = vpow2.f32 %v3825_v54  ;;  %v2181_v41 = vmul.f32 1.1272403, %v2165_v32  ;;  %v5863_v54 = vld [vmem:[#allocation7 + $0x8] sm:$0xf] }
 0x3ac   :  { %2505 = vadd.xlane.f32.xlu0 %v2504_v49  ;;  %4507 = vtanh.f32 %v1862_v19  ;;  %v2535_v19 = vadd.f32 1e-06, %v2519_v3  ;;  %v5868_v31 = vrot.slane %v5863_v54, %v4836_v30 }
 0x3ad   :  { %4509 = vtanh.f32 %v1861_v28  ;;  %v2521_v28 = vmul.f32 0.03125, %v2485_v9 }
 0x3ae   :  { %4511 = vrsqrt.f32 %v2533_v53 }
 0x3af   :  { %v2537_v43 = vadd.f32 1e-06, %v2521_v28 }
 0x3b5   :  { %v4504_v35 = vpop.eup %4503 }
 0x3b6   :  { %v2298_v48 = vadd.f32 1.0, %v4504_v35 }
 0x3b8   :  { %v4506_v45 = vpop.eup %4505  ;;  %4513 = vrcp.f32 %v2298_v48 }
 0x3b9   :  { %v2297_v59 = vadd.f32 1.0, %v4506_v45  ;;  %4515 = vrsqrt.f32 %v2532_v55  ;;  %v4508_v57 = vpop.eup %4507 }
 0x3ba   :  { %v4510_v15 = vpop.eup %4509  ;;  %v2362_v17 = vsub.f32 %v4508_v57, %v2182_v24  ;;  %v2491_v49 = vpop.xlane.xlu1 %2490 }
 0x3bb   :  { %4517 = vrcp.f32 %v2297_v59  ;;  %v4512_v38 = vpop.eup %4511  ;;  %v2361_v26 = vsub.f32 %v4510_v15, %v2181_v41  ;;  %v2523_v25 = vmul.f32 0.03125, %v2491_v49 }
 0x3bc   :  { %4519 = vrsqrt.f32 %v2535_v19  ;;  %v2565_v22 = vmul.f32 %v4512_v38, %v5571_v14 }
 0x3bd   :  { %4521 = vrsqrt.f32 %v2534_v46  ;;  %v2488_v53 = vpop.xlane.xlu0 %2487  ;;  %v2539_v14 = vadd.f32 1e-06, %v2523_v25 }
 0x3be   :  { %4523 = vrsqrt.f32 %v2537_v43  ;;  %v2522_v7 = vmul.f32 0.03125, %v2488_v53  ;;  %v2585_v50 = vmul.f32 %v5868_v31, %v2565_v22 }
 0x3bf   :  { %4525 = vrsqrt.f32 %v2536_v56 }
 0x3c0   :  { %v5886_v46 = vmul.f32 %v2601_v58, %v2585_v50  ;;  %4527 = vrsqrt.f32 %v2539_v14 }
 0x3c2   :  { %v2635_v57 = vsel %vm74_vm0, %v5886_v46, 0.0  ;;  %v2697_v37 = vmul.f32 %v5886_v46, %v5886_v46 }
 0x3c5   :  { %v4514_v18 = vpop.eup %4513 }
 0x3c6   :  { %v4516_v61 = vpop.eup %4515  ;;  %v2378_v8 = vmul.f32 %v4514_v18, %v2362_v17  ;;  %v2715_v18 = vsel %vm74_vm0, %v2697_v37, 0.0 }
 0x3c7   :  { %v2564_v11 = vmul.f32 %v4516_v61, %v5581_v44  ;;  %v2538_v44 = vadd.f32 1e-06, %v2522_v7 }
 0x3c8   :  { %v4518_v16 = vpop.eup %4517  ;;  %v2394_v35 = vadd.f32 %v2378_v8, %v2182_v24 }
 0x3c9   :  { %v2377_v55 = vmul.f32 %v4518_v16, %v2361_v26  ;;  %v4520_v60 = vpop.eup %4519  ;;  %v2584_v0 = vmul.f32 %v5868_v31, %v2564_v11  ;;  %4529 = vrsqrt.f32 %v2538_v44  ;;  %v2604_v11 = vld [vmem:[%s6531_s0 + $0x20] sm:$0xff] }
 0x3ca   :  { %v2435_v48 = vmul.f32 %v5553_v23, %v2394_v35  ;;  %v4522_v9 = vpop.eup %4521  ;;  %v2567_v21 = vmul.f32 %v4520_v60, %v5603_v47  ;;  %v2603_v47 = vld [vmem:[%s6531_s0 + $0x18] sm:$0xff] }
 0x3cb   :  { %v2393_v45 = vadd.f32 %v2377_v55, %v2181_v41  ;;  %v5896_v28 = vmul.f32 %v2600_v63, %v2584_v0  ;;  %v2566_v32 = vmul.f32 %v4522_v9, %v5609_v4  ;;  %v4524_v15 = vpop.eup %4523  ;;  %v2602_v41 = vld [vmem:[%s6531_s0 + $0x10] sm:$0xff]  ;;  %v2607_v63 = vld [vmem:[%s6531_s0 + $0x38] sm:$0xff] }
 0x3cc   :  { %v5874_v3 = vadd.f32 %v2435_v48, %v2414_v40  ;;  %v2587_v24 = vmul.f32 %v5868_v31, %v2567_v21  ;;  %v4526_v17 = vpop.eup %4525  ;;  %v2569_v61 = vmul.f32 %v4524_v15, %v5655_v34  ;;  %v2605_v34 = vld [vmem:[%s6531_s0 + $0x28] sm:$0xff] }
 0x3cd   :  { %v2434_v59 = vmul.f32 %v5553_v23, %v2393_v45  ;;  %v2632_v38 = vsel %vm74_vm0, %v5896_v28, 0.0  ;;  %v2696_v4 = vmul.f32 %v5896_v28, %v5896_v28  ;;  %v2586_v43 = vmul.f32 %v5868_v31, %v2566_v32  ;;  %v4528_v25 = vpop.eup %4527 }
 0x3ce   :  { %v2467_v5 = vmul.f32 %v5874_v3, %v5874_v3  ;;  %v5916_v49 = vmul.f32 %v2603_v47, %v2587_v24  ;;  %v2568_v26 = vmul.f32 %v4526_v17, %v5661_v42  ;;  %v2589_v22 = vmul.f32 %v5868_v31, %v2569_v61 }
 0x3cf   :  { %v5883_v19 = vadd.f32 %v2434_v59, %v2413_v6  ;;  %v2712_v56 = vsel %vm74_vm0, %v2696_v4, 0.0  ;;  %v5920_v8 = vmul.f32 %v2602_v41, %v2586_v43  ;;  %v2571_v45 = vmul.f32 %v4528_v25, %v5707_v33 }
 0x3d0   :  { %v2513_v23 = vsel %vm74_vm0, %v2467_v5, 0.0  ;;  %v2641_v16 = vsel %vm74_vm0, %v5916_v49, 0.0  ;;  %v2699_v53 = vmul.f32 %v5916_v49, %v5916_v49  ;;  %v2588_v55 = vmul.f32 %v5868_v31, %v2568_v26 }
 0x3d1   :  { %v2466_v1 = vmul.f32 %v5883_v19, %v5883_v19  ;;  %2514 = vadd.xlane.f32.xlu1 %v2513_v23  ;;  %v2638_v35 = vsel %vm74_vm0, %v5920_v8, 0.0  ;;  %v2698_v42 = vmul.f32 %v5920_v8, %v5920_v8  ;;  %v5940_v48 = vmul.f32 %v2605_v34, %v2589_v22 }
 0x3d2   :  { %v2721_v7 = vsel %vm74_vm0, %v2699_v53, 0.0  ;;  %v5944_v6 = vmul.f32 %v2604_v11, %v2588_v55  ;;  %v2591_v0 = vmul.f32 %v5868_v31, %v2571_v45  ;;  %v2608_v53 = vld [vmem:[%s6531_s0 + $0x40] sm:$0xff]  ;;  %v2947_v55 = vld [vmem:[%s6538_s7 + $0x18] sm:$0xff]  ;;  %v2946_v11 = vld [vmem:[%s6538_s7 + $0x10] sm:$0xff] }
 0x3d3   :  { %v2510_v27 = vsel %vm74_vm0, %v2466_v1, 0.0  ;;  %v2718_v14 = vsel %vm74_vm0, %v2698_v42, 0.0  ;;  %v2647_v44 = vsel %vm74_vm0, %v5940_v48, 0.0  ;;  %v2701_v5 = vmul.f32 %v5940_v48, %v5940_v48  ;;  %4200 = vmatprep.subr.mxu1 %v2947_v55  ;;  %v2945_v45 = vld [vmem:[%s6538_s7 + $0x8] sm:$0xff] }
 0x3d4   :  { %2511 = vadd.xlane.f32.xlu0 %v2510_v27  ;;  %v2700_v23 = vmul.f32 %v5944_v6, %v5944_v6  ;;  %v2606_v27 = vld [vmem:[%s6531_s0 + $0x30] sm:$0xff]  ;;  %4201 = vmatpush3.msra.mxu1 %v2947_v55 }
 0x3d5   :  { %2636 = vadd.xlane.f32.xlu1 %v2635_v57  ;;  %v2727_v32 = vsel %vm74_vm0, %v2701_v5, 0.0  ;;  %v5964_v57 = vmul.f32 %v2607_v63, %v2591_v0  ;;  %4202 = vmatprep.subr.mxu1 %v2946_v11  ;;  %v2611_v63 = vld [vmem:[%s6531_s0 + $0x58] sm:$0xff] }
 0x3d6   :  { %v4530_v40 = vpop.eup %4529  ;;  %v2724_v37 = vsel %vm74_vm0, %v2700_v23, 0.0  ;;  %4203 = vmatpush3.msra.mxu1 %v2946_v11 }
 0x3d7   :  { %v2570_v59 = vmul.f32 %v4530_v40, %v5713_v52  ;;  %v2644_v52 = vsel %vm74_vm0, %v5944_v6, 0.0  ;;  %v2653_v15 = vsel %vm74_vm0, %v5964_v57, 0.0  ;;  %v2703_v47 = vmul.f32 %v5964_v57, %v5964_v57  ;;  %4204 = vmatprep.subr.mxu1 %v2945_v45 }
 0x3d8   :  { %2633 = vadd.xlane.f32.xlu0 %v2632_v38  ;;  %4205 = vmatpush3.msra.mxu1 %v2945_v45 }
 0x3d9   :  { %2716 = vadd.xlane.f32.xlu1 %v2715_v18  ;;  %v2590_v1 = vmul.f32 %v5868_v31, %v2570_v59  ;;  %v2733_v43 = vsel %vm74_vm0, %v2703_v47, 0.0 }
 0x3db   :  { %v5967_v24 = vmul.f32 %v2606_v27, %v2590_v1  ;;  %v2610_v1 = vld [vmem:[%s6531_s0 + $0x50] sm:$0xff] }
 0x3dc   :  { %2713 = vadd.xlane.f32.xlu0 %v2712_v56  ;;  %v2609_v56 = vld [vmem:[%s6531_s0 + $0x48] sm:$0xff] }
 0x3dd   :  { %2642 = vadd.xlane.f32.xlu1 %v2641_v16  ;;  %v2650_v38 = vsel %vm74_vm0, %v5967_v24, 0.0  ;;  %v2702_v4 = vmul.f32 %v5967_v24, %v5967_v24 }
 0x3df   :  { %v2730_v17 = vsel %vm74_vm0, %v2702_v4, 0.0 }
 0x3e0   :  { %2639 = vadd.xlane.f32.xlu0 %v2638_v35 }
 0x3e1   :  { %2722 = vadd.xlane.f32.xlu1 %v2721_v7 }
 0x3e2   :  { %v2497_v50 = vpop.xlane.xlu1 %2496 }
 0x3e3   :  { %v2525_v58 = vmul.f32 0.03125, %v2497_v50  ;;  %v2944_v50 = vld [vmem:[%s6538_s7] sm:$0xff] }
 0x3e4   :  { %2719 = vadd.xlane.f32.xlu0 %v2718_v14  ;;  %4206 = vmatprep.subr.mxu1 %v2944_v50 }
 0x3e5   :  { %v2494_v60 = vpop.xlane.xlu0 %2493  ;;  %v2541_v33 = vadd.f32 1e-06, %v2525_v58  ;;  %2648 = vadd.xlane.f32.xlu1 %v2647_v44  ;;  %4207 = vmatpush3.msra.mxu1 %v2944_v50 }
 0x3e6   :  { %v2524_v9 = vmul.f32 0.03125, %v2494_v60 }
 0x3e7   :  { %4531 = vrsqrt.f32 %v2541_v33 }
 0x3e8   :  { %v2540_v21 = vadd.f32 1e-06, %v2524_v9  ;;  %2645 = vadd.xlane.f32.xlu0 %v2644_v52 }
 0x3e9   :  { %2728 = vadd.xlane.f32.xlu1 %v2727_v32 }
 0x3ea   :  { %4533 = vrsqrt.f32 %v2540_v21 }
 0x3ec   :  { %2725 = vadd.xlane.f32.xlu0 %v2724_v37 }
 0x3ed   :  { %2654 = vadd.xlane.f32.xlu1 %v2653_v15 }
 0x3f0   :  { %2651 = vadd.xlane.f32.xlu0 %v2650_v38 }
 0x3f1   :  { %2734 = vadd.xlane.f32.xlu1 %v2733_v43 }
 0x3f4   :  { %2731 = vadd.xlane.f32.xlu0 %v2730_v17  ;;  %v4532_v41 = vpop.eup %4531 }
 0x3f5   :  { %v2573_v18 = vmul.f32 %v4532_v41, %v5759_v39 }
 0x3f7   :  { %v4534_v61 = vpop.eup %4533  ;;  %v2593_v26 = vmul.f32 %v5868_v31, %v2573_v18 }
 0x3f8   :  { %v2572_v16 = vmul.f32 %v4534_v61, %v5765_v20 }
 0x3f9   :  { %v5988_v22 = vmul.f32 %v2609_v56, %v2593_v26 }
 0x3fa   :  { %v2592_v25 = vmul.f32 %v5868_v31, %v2572_v16 }
 0x3fb   :  { %v2659_v39 = vsel %vm74_vm0, %v5988_v22, 0.0  ;;  %v2705_v35 = vmul.f32 %v5988_v22, %v5988_v22 }
 0x3fc   :  { %v5993_v34 = vmul.f32 %v2608_v53, %v2592_v25  ;;  %2660 = vadd.xlane.f32.xlu1 %v2659_v39  ;;  %v2613_v53 = vld [vmem:[%s6531_s0 + $0x68] sm:$0xff] }
 0x3fd   :  { %v2739_v40 = vsel %vm74_vm0, %v2705_v35, 0.0  ;;  %v2612_v35 = vld [vmem:[%s6531_s0 + $0x60] sm:$0xff] }
 0x3fe   :  { %v2656_v20 = vsel %vm74_vm0, %v5993_v34, 0.0  ;;  %v2704_v42 = vmul.f32 %v5993_v34, %v5993_v34 }
 0x3ff   :  { %2657 = vadd.xlane.f32.xlu0 %v2656_v20 }
 0x400   :  { %2740 = vadd.xlane.f32.xlu1 %v2739_v40  ;;  %v2736_v7 = vsel %vm74_vm0, %v2704_v42, 0.0 }
 0x403   :  { %2737 = vadd.xlane.f32.xlu0 %v2736_v7 }
 0x40a   :  { %v2503_v14 = vpop.xlane.xlu1 %2502 }
 0x40b   :  { %v2527_v59 = vmul.f32 0.03125, %v2503_v14 }
 0x40d   :  { %v2500_v58 = vpop.xlane.xlu0 %2499  ;;  %v2543_v60 = vadd.f32 1e-06, %v2527_v59 }
 0x40e   :  { %v2526_v44 = vmul.f32 0.03125, %v2500_v58 }
 0x40f   :  { %4535 = vrsqrt.f32 %v2543_v60 }
 0x410   :  { %v2542_v5 = vadd.f32 1e-06, %v2526_v44 }
 0x412   :  { %4537 = vrsqrt.f32 %v2542_v5 }
 0x41c   :  { %v4536_v0 = vpop.eup %4535 }
 0x41d   :  { %v2575_v33 = vmul.f32 %v4536_v0, %v5811_v2 }
 0x41f   :  { %v4538_v9 = vpop.eup %4537  ;;  %v2595_v52 = vmul.f32 %v5868_v31, %v2575_v33 }
 0x420   :  { %v2574_v23 = vmul.f32 %v4538_v9, %v5817_v51 }
 0x421   :  { %v6024_v21 = vmul.f32 %v2611_v63, %v2595_v52 }
 0x422   :  { %v2594_v27 = vmul.f32 %v5868_v31, %v2574_v23 }
 0x423   :  { %v2665_v2 = vsel %vm74_vm0, %v6024_v21, 0.0  ;;  %v2707_v37 = vmul.f32 %v6024_v21, %v6024_v21 }
 0x424   :  { %v6029_v32 = vmul.f32 %v2610_v1, %v2594_v27  ;;  %2666 = vadd.xlane.f32.xlu1 %v2665_v2 }
 0x425   :  { %v2745_v47 = vsel %vm74_vm0, %v2707_v37, 0.0 }
 0x426   :  { %v2662_v51 = vsel %vm74_vm0, %v6029_v32, 0.0  ;;  %v2706_v15 = vmul.f32 %v6029_v32, %v6029_v32 }
 0x427   :  { %2663 = vadd.xlane.f32.xlu0 %v2662_v51 }
 0x428   :  { %2746 = vadd.xlane.f32.xlu1 %v2745_v47  ;;  %v2742_v38 = vsel %vm74_vm0, %v2706_v15, 0.0 }
 0x42b   :  { %2743 = vadd.xlane.f32.xlu0 %v2742_v38 }
 0x432   :  { %v2509_v4 = vpop.xlane.xlu1 %2508 }
 0x433   :  { %v2529_v43 = vmul.f32 0.03125, %v2509_v4 }
 0x435   :  { %v2506_v17 = vpop.xlane.xlu0 %2505  ;;  %v2545_v41 = vadd.f32 1e-06, %v2529_v43 }
 0x436   :  { %v2528_v18 = vmul.f32 0.03125, %v2506_v17 }
 0x437   :  { %4539 = vrsqrt.f32 %v2545_v41 }
 0x438   :  { %v2544_v61 = vadd.f32 1e-06, %v2528_v18 }
 0x43a   :  { %4541 = vrsqrt.f32 %v2544_v61 }
 0x444   :  { %v4540_v56 = vpop.eup %4539 }
 0x445   :  { %v2577_v26 = vmul.f32 %v4540_v56, %v5845_v36 }
 0x447   :  { %v4542_v16 = vpop.eup %4541  ;;  %v2597_v25 = vmul.f32 %v5868_v31, %v2577_v26 }
 0x448   :  { %v2576_v39 = vmul.f32 %v4542_v16, %v5851_v62 }
 0x449   :  { %v6048_v20 = vmul.f32 %v2613_v53, %v2597_v25 }
 0x44a   :  { %v2596_v42 = vmul.f32 %v5868_v31, %v2576_v39 }
 0x44b   :  { %v2671_v36 = vsel %vm74_vm0, %v6048_v20, 0.0  ;;  %v2709_v40 = vmul.f32 %v6048_v20, %v6048_v20 }
 0x44c   :  { %v6053_v55 = vmul.f32 %v2612_v35, %v2596_v42  ;;  %2672 = vadd.xlane.f32.xlu1 %v2671_v36 }
 0x44d   :  { %v2751_v7 = vsel %vm74_vm0, %v2709_v40, 0.0 }
 0x44e   :  { %v2668_v62 = vsel %vm74_vm0, %v6053_v55, 0.0  ;;  %v2708_v11 = vmul.f32 %v6053_v55, %v6053_v55 }
 0x44f   :  { %2669 = vadd.xlane.f32.xlu0 %v2668_v62 }
 0x450   :  { %2752 = vadd.xlane.f32.xlu1 %v2751_v7  ;;  %v2748_v45 = vsel %vm74_vm0, %v2708_v11, 0.0 }
 0x453   :  { %2749 = vadd.xlane.f32.xlu0 %v2748_v45 }
 0x45a   :  { %v2515_v50 = vpop.xlane.xlu1 %2514 }
 0x45b   :  { %v2531_v14 = vmul.f32 0.03125, %v2515_v50  ;;  %v2615_v50 = vld [vmem:[%s6531_s0 + $0x78] sm:$0xff] }
 0x45d   :  { %v2512_v59 = vpop.xlane.xlu0 %2511  ;;  %v2547_v58 = vadd.f32 1e-06, %v2531_v14 }
 0x45e   :  { %v2530_v60 = vmul.f32 0.03125, %v2512_v59  ;;  %v2637_v44 = vpop.xlane.xlu1 %2636 }
 0x45f   :  { %4543 = vrsqrt.f32 %v2547_v58  ;;  %v6063_v0 = vmul.f32 0.03125, %v2637_v44 }
 0x460   :  { %v2546_v5 = vadd.f32 1e-06, %v2530_v60 }
 0x461   :  { %v2634_v33 = vpop.xlane.xlu0 %2633  ;;  %v2777_v52 = vmul.f32 %v6063_v0, %v6063_v0 }
 0x462   :  { %4545 = vrsqrt.f32 %v2546_v5  ;;  %v6065_v9 = vmul.f32 0.03125, %v2634_v33  ;;  %v2717_v63 = vpop.xlane.xlu1 %2716 }
 0x463   :  { %v2761_v23 = vmul.f32 0.03125, %v2717_v63 }
 0x464   :  { %v2776_v27 = vmul.f32 %v6065_v9, %v6065_v9 }
 0x465   :  { %v2714_v1 = vpop.xlane.xlu0 %2713  ;;  %v2793_v2 = vsub.f32 %v2761_v23, %v2777_v52 }
 0x466   :  { %v2760_v37 = vmul.f32 0.03125, %v2714_v1  ;;  %v2643_v51 = vpop.xlane.xlu1 %2642 }
 0x467   :  { %v2809_v15 = vmax.f32 %v2793_v2, 0.0  ;;  %v6071_v38 = vmul.f32 0.03125, %v2643_v51 }
 0x468   :  { %v2792_v47 = vsub.f32 %v2760_v37, %v2776_v27 }
 0x469   :  { %v2640_v4 = vpop.xlane.xlu0 %2639  ;;  %v2841_v43 = vadd.f32 1e-05, %v2809_v15  ;;  %v2779_v56 = vmul.f32 %v6071_v38, %v6071_v38 }
 0x46a   :  { %v2808_v17 = vmax.f32 %v2792_v47, 0.0  ;;  %v6073_v41 = vmul.f32 0.03125, %v2640_v4  ;;  %v2723_v18 = vpop.xlane.xlu1 %2722 }
 0x46b   :  { %4547 = vrsqrt.f32 %v2841_v43  ;;  %v2763_v26 = vmul.f32 0.03125, %v2723_v18 }
 0x46c   :  { %v2840_v61 = vadd.f32 1e-05, %v2808_v17  ;;  %v4544_v16 = vpop.eup %4543  ;;  %v2778_v53 = vmul.f32 %v6073_v41, %v6073_v41  ;;  %v2825_v17 = vsub.f32 %v5886_v46, %v6063_v0 }
 0x46d   :  { %v2720_v25 = vpop.xlane.xlu0 %2719  ;;  %v2795_v39 = vsub.f32 %v2763_v26, %v2779_v56  ;;  %v2579_v42 = vmul.f32 %v4544_v16, %v5874_v3  ;;  %v2614_v3 = vld [vmem:[%s6531_s0 + $0x70] sm:$0xff] }
 0x46e   :  { %4549 = vrsqrt.f32 %v2840_v61  ;;  %v2762_v35 = vmul.f32 0.03125, %v2720_v25  ;;  %v2649_v40 = vpop.xlane.xlu1 %2648  ;;  %v6116_v25 = vrot.slane %v5863_v54, %v5137_v10 }
 0x46f   :  { %v4546_v36 = vpop.eup %4545  ;;  %v2811_v62 = vmax.f32 %v2795_v39, 0.0  ;;  %v6080_v7 = vmul.f32 0.03125, %v2649_v40  ;;  %v2599_v45 = vmul.f32 %v5868_v31, %v2579_v42  ;;  %v2824_v39 = vsub.f32 %v5896_v28, %v6065_v9 }
 0x470   :  { %v2794_v11 = vsub.f32 %v2762_v35, %v2778_v53  ;;  %v2578_v59 = vmul.f32 %v4546_v36, %v5883_v19 }
 0x471   :  { %v2646_v14 = vpop.xlane.xlu0 %2645  ;;  %v2843_v58 = vadd.f32 1e-05, %v2811_v62  ;;  %v6092_v33 = vmul.f32 %v2615_v50, %v2599_v45  ;;  %v2781_v23 = vmul.f32 %v6080_v7, %v6080_v7  ;;  %v6128_v50 = vrot.slane %v5863_v54, %v1030_v12 }
 0x472   :  { %v2810_v60 = vmax.f32 %v2794_v11, 0.0  ;;  %v6090_v44 = vmul.f32 0.03125, %v2646_v14  ;;  %v2729_v5 = vpop.xlane.xlu1 %2728  ;;  %v2598_v63 = vmul.f32 %v5868_v31, %v2578_v59  ;;  %v2827_v12 = vsub.f32 %v5916_v49, %v6071_v38 }
 0x473   :  { %4551 = vrsqrt.f32 %v2843_v58  ;;  %v2765_v1 = vmul.f32 0.03125, %v2729_v5  ;;  %v2677_v27 = vsel %vm74_vm0, %v6092_v33, 0.0  ;;  %v2711_v31 = vmul.f32 %v6092_v33, %v6092_v33 }
 0x474   :  { %v2842_v52 = vadd.f32 1e-05, %v2810_v60  ;;  %v2780_v19 = vmul.f32 %v6090_v44, %v6090_v44  ;;  %v6101_v37 = vmul.f32 %v2614_v3, %v2598_v63  ;;  %2678 = vadd.xlane.f32.xlu1 %v2677_v27 }
 0x475   :  { %v2726_v2 = vpop.xlane.xlu0 %2725  ;;  %v2797_v51 = vsub.f32 %v2765_v1, %v2781_v23  ;;  %v2757_v16 = vsel %vm74_vm0, %v2711_v31, 0.0 }
 0x476   :  { %4553 = vrsqrt.f32 %v2842_v52  ;;  %v2764_v15 = vmul.f32 0.03125, %v2726_v2  ;;  %v2655_v47 = vpop.xlane.xlu1 %2654  ;;  %v2674_v4 = vsel %vm74_vm0, %v6101_v37, 0.0  ;;  %v2710_v43 = vmul.f32 %v6101_v37, %v6101_v37 }
 0x477   :  { %v2813_v18 = vmax.f32 %v2797_v51, 0.0  ;;  %v6111_v56 = vmul.f32 0.03125, %v2655_v47  ;;  %2675 = vadd.xlane.f32.xlu0 %v2674_v4  ;;  %v2826_v2 = vsub.f32 %v5920_v8, %v6073_v41 }
 0x478   :  { %v2796_v61 = vsub.f32 %v2764_v15, %v2780_v19  ;;  %v4548_v26 = vpop.eup %4547  ;;  %2758 = vadd.xlane.f32.xlu1 %v2757_v16  ;;  %v2754_v45 = vsel %vm74_vm0, %v2710_v43, 0.0 }
 0x479   :  { %v2652_v53 = vpop.xlane.xlu0 %2651  ;;  %v2873_v35 = vmul.f32 %v4548_v26, %v2825_v17  ;;  %v2845_v42 = vadd.f32 1e-05, %v2813_v18  ;;  %v2783_v40 = vmul.f32 %v6111_v56, %v6111_v56 }
 0x47a   :  { %v2812_v36 = vmax.f32 %v2796_v61, 0.0  ;;  %v6122_v62 = vmul.f32 0.03125, %v2652_v53  ;;  %v2735_v11 = vpop.xlane.xlu1 %2734  ;;  %v2829_v53 = vsub.f32 %v5940_v48, %v6080_v7 }
 0x47b   :  { %v4550_v0 = vpop.eup %4549  ;;  %4555 = vrsqrt.f32 %v2845_v42  ;;  %v2767_v14 = vmul.f32 0.03125, %v2735_v11  ;;  %2755 = vadd.xlane.f32.xlu0 %v2754_v45  ;;  %v2893_v3 = vmul.f32 %v6116_v25, %v2873_v35 }
 0x47c   :  { %v2844_v9 = vadd.f32 1e-05, %v2812_v36  ;;  %v2872_v59 = vmul.f32 %v4550_v0, %v2824_v39  ;;  %v2782_v58 = vmul.f32 %v6122_v62, %v6122_v62  ;;  %v2828_v0 = vsub.f32 %v5944_v6, %v6090_v44 }
 0x47d   :  { %v2732_v60 = vpop.xlane.xlu0 %2731  ;;  %v2799_v5 = vsub.f32 %v2767_v14, %v2783_v40  ;;  %v2913_v23 = vadd.f32 %v6128_v50, %v2893_v3 }
 0x47e   :  { %4557 = vrsqrt.f32 %v2844_v9  ;;  %v2766_v63 = vmul.f32 0.03125, %v2732_v60  ;;  %v2892_v52 = vmul.f32 %v6116_v25, %v2872_v59 }
 0x47f   :  { %v2815_v54 = vmax.f32 %v2799_v5, 0.0  ;;  %v2929_v43 = vmax.f32 %v2913_v23, 0.0 }
 0x480   :  { %v2798_v1 = vsub.f32 %v2766_v63, %v2782_v58  ;;  %v2912_v19 = vadd.f32 %v6128_v50, %v2892_v52  ;;  %v4552_v27 = vpop.eup %4551 }
 0x481   :  { %v2847_v51 = vadd.f32 1e-05, %v2815_v54  ;;  %v2875_v47 = vmul.f32 %v4552_v27, %v2827_v12 }
 0x482   :  { %v2814_v15 = vmax.f32 %v2798_v1, 0.0  ;;  %v2928_v31 = vmax.f32 %v2912_v19, 0.0  ;;  %v2831_v1 = vsub.f32 %v5964_v57, %v6111_v56 }
 0x483   :  { %v4554_v4 = vpop.eup %4553  ;;  %4559 = vrsqrt.f32 %v2847_v51  ;;  %v2895_v38 = vmul.f32 %v6116_v25, %v2875_v47 }
 0x484   :  { %v2846_v17 = vadd.f32 1e-05, %v2814_v15  ;;  %4208 = vmatprep.mubr.msk.f32.mxu1 %vm74_vm0, %v2928_v31  ;;  %v2874_v18 = vmul.f32 %v4554_v4, %v2826_v2  ;;  %v2830_v15 = vsub.f32 %v5967_v24, %v6122_v62 }
 0x485   :  { %4209 = vmatmul.mubr.msk.f32.vlgmr.msra.gmra.mxu1 %vm74_vm0, %v2929_v43  ;;  %v2661_v61 = vpop.xlane.xlu1 %2660  ;;  %v2915_v16 = vadd.f32 %v6128_v50, %v2895_v38 }
 0x486   :  { %4561 = vrsqrt.f32 %v2846_v17  ;;  %v2894_v26 = vmul.f32 %v6116_v25, %v2874_v18  ;;  %v2689_v41 = vmul.f32 0.03125, %v2661_v61 }
 0x487   :  { %v2931_v58 = vmax.f32 %v2915_v16, 0.0 }
 0x488   :  { %v2658_v39 = vpop.xlane.xlu0 %2657  ;;  %v2914_v35 = vadd.f32 %v6128_v50, %v2894_v26  ;;  %v4556_v42 = vpop.eup %4555  ;;  %v2785_v14 = vmul.f32 %v2689_v41, %v2689_v41 }
 0x489   :  { %v2688_v36 = vmul.f32 0.03125, %v2658_v39  ;;  %v2741_v40 = vpop.xlane.xlu1 %2740  ;;  %v2877_v45 = vmul.f32 %v4556_v42, %v2829_v53  ;;  %v2833_v53 = vsub.f32 %v5988_v22, %v2689_v41 }
 0x48a   :  { %v2930_v11 = vmax.f32 %v2914_v35, 0.0  ;;  %v2769_v59 = vmul.f32 0.03125, %v2741_v40 }
 0x48b   :  { %v4558_v9 = vpop.eup %4557  ;;  %v2897_v7 = vmul.f32 %v6116_v25, %v2877_v45  ;;  %v2784_v5 = vmul.f32 %v2688_v36, %v2688_v36  ;;  %v2832_v35 = vsub.f32 %v5993_v34, %v2688_v36 }
 0x48c   :  { %4211 = vmatprep.mubr.msk.f32.mxu1 %vm74_vm0, %v2930_v11  ;;  %v2738_v60 = vpop.xlane.xlu0 %2737  ;;  %v2876_v3 = vmul.f32 %v4558_v9, %v2828_v0  ;;  %v2801_v63 = vsub.f32 %v2769_v59, %v2785_v14 }
 0x48d   :  { %v2768_v52 = vmul.f32 0.03125, %v2738_v60  ;;  %4212 = vmatmul.mubr.msk.f32.gmra.mxu1 %vm74_vm0, %v2931_v58  ;;  %v2917_v54 = vadd.f32 %v6128_v50, %v2897_v7 }
 0x48e   :  { %v2896_v44 = vmul.f32 %v6116_v25, %v2876_v3  ;;  %v2817_v23 = vmax.f32 %v2801_v63, 0.0 }
 0x48f   :  { %v2800_v12 = vsub.f32 %v2768_v52, %v2784_v5  ;;  %v2933_v17 = vmax.f32 %v2917_v54, 0.0 }
 0x490   :  { %v2916_v19 = vadd.f32 %v6128_v50, %v2896_v44  ;;  %v4560_v27 = vpop.eup %4559  ;;  %v2849_v2 = vadd.f32 1e-05, %v2817_v23 }
 0x491   :  { %v2816_v51 = vmax.f32 %v2800_v12, 0.0  ;;  %v2879_v47 = vmul.f32 %v4560_v27, %v2831_v1 }
 0x492   :  { %v2932_v31 = vmax.f32 %v2916_v19, 0.0  ;;  %4563 = vrsqrt.f32 %v2849_v2 }
 0x493   :  { %v4562_v4 = vpop.eup %4561  ;;  %v2848_v43 = vadd.f32 1e-05, %v2816_v51  ;;  %v2899_v38 = vmul.f32 %v6116_v25, %v2879_v47 }
 0x494   :  { %4214 = vmatprep.mubr.msk.f32.mxu1 %vm74_vm0, %v2932_v31  ;;  %v2878_v18 = vmul.f32 %v4562_v4, %v2830_v15 }
 0x495   :  { %4565 = vrsqrt.f32 %v2848_v43  ;;  %4215 = vmatmul.mubr.msk.f32.gmra.mxu1 %vm74_vm0, %v2933_v17  ;;  %v2919_v61 = vadd.f32 %v6128_v50, %v2899_v38 }
 0x496   :  { %v2898_v56 = vmul.f32 %v6116_v25, %v2878_v18 }
 0x497   :  { %v2935_v16 = vmax.f32 %v2919_v61, 0.0 }
 0x498   :  { %v2918_v62 = vadd.f32 %v6128_v50, %v2898_v56 }
 0x49a   :  { %v2934_v26 = vmax.f32 %v2918_v62, 0.0 }
 0x49c   :  { %4217 = vmatprep.mubr.msk.f32.mxu1 %vm74_vm0, %v2934_v26 }
 0x49d   :  { %4218 = vmatmul.mubr.msk.f32.gmra.mxu1 %vm74_vm0, %v2935_v16 }
 0x49f   :  { %v4564_v39 = vpop.eup %4563 }
 0x4a0   :  { %v2881_v42 = vmul.f32 %v4564_v39, %v2833_v53 }
 0x4a2   :  { %v4566_v0 = vpop.eup %4565  ;;  %v2901_v11 = vmul.f32 %v6116_v25, %v2881_v42 }
 0x4a3   :  { %v2880_v40 = vmul.f32 %v4566_v0, %v2832_v35 }
 0x4a4   :  { %v2921_v9 = vadd.f32 %v6128_v50, %v2901_v11 }
 0x4a5   :  { %v2900_v45 = vmul.f32 %v6116_v25, %v2880_v40 }
 0x4a6   :  { %v2937_v58 = vmax.f32 %v2921_v9, 0.0 }
 0x4a7   :  { %v2920_v14 = vadd.f32 %v6128_v50, %v2900_v45 }
 0x4a9   :  { %v2936_v59 = vmax.f32 %v2920_v14, 0.0 }
 0x4ab   :  { %4220 = vmatprep.mubr.msk.f32.mxu1 %vm74_vm0, %v2936_v59 }
 0x4ac   :  { %4221 = vmatmul.mubr.msk.f32.gmra.mxu1 %vm74_vm0, %v2937_v58 }
 0x4ad   :  { %v2667_v41 = vpop.xlane.xlu1 %2666 }
 0x4ae   :  { %v2691_v60 = vmul.f32 0.03125, %v2667_v41 }
 0x4b0   :  { %v2664_v36 = vpop.xlane.xlu0 %2663  ;;  %v2787_v5 = vmul.f32 %v2691_v60, %v2691_v60  ;;  %v2835_v51 = vsub.f32 %v6024_v21, %v2691_v60 }
 0x4b1   :  { %v2690_v3 = vmul.f32 0.03125, %v2664_v36  ;;  %v2747_v7 = vpop.xlane.xlu1 %2746 }
 0x4b2   :  { %v2771_v63 = vmul.f32 0.03125, %v2747_v7 }
 0x4b3   :  { %v2786_v44 = vmul.f32 %v2690_v3, %v2690_v3  ;;  %v2834_v31 = vsub.f32 %v6029_v32, %v2690_v3 }
 0x4b4   :  { %v2744_v52 = vpop.xlane.xlu0 %2743  ;;  %v2803_v23 = vsub.f32 %v2771_v63, %v2787_v5 }
 0x4b5   :  { %v2770_v12 = vmul.f32 0.03125, %v2744_v52 }
 0x4b6   :  { %v2819_v54 = vmax.f32 %v2803_v23, 0.0 }
 0x4b7   :  { %v2802_v1 = vsub.f32 %v2770_v12, %v2786_v44 }
 0x4b8   :  { %v2851_v19 = vadd.f32 1e-05, %v2819_v54 }
 0x4b9   :  { %v2818_v27 = vmax.f32 %v2802_v1, 0.0 }
 0x4ba   :  { %4567 = vrsqrt.f32 %v2851_v19 }
 0x4bb   :  { %v2850_v2 = vadd.f32 1e-05, %v2818_v27 }
 0x4bd   :  { %4569 = vrsqrt.f32 %v2850_v2 }
 0x4c7   :  { %v4568_v15 = vpop.eup %4567 }
 0x4c8   :  { %v2883_v47 = vmul.f32 %v4568_v15, %v2835_v51 }
 0x4ca   :  { %v4570_v4 = vpop.eup %4569  ;;  %v2903_v17 = vmul.f32 %v6116_v25, %v2883_v47 }
 0x4cb   :  { %v2882_v43 = vmul.f32 %v4570_v4, %v2834_v31 }
 0x4cc   :  { %v2923_v38 = vadd.f32 %v6128_v50, %v2903_v17 }
 0x4cd   :  { %v2902_v18 = vmul.f32 %v6116_v25, %v2882_v43 }
 0x4ce   :  { %v2939_v62 = vmax.f32 %v2923_v38, 0.0 }
 0x4cf   :  { %v2922_v56 = vadd.f32 %v6128_v50, %v2902_v18 }
 0x4d1   :  { %v2938_v61 = vmax.f32 %v2922_v56, 0.0 }
 0x4d3   :  { %4223 = vmatprep.mubr.msk.f32.mxu1 %vm74_vm0, %v2938_v61 }
 0x4d4   :  { %4224 = vmatmul.mubr.msk.f32.gmra.mxu1 %vm74_vm0, %v2939_v62 }
 0x4d5   :  { %v2673_v26 = vpop.xlane.xlu1 %2672 }
 0x4d6   :  { %v2693_v16 = vmul.f32 0.03125, %v2673_v26 }
 0x4d8   :  { %v2670_v53 = vpop.xlane.xlu0 %2669  ;;  %v2789_v42 = vmul.f32 %v2693_v16, %v2693_v16  ;;  %v2837_v36 = vsub.f32 %v6048_v20, %v2693_v16 }
 0x4d9   :  { %v2692_v39 = vmul.f32 0.03125, %v2670_v53  ;;  %v2753_v35 = vpop.xlane.xlu1 %2752 }
 0x4da   :  { %v2773_v0 = vmul.f32 0.03125, %v2753_v35 }
 0x4db   :  { %v2788_v11 = vmul.f32 %v2692_v39, %v2692_v39  ;;  %v2836_v7 = vsub.f32 %v6053_v55, %v2692_v39 }
 0x4dc   :  { %v2750_v40 = vpop.xlane.xlu0 %2749  ;;  %v2805_v45 = vsub.f32 %v2773_v0, %v2789_v42 }
 0x4dd   :  { %v2772_v9 = vmul.f32 0.03125, %v2750_v40 }
 0x4de   :  { %v2821_v14 = vmax.f32 %v2805_v45, 0.0 }
 0x4df   :  { %v2804_v59 = vsub.f32 %v2772_v9, %v2788_v11 }
 0x4e0   :  { %v2853_v58 = vadd.f32 1e-05, %v2821_v14 }
 0x4e1   :  { %v2820_v41 = vmax.f32 %v2804_v59, 0.0 }
 0x4e2   :  { %4571 = vrsqrt.f32 %v2853_v58 }
 0x4e3   :  { %v2852_v60 = vadd.f32 1e-05, %v2820_v41 }
 0x4e5   :  { %4573 = vrsqrt.f32 %v2852_v60 }
 0x4ef   :  { %v4572_v3 = vpop.eup %4571 }
 0x4f0   :  { %v2885_v5 = vmul.f32 %v4572_v3, %v2837_v36 }
 0x4f2   :  { %v4574_v63 = vpop.eup %4573  ;;  %v2905_v44 = vmul.f32 %v6116_v25, %v2885_v5 }
 0x4f3   :  { %v2884_v52 = vmul.f32 %v4574_v63, %v2836_v7 }
 0x4f4   :  { %v2925_v12 = vadd.f32 %v6128_v50, %v2905_v44 }
 0x4f5   :  { %v2904_v23 = vmul.f32 %v6116_v25, %v2884_v52 }
 0x4f6   :  { %v2941_v19 = vmax.f32 %v2925_v12, 0.0 }
 0x4f7   :  { %v2924_v54 = vadd.f32 %v6128_v50, %v2904_v23 }
 0x4f9   :  { %v2940_v1 = vmax.f32 %v2924_v54, 0.0 }
 0x4fb   :  { %4226 = vmatprep.mubr.msk.f32.mxu1 %vm74_vm0, %v2940_v1 }
 0x4fc   :  { %4227 = vmatmul.mubr.msk.f32.gmra.mxu1 %vm74_vm0, %v2941_v19 }
 0x4fd   :  { %v2679_v27 = vpop.xlane.xlu1 %2678 }
 0x4fe   :  { %v2695_v2 = vmul.f32 0.03125, %v2679_v27 }
 0x500   :  { %v2676_v51 = vpop.xlane.xlu0 %2675  ;;  %v2791_v47 = vmul.f32 %v2695_v2, %v2695_v2  ;;  %v2839_v53 = vsub.f32 %v6092_v33, %v2695_v2 }
 0x501   :  { %v2694_v15 = vmul.f32 0.03125, %v2676_v51  ;;  %v2759_v31 = vpop.xlane.xlu1 %2758 }
 0x502   :  { %v2775_v4 = vmul.f32 0.03125, %v2759_v31 }
 0x503   :  { %v2790_v17 = vmul.f32 %v2694_v15, %v2694_v15  ;;  %v2838_v35 = vsub.f32 %v6101_v37, %v2694_v15 }
 0x504   :  { %v2756_v43 = vpop.xlane.xlu0 %2755  ;;  %v2807_v18 = vsub.f32 %v2775_v4, %v2791_v47 }
 0x505   :  { %v2774_v38 = vmul.f32 0.03125, %v2756_v43 }
 0x506   :  { %v2823_v56 = vmax.f32 %v2807_v18, 0.0 }
 0x507   :  { %v2806_v61 = vsub.f32 %v2774_v38, %v2790_v17 }
 0x508   :  { %v2855_v62 = vadd.f32 1e-05, %v2823_v56 }
 0x509   :  { %v2822_v26 = vmax.f32 %v2806_v61, 0.0 }
 0x50a   :  { %4575 = vrsqrt.f32 %v2855_v62 }
 0x50b   :  { %v2854_v16 = vadd.f32 1e-05, %v2822_v26 }
 0x50d   :  { %4577 = vrsqrt.f32 %v2854_v16 }
 0x517   :  { %v4576_v39 = vpop.eup %4575 }
 0x518   :  { %v2887_v42 = vmul.f32 %v4576_v39, %v2839_v53  ;;  %v3462_v53 = vld [vmem:[%s6539_s8 + $0x38] sm:$0xff]  ;;  %v3461_v39 = vld [vmem:[%s6539_s8 + $0x30] sm:$0xff] }
 0x519   :  { %4232 = vmatprep.subr.mxu0 %v3462_v53  ;;  %4272 = vmatprep.subr.mxu1 %v3462_v53 }
 0x51a   :  { %v4578_v0 = vpop.eup %4577  ;;  %v2907_v11 = vmul.f32 %v6116_v25, %v2887_v42  ;;  %4233 = vmatpush3.msra.mxu0 %v3462_v53  ;;  %4280 = vmatpush3.msra.mxu1 %v3462_v53 }
 0x51b   :  { %v2886_v40 = vmul.f32 %v4578_v0, %v2838_v35  ;;  %4234 = vmatprep.subr.mxu0 %v3461_v39  ;;  %4273 = vmatprep.subr.mxu1 %v3461_v39  ;;  %v3460_v35 = vld [vmem:[%s6539_s8 + $0x28] sm:$0xff] }
 0x51c   :  { %v2927_v9 = vadd.f32 %v6128_v50, %v2907_v11  ;;  %4235 = vmatpush3.msra.mxu0 %v3461_v39  ;;  %4281 = vmatpush3.msra.mxu1 %v3461_v39  ;;  %v3459_v11 = vld [vmem:[%s6539_s8 + $0x20] sm:$0xff] }
 0x51d   :  { %v2906_v45 = vmul.f32 %v6116_v25, %v2886_v40  ;;  %4236 = vmatprep.subr.mxu0 %v3460_v35  ;;  %4274 = vmatprep.subr.mxu1 %v3460_v35 }
 0x51e   :  { %v2943_v58 = vmax.f32 %v2927_v9, 0.0  ;;  %4237 = vmatpush3.msra.mxu0 %v3460_v35  ;;  %4282 = vmatpush3.msra.mxu1 %v3460_v35 }
 0x51f   :  { %v2926_v14 = vadd.f32 %v6128_v50, %v2906_v45  ;;  %4238 = vmatprep.subr.mxu0 %v3459_v11  ;;  %4275 = vmatprep.subr.mxu1 %v3459_v11 }
 0x520   :  { %4239 = vmatpush3.msra.mxu0 %v3459_v11  ;;  %4283 = vmatpush3.msra.mxu1 %v3459_v11 }
 0x521   :  { %v2942_v59 = vmax.f32 %v2926_v14, 0.0 }
 0x523   :  { %4229 = vmatprep.mubr.msk.f32.mxu1 %vm74_vm0, %v2942_v59  ;;  %v3458_v59 = vld [vmem:[%s6539_s8 + $0x18] sm:$0xff] }
 0x524   :  { %4230 = vmatmul.mubr.msk.f32.gmra.mxu1 %vm74_vm0, %v2943_v58  ;;  %4240 = vmatprep.subr.mxu0 %v3458_v59 }
 0x525   :  { %4241 = vmatpush3.msra.mxu0 %v3458_v59  ;;  %4276 = vmatprep.subr.mxu1 %v3458_v59 }
 0x526   :  { %4284 = vmatpush3.msra.mxu1 %v3458_v59 }
 0x545   :  { %v6200_v41 = vpop.f32.mrf.mxu1 }
 0x546   :  { %v3208_v60 = vmul.f32 %v6200_v41, %v6200_v41  ;;  %v3145_v36 = vsel %vm3141_vm1, %v6200_v41, 0.0 }
 0x547   :  { %3146 = vadd.xlane.f32.xlu1 %v3145_v36  ;;  %v6206_v25 = vpop.f32.mrf.mxu1 }
 0x548   :  { %v3207_v50 = vmul.f32 %v6206_v25, %v6206_v25  ;;  %v3142_v3 = vsel %vm3141_vm1, %v6206_v25, 0.0  ;;  %v3226_v7 = vsel %vm3141_vm1, %v3208_v60, 0.0  ;;  %v3457_v60 = vld [vmem:[%s6539_s8 + $0x10] sm:$0xff] }
 0x549   :  { %3143 = vadd.xlane.f32.xlu0 %v3142_v3  ;;  %4242 = vmatprep.subr.mxu0 %v3457_v60  ;;  %v3455_v3 = vld [vmem:[%s6539_s8] sm:$0xff] }
 0x54a   :  { %v3223_v5 = vsel %vm3141_vm1, %v3207_v50, 0.0  ;;  %4243 = vmatpush3.msra.mxu0 %v3457_v60  ;;  %v3456_v50 = vld [vmem:[%s6539_s8 + $0x8] sm:$0xff]  ;;  %4277 = vmatprep.subr.mxu1 %v3457_v60 }
 0x54b   :  { %3227 = vadd.xlane.f32.xlu1 %v3226_v7  ;;  %4244 = vmatprep.subr.mxu0 %v3456_v50 }
 0x54c   :  { %4245 = vmatpush3.msra.mxu0 %v3456_v50  ;;  %4285 = vmatpush3.msra.mxu1 %v3457_v60 }
 0x54d   :  { %3224 = vadd.xlane.f32.xlu0 %v3223_v5  ;;  %v6214_v63 = vpop.f32.mrf.mxu1  ;;  %4246 = vmatprep.subr.mxu0 %v3455_v3 }
 0x54e   :  { %v3210_v52 = vmul.f32 %v6214_v63, %v6214_v63  ;;  %v3151_v44 = vsel %vm3141_vm1, %v6214_v63, 0.0  ;;  %4247 = vmatpush3.msra.mxu0 %v3455_v3  ;;  %4278 = vmatprep.subr.mxu1 %v3456_v50 }
 0x54f   :  { %3152 = vadd.xlane.f32.xlu1 %v3151_v44  ;;  %v6220_v23 = vpop.f32.mrf.mxu1  ;;  %4286 = vmatpush3.msra.mxu1 %v3456_v50 }
 0x550   :  { %v3209_v12 = vmul.f32 %v6220_v23, %v6220_v23  ;;  %v3148_v54 = vsel %vm3141_vm1, %v6220_v23, 0.0  ;;  %v3232_v1 = vsel %vm3141_vm1, %v3210_v52, 0.0  ;;  %4279 = vmatprep.subr.mxu1 %v3455_v3 }
 0x551   :  { %3149 = vadd.xlane.f32.xlu0 %v3148_v54  ;;  %4287 = vmatpush3.msra.mxu1 %v3455_v3 }
 0x552   :  { %v3229_v19 = vsel %vm3141_vm1, %v3209_v12, 0.0 }
 0x553   :  { %3233 = vadd.xlane.f32.xlu1 %v3232_v1 }
 0x555   :  { %3230 = vadd.xlane.f32.xlu0 %v3229_v19  ;;  %v6228_v27 = vpop.f32.mrf.mxu1 }
 0x556   :  { %v3212_v2 = vmul.f32 %v6228_v27, %v6228_v27  ;;  %v3157_v51 = vsel %vm3141_vm1, %v6228_v27, 0.0 }
 0x557   :  { %3158 = vadd.xlane.f32.xlu1 %v3157_v51  ;;  %v6234_v15 = vpop.f32.mrf.mxu1 }
 0x558   :  { %v3211_v31 = vmul.f32 %v6234_v15, %v6234_v15  ;;  %v3154_v47 = vsel %vm3141_vm1, %v6234_v15, 0.0  ;;  %v3238_v4 = vsel %vm3141_vm1, %v3212_v2, 0.0 }
 0x559   :  { %3155 = vadd.xlane.f32.xlu0 %v3154_v47 }
 0x55a   :  { %v3235_v43 = vsel %vm3141_vm1, %v3211_v31, 0.0 }
 0x55b   :  { %3239 = vadd.xlane.f32.xlu1 %v3238_v4 }
 0x55d   :  { %3236 = vadd.xlane.f32.xlu0 %v3235_v43  ;;  %v6242_v17 = vpop.f32.mrf.mxu1 }
 0x55e   :  { %v3214_v18 = vmul.f32 %v6242_v17, %v6242_v17  ;;  %v3163_v38 = vsel %vm3141_vm1, %v6242_v17, 0.0 }
 0x55f   :  { %3164 = vadd.xlane.f32.xlu1 %v3163_v38  ;;  %v6248_v56 = vpop.f32.mrf.mxu1 }
 0x560   :  { %v3213_v61 = vmul.f32 %v6248_v56, %v6248_v56  ;;  %v3160_v62 = vsel %vm3141_vm1, %v6248_v56, 0.0  ;;  %v3244_v26 = vsel %vm3141_vm1, %v3214_v18, 0.0 }
 0x561   :  { %3161 = vadd.xlane.f32.xlu0 %v3160_v62 }
 0x562   :  { %v3241_v16 = vsel %vm3141_vm1, %v3213_v61, 0.0 }
 0x563   :  { %3245 = vadd.xlane.f32.xlu1 %v3244_v26 }
 0x565   :  { %3242 = vadd.xlane.f32.xlu0 %v3241_v16 }
 0x56c   :  { %v6265_v42 = vpop.f32.mrf.mxu1 }
 0x56d   :  { %v3216_v0 = vmul.f32 %v6265_v42, %v6265_v42  ;;  %v3169_v40 = vsel %vm3141_vm1, %v6265_v42, 0.0 }
 0x56e   :  { %3170 = vadd.xlane.f32.xlu1 %v3169_v40  ;;  %v6274_v45 = vpop.f32.mrf.mxu1 }
 0x56f   :  { %v3215_v9 = vmul.f32 %v6274_v45, %v6274_v45  ;;  %v3166_v14 = vsel %vm3141_vm1, %v6274_v45, 0.0  ;;  %v3250_v58 = vsel %vm3141_vm1, %v3216_v0, 0.0 }
 0x570   :  { %3167 = vadd.xlane.f32.xlu0 %v3166_v14 }
 0x571   :  { %v3247_v36 = vsel %vm3141_vm1, %v3215_v9, 0.0 }
 0x572   :  { %3251 = vadd.xlane.f32.xlu1 %v3250_v58 }
 0x574   :  { %3248 = vadd.xlane.f32.xlu0 %v3247_v36 }
 0x594   :  { %v6294_v7 = vpop.f32.mrf.mxu1 }
 0x595   :  { %v3218_v5 = vmul.f32 %v6294_v7, %v6294_v7  ;;  %v3175_v52 = vsel %vm3141_vm1, %v6294_v7, 0.0 }
 0x596   :  { %3176 = vadd.xlane.f32.xlu1 %v3175_v52  ;;  %v6300_v44 = vpop.f32.mrf.mxu1 }
 0x597   :  { %v3217_v12 = vmul.f32 %v6300_v44, %v6300_v44  ;;  %v3172_v54 = vsel %vm3141_vm1, %v6300_v44, 0.0  ;;  %v3256_v1 = vsel %vm3141_vm1, %v3218_v5, 0.0 }
 0x598   :  { %3173 = vadd.xlane.f32.xlu0 %v3172_v54 }
 0x599   :  { %v3253_v19 = vsel %vm3141_vm1, %v3217_v12, 0.0 }
 0x59a   :  { %3257 = vadd.xlane.f32.xlu1 %v3256_v1 }
 0x59c   :  { %3254 = vadd.xlane.f32.xlu0 %v3253_v19 }
 0x5bc   :  { %v6308_v2 = vpop.f32.mrf.mxu1 }
 0x5bd   :  { %v3181_v51 = vsel %vm3141_vm1, %v6308_v2, 0.0  ;;  %v3220_v43 = vmul.f32 %v6308_v2, %v6308_v2 }
 0x5be   :  { %3182 = vadd.xlane.f32.xlu0 %v3181_v51  ;;  %v6312_v31 = vpop.f32.mrf.mxu1 }
 0x5bf   :  { %v3219_v47 = vmul.f32 %v6312_v31, %v6312_v31  ;;  %v3178_v4 = vsel %vm3141_vm1, %v6312_v31, 0.0  ;;  %v3262_v38 = vsel %vm3141_vm1, %v3220_v43, 0.0 }
 0x5c1   :  { %v3259_v18 = vsel %vm3141_vm1, %v3219_v47, 0.0 }
 0x5c2   :  { %3179 = vadd.xlane.f32.xlu0 %v3178_v4 }
 0x5c6   :  { %3260 = vadd.xlane.f32.xlu0 %v3259_v18 }
 0x5ca   :  { %3263 = vadd.xlane.f32.xlu0 %v3262_v38 }
 0x5d0   :  { %v3147_v61 = vpop.xlane.xlu1 %3146 }
 0x5d1   :  { %v6322_v62 = vmul.f32 0.015625, %v3147_v61 }
 0x5d2   :  { %v3144_v26 = vpop.xlane.xlu0 %3143 }
 0x5d3   :  { %v6324_v16 = vmul.f32 0.015625, %v3144_v26  ;;  %v3288_v39 = vmul.f32 %v6322_v62, %v6322_v62 }
 0x5d4   :  { %v3228_v53 = vpop.xlane.xlu1 %3227 }
 0x5d5   :  { %v3272_v35 = vmul.f32 0.015625, %v3228_v53  ;;  %v3287_v40 = vmul.f32 %v6324_v16, %v6324_v16 }
 0x5d6   :  { %v3225_v0 = vpop.xlane.xlu0 %3224 }
 0x5d7   :  { %v3304_v11 = vsub.f32 %v3272_v35, %v3288_v39  ;;  %v3271_v9 = vmul.f32 0.015625, %v3225_v0 }
 0x5d8   :  { %v3153_v14 = vpop.xlane.xlu1 %3152 }
 0x5d9   :  { %v3320_v59 = vmax.f32 %v3304_v11, 0.0  ;;  %v3303_v58 = vsub.f32 %v3271_v9, %v3287_v40  ;;  %v6330_v60 = vmul.f32 0.015625, %v3153_v14 }
 0x5da   :  { %v3150_v36 = vpop.xlane.xlu0 %3149 }
 0x5db   :  { %v3352_v50 = vadd.f32 1e-05, %v3320_v59  ;;  %v3319_v3 = vmax.f32 %v3303_v58, 0.0  ;;  %v6332_v5 = vmul.f32 0.015625, %v3150_v36  ;;  %v3290_v54 = vmul.f32 %v6330_v60, %v6330_v60 }
 0x5dc   :  { %v3234_v52 = vpop.xlane.xlu1 %3233 }
 0x5dd   :  { %4579 = vrsqrt.f32 %v3352_v50  ;;  %v3351_v12 = vadd.f32 1e-05, %v3319_v3  ;;  %v3274_v1 = vmul.f32 0.015625, %v3234_v52  ;;  %v3289_v51 = vmul.f32 %v6332_v5, %v6332_v5 }
 0x5de   :  { %v3231_v19 = vpop.xlane.xlu0 %3230 }
 0x5df   :  { %4581 = vrsqrt.f32 %v3351_v12  ;;  %v3306_v47 = vsub.f32 %v3274_v1, %v3290_v54  ;;  %v3273_v4 = vmul.f32 0.015625, %v3231_v19  ;;  %v48_v12 = vld [vmem:[%s6534_s3] sm:$0x3]  ;;  %v3336_v1 = vsub.f32 %v6200_v41, %v6322_v62 }
 0x5e0   :  { %v3159_v43 = vpop.xlane.xlu1 %3158 }
 0x5e1   :  { %v3322_v18 = vmax.f32 %v3306_v47, 0.0  ;;  %v3305_v38 = vsub.f32 %v3273_v4, %v3289_v51  ;;  %v6338_v61 = vmul.f32 0.015625, %v3159_v43 }
 0x5e2   :  { %v3156_v26 = vpop.xlane.xlu0 %3155 }
 0x5e3   :  { %v3354_v53 = vadd.f32 1e-05, %v3322_v18  ;;  %v3321_v39 = vmax.f32 %v3305_v38, 0.0  ;;  %v6340_v35 = vmul.f32 0.015625, %v3156_v26  ;;  %v3292_v11 = vmul.f32 %v6338_v61, %v6338_v61 }
 0x5e4   :  { %v3240_v0 = vpop.xlane.xlu1 %3239  ;;  %v6344_v14 = vpop.f32.mrf.mxu1  ;;  %v6364_v26 = vrot.slane %v48_v12, %v4836_v30 }
 0x5e5   :  { %4583 = vrsqrt.f32 %v3354_v53  ;;  %v3353_v40 = vadd.f32 1e-05, %v3321_v39  ;;  %v3276_v9 = vmul.f32 0.015625, %v3240_v0  ;;  %v3187_v59 = vsel %vm3141_vm1, %v6344_v14, 0.0 }
 0x5e6   :  { %v3237_v58 = vpop.xlane.xlu0 %3236  ;;  %v3291_v36 = vmul.f32 %v6340_v35, %v6340_v35  ;;  %3188 = vadd.xlane.f32.xlu1 %v3187_v59  ;;  %v6350_v3 = vpop.f32.mrf.mxu1  ;;  %v3335_v53 = vsub.f32 %v6206_v25, %v6324_v16  ;;  %v6373_v59 = vrot.slane %v48_v12, %v5137_v10  ;;  %v3222_v25 = vmul.f32 %v6344_v14, %v6344_v14 }
 0x5e7   :  { %4585 = vrsqrt.f32 %v3353_v40  ;;  %v3308_v50 = vsub.f32 %v3276_v9, %v3292_v11  ;;  %v3275_v52 = vmul.f32 0.015625, %v3237_v58  ;;  %v3221_v43 = vmul.f32 %v6350_v3, %v6350_v3 }
 0x5e8   :  { %v3165_v54 = vpop.xlane.xlu1 %3164  ;;  %v3184_v18 = vsel %vm3141_vm1, %v6350_v3, 0.0 }
 0x5e9   :  { %v3324_v19 = vmax.f32 %v3308_v50, 0.0  ;;  %v3307_v51 = vsub.f32 %v3275_v52, %v3291_v36  ;;  %v6357_v47 = vmul.f32 0.015625, %v3165_v54  ;;  %v3265_v50 = vsel %vm3141_vm1, %v3221_v43, 0.0 }
 0x5ea   :  { %v4580_v4 = vpop.eup %4579  ;;  %v3162_v38 = vpop.xlane.xlu0 %3161  ;;  %3185 = vadd.xlane.f32.xlu1 %v3184_v18  ;;  %v3337_v43 = vsub.f32 %v6220_v23, %v6332_v5 }
 0x5eb   :  { %v3384_v39 = vmul.f32 %v4580_v4, %v3336_v1  ;;  %v3356_v41 = vadd.f32 1e-05, %v3324_v19  ;;  %v3323_v62 = vmax.f32 %v3307_v51, 0.0  ;;  %v3294_v40 = vmul.f32 %v6357_v47, %v6357_v47 }
 0x5ec   :  { %v4582_v0 = vpop.eup %4581  ;;  %v6370_v11 = vmul.f32 0.015625, %v3162_v38  ;;  %v3246_v9 = vpop.xlane.xlu1 %3245  ;;  %v3338_v51 = vsub.f32 %v6214_v63, %v6330_v60 }
 0x5ed   :  { %4587 = vrsqrt.f32 %v3356_v41  ;;  %v3355_v30 = vadd.f32 1e-05, %v3323_v62  ;;  %v3278_v58 = vmul.f32 0.015625, %v3246_v9  ;;  %v3383_v36 = vmul.f32 %v4582_v0, %v3335_v53 }
 0x5ee   :  { %v3293_v16 = vmul.f32 %v6370_v11, %v6370_v11  ;;  %v3243_v52 = vpop.xlane.xlu0 %3242  ;;  %v3404_v54 = vmul.f32 %v6364_v26, %v3384_v39  ;;  %3266 = vadd.xlane.f32.xlu1 %v3265_v50  ;;  %v3268_v39 = vsel %vm3141_vm1, %v3222_v25, 0.0 }
 0x5ef   :  { %4589 = vrsqrt.f32 %v3355_v30  ;;  %v3310_v1 = vsub.f32 %v3278_v58, %v3294_v40  ;;  %v3277_v10 = vmul.f32 0.015625, %v3243_v52  ;;  %v3403_v12 = vmul.f32 %v6364_v26, %v3383_v36 }
 0x5f0   :  { %v3424_v19 = vadd.f32 %v6373_v59, %v3404_v54 }
 0x5f1   :  { %v3326_v4 = vmax.f32 %v3310_v1, 0.0  ;;  %v3309_v18 = vsub.f32 %v3277_v10, %v3293_v16  ;;  %v3423_v38 = vadd.f32 %v6373_v59, %v3403_v12  ;;  %v3340_v16 = vsub.f32 %v6228_v27, %v6338_v61 }
 0x5f2   :  { %v4584_v53 = vpop.eup %4583  ;;  %3269 = vadd.xlane.f32.xlu1 %v3268_v39  ;;  %v3440_v30 = vmax.f32 %v3424_v19, 0.0  ;;  %v3339_v10 = vsub.f32 %v6234_v15, %v6340_v35 }
 0x5f3   :  { %v3358_v41 = vadd.f32 1e-05, %v3326_v4  ;;  %v3325_v62 = vmax.f32 %v3309_v18, 0.0  ;;  %v3439_v0 = vmax.f32 %v3423_v38, 0.0  ;;  %v3386_v40 = vmul.f32 %v4584_v53, %v3338_v51 }
 0x5f4   :  { %v4586_v9 = vpop.eup %4585 }
 0x5f5   :  { %4591 = vrsqrt.f32 %v3358_v41  ;;  %v3357_v58 = vadd.f32 1e-05, %v3325_v62  ;;  %4248 = vmatprep.mubr.msk.f32.mxu0 %vm3141_vm1, %v3439_v0  ;;  %v3385_v63 = vmul.f32 %v4586_v9, %v3337_v43  ;;  %v3406_v60 = vmul.f32 %v6364_v26, %v3386_v40 }
 0x5f6   :  { %4249 = vmatmul.mubr.msk.f32.vlgmr.msra.gmra.mxu0 %vm3141_vm1, %v3440_v30  ;;  %v3342_v9 = vsub.f32 %v6242_v17, %v6357_v47 }
 0x5f7   :  { %4593 = vrsqrt.f32 %v3357_v58  ;;  %v3171_v23 = vpop.xlane.xlu1 %3170  ;;  %v3405_v5 = vmul.f32 %v6364_v26, %v3385_v63  ;;  %v3426_v25 = vadd.f32 %v6373_v59, %v3406_v60 }
 0x5f8   :  { %v3200_v36 = vmul.f32 0.015625, %v3171_v23  ;;  %v3341_v23 = vsub.f32 %v6248_v56, %v6370_v11 }
 0x5f9   :  { %v3168_v50 = vpop.xlane.xlu0 %3167  ;;  %v3425_v52 = vadd.f32 %v6373_v59, %v3405_v5  ;;  %v3442_v53 = vmax.f32 %v3426_v25, 0.0 }
 0x5fa   :  { %v4588_v54 = vpop.eup %4587  ;;  %v3199_v1 = vmul.f32 0.015625, %v3168_v50  ;;  %v3296_v18 = vmul.f32 %v3200_v36, %v3200_v36 }
 0x5fb   :  { %v3252_v12 = vpop.xlane.xlu1 %3251  ;;  %v3441_v19 = vmax.f32 %v3425_v52, 0.0  ;;  %v3388_v51 = vmul.f32 %v4588_v54, %v3340_v16 }
 0x5fc   :  { %v4590_v4 = vpop.eup %4589  ;;  %v3280_v38 = vmul.f32 0.015625, %v3252_v12  ;;  %v3295_v61 = vmul.f32 %v3199_v1, %v3199_v1 }
 0x5fd   :  { %4251 = vmatprep.mubr.msk.f32.mxu0 %vm3141_vm1, %v3441_v19  ;;  %v3249_v43 = vpop.xlane.xlu0 %3248  ;;  %v3387_v39 = vmul.f32 %v4590_v4, %v3339_v10  ;;  %v3408_v27 = vmul.f32 %v6364_v26, %v3388_v51  ;;  %v3344_v19 = vsub.f32 %v6265_v42, %v3200_v36  ;;  %v3343_v4 = vsub.f32 %v6274_v45, %v3199_v1 }
 0x5fe   :  { %v3312_v41 = vsub.f32 %v3280_v38, %v3296_v18  ;;  %v3279_v62 = vmul.f32 0.015625, %v3249_v43  ;;  %4252 = vmatmul.mubr.msk.f32.gmra.mxu0 %vm3141_vm1, %v3442_v53 }
 0x5ff   :  { %v3407_v15 = vmul.f32 %v6364_v26, %v3387_v39  ;;  %v3428_v40 = vadd.f32 %v6373_v59, %v3408_v27 }
 0x600   :  { %v3328_v35 = vmax.f32 %v3312_v41, 0.0  ;;  %v3311_v0 = vsub.f32 %v3279_v62, %v3295_v61 }
 0x601   :  { %v3427_v30 = vadd.f32 %v6373_v59, %v3407_v15  ;;  %v3444_v52 = vmax.f32 %v3428_v40, 0.0 }
 0x602   :  { %v4592_v58 = vpop.eup %4591  ;;  %v3360_v63 = vadd.f32 1e-05, %v3328_v35  ;;  %v3327_v60 = vmax.f32 %v3311_v0, 0.0 }
 0x603   :  { %v3443_v5 = vmax.f32 %v3427_v30, 0.0  ;;  %v3390_v25 = vmul.f32 %v4592_v58, %v3342_v9 }
 0x604   :  { %v4594_v16 = vpop.eup %4593  ;;  %4595 = vrsqrt.f32 %v3360_v63  ;;  %v3359_v50 = vadd.f32 1e-05, %v3327_v60 }
 0x605   :  { %4254 = vmatprep.mubr.msk.f32.mxu0 %vm3141_vm1, %v3443_v5  ;;  %v3389_v54 = vmul.f32 %v4594_v16, %v3341_v23  ;;  %v3410_v10 = vmul.f32 %v6364_v26, %v3390_v25 }
 0x606   :  { %4597 = vrsqrt.f32 %v3359_v50  ;;  %4255 = vmatmul.mubr.msk.f32.gmra.mxu0 %vm3141_vm1, %v3444_v52 }
 0x607   :  { %v3409_v17 = vmul.f32 %v6364_v26, %v3389_v54  ;;  %v3430_v47 = vadd.f32 %v6373_v59, %v3410_v10 }
 0x609   :  { %v3429_v56 = vadd.f32 %v6373_v59, %v3409_v17  ;;  %v3446_v12 = vmax.f32 %v3430_v47, 0.0 }
 0x60b   :  { %v3445_v11 = vmax.f32 %v3429_v56, 0.0 }
 0x60d   :  { %4257 = vmatprep.mubr.msk.f32.mxu0 %vm3141_vm1, %v3445_v11 }
 0x60e   :  { %4258 = vmatmul.mubr.msk.f32.gmra.mxu0 %vm3141_vm1, %v3446_v12 }
 0x611   :  { %v4596_v51 = vpop.eup %4595 }
 0x612   :  { %v3392_v18 = vmul.f32 %v4596_v51, %v3344_v19 }
 0x613   :  { %v4598_v38 = vpop.eup %4597 }
 0x614   :  { %v3391_v53 = vmul.f32 %v4598_v38, %v3343_v4  ;;  %v3412_v43 = vmul.f32 %v6364_v26, %v3392_v18 }
 0x616   :  { %v3411_v39 = vmul.f32 %v6364_v26, %v3391_v53  ;;  %v3432_v27 = vadd.f32 %v6373_v59, %v3412_v43 }
 0x618   :  { %v3431_v61 = vadd.f32 %v6373_v59, %v3411_v39  ;;  %v3448_v62 = vmax.f32 %v3432_v27, 0.0 }
 0x61a   :  { %v3447_v41 = vmax.f32 %v3431_v61, 0.0 }
 0x61c   :  { %4260 = vmatprep.mubr.msk.f32.mxu0 %vm3141_vm1, %v3447_v41 }
 0x61d   :  { %4261 = vmatmul.mubr.msk.f32.gmra.mxu0 %vm3141_vm1, %v3448_v62 }
 0x61f   :  { %v3177_v42 = vpop.xlane.xlu1 %3176 }
 0x620   :  { %v3202_v36 = vmul.f32 0.015625, %v3177_v42 }
 0x621   :  { %v3174_v45 = vpop.xlane.xlu0 %3173 }
 0x622   :  { %v3201_v1 = vmul.f32 0.015625, %v3174_v45  ;;  %v3298_v35 = vmul.f32 %v3202_v36, %v3202_v36  ;;  %v3346_v16 = vsub.f32 %v6294_v7, %v3202_v36 }
 0x623   :  { %v3258_v15 = vpop.xlane.xlu1 %3257 }
 0x624   :  { %v3282_v0 = vmul.f32 0.015625, %v3258_v15  ;;  %v3297_v9 = vmul.f32 %v3201_v1, %v3201_v1  ;;  %v3345_v52 = vsub.f32 %v6300_v44, %v3201_v1 }
 0x625   :  { %v3255_v40 = vpop.xlane.xlu0 %3254 }
 0x626   :  { %v3314_v30 = vsub.f32 %v3282_v0, %v3298_v35  ;;  %v3281_v58 = vmul.f32 0.015625, %v3255_v40 }
 0x628   :  { %v3330_v63 = vmax.f32 %v3314_v30, 0.0  ;;  %v3313_v60 = vsub.f32 %v3281_v58, %v3297_v9 }
 0x62a   :  { %v3362_v23 = vadd.f32 1e-05, %v3330_v63  ;;  %v3329_v5 = vmax.f32 %v3313_v60, 0.0 }
 0x62c   :  { %4599 = vrsqrt.f32 %v3362_v23  ;;  %v3361_v25 = vadd.f32 1e-05, %v3329_v5 }
 0x62e   :  { %4601 = vrsqrt.f32 %v3361_v25 }
 0x639   :  { %v4600_v50 = vpop.eup %4599 }
 0x63a   :  { %v3394_v54 = vmul.f32 %v4600_v50, %v3346_v16 }
 0x63b   :  { %v4602_v10 = vpop.eup %4601 }
 0x63c   :  { %v3393_v17 = vmul.f32 %v4602_v10, %v3345_v52  ;;  %v3414_v47 = vmul.f32 %v6364_v26, %v3394_v54 }
 0x63e   :  { %v3413_v56 = vmul.f32 %v6364_v26, %v3393_v17  ;;  %v3434_v11 = vadd.f32 %v6373_v59, %v3414_v47 }
 0x640   :  { %v3433_v12 = vadd.f32 %v6373_v59, %v3413_v56  ;;  %v3450_v51 = vmax.f32 %v3434_v11, 0.0 }
 0x642   :  { %v3449_v19 = vmax.f32 %v3433_v12, 0.0 }
 0x644   :  { %4263 = vmatprep.mubr.msk.f32.mxu0 %vm3141_vm1, %v3449_v19 }
 0x645   :  { %4264 = vmatmul.mubr.msk.f32.gmra.mxu0 %vm3141_vm1, %v3450_v51 }
 0x647   :  { %v3183_v7 = vpop.xlane.xlu0 %3182 }
 0x648   :  { %v3204_v38 = vmul.f32 0.015625, %v3183_v7 }
 0x64a   :  { %v3300_v61 = vmul.f32 %v3204_v38, %v3204_v38  ;;  %v3348_v40 = vsub.f32 %v6308_v2, %v3204_v38 }
 0x64b   :  { %v3180_v4 = vpop.xlane.xlu0 %3179 }
 0x64c   :  { %v3203_v44 = vmul.f32 0.015625, %v3180_v4 }
 0x64e   :  { %v3299_v53 = vmul.f32 %v3203_v44, %v3203_v44  ;;  %v3347_v15 = vsub.f32 %v6312_v31, %v3203_v44 }
 0x64f   :  { %v3261_v18 = vpop.xlane.xlu0 %3260 }
 0x650   :  { %v3283_v43 = vmul.f32 0.015625, %v3261_v18 }
 0x652   :  { %v3315_v39 = vsub.f32 %v3283_v43, %v3299_v53 }
 0x653   :  { %v3264_v27 = vpop.xlane.xlu0 %3263 }
 0x654   :  { %v3331_v41 = vmax.f32 %v3315_v39, 0.0  ;;  %v3284_v62 = vmul.f32 0.015625, %v3264_v27 }
 0x656   :  { %v3363_v42 = vadd.f32 1e-05, %v3331_v41  ;;  %v3316_v36 = vsub.f32 %v3284_v62, %v3300_v61 }
 0x658   :  { %4603 = vrsqrt.f32 %v3363_v42  ;;  %v3332_v45 = vmax.f32 %v3316_v36, 0.0 }
 0x65a   :  { %v3364_v1 = vadd.f32 1e-05, %v3332_v45 }
 0x65c   :  { %4605 = vrsqrt.f32 %v3364_v1 }
 0x665   :  { %v4604_v35 = vpop.eup %4603 }
 0x666   :  { %v3395_v0 = vmul.f32 %v4604_v35, %v3347_v15 }
 0x668   :  { %v3415_v9 = vmul.f32 %v6364_v26, %v3395_v0 }
 0x669   :  { %v4606_v30 = vpop.eup %4605 }
 0x66a   :  { %v3435_v58 = vadd.f32 %v6373_v59, %v3415_v9  ;;  %v3396_v63 = vmul.f32 %v4606_v30, %v3348_v40 }
 0x66c   :  { %v3451_v60 = vmax.f32 %v3435_v58, 0.0  ;;  %v3416_v23 = vmul.f32 %v6364_v26, %v3396_v63 }
 0x66e   :  { %4266 = vmatprep.mubr.msk.f32.mxu0 %vm3141_vm1, %v3451_v60  ;;  %v3436_v5 = vadd.f32 %v6373_v59, %v3416_v23 }
 0x66f   :  { %v3189_v25 = vpop.xlane.xlu1 %3188 }
 0x670   :  { %v3452_v16 = vmax.f32 %v3436_v5, 0.0  ;;  %v3206_v52 = vmul.f32 0.015625, %v3189_v25 }
 0x672   :  { %4267 = vmatmul.mubr.msk.f32.gmra.mxu0 %vm3141_vm1, %v3452_v16  ;;  %v3302_v56 = vmul.f32 %v3206_v52, %v3206_v52  ;;  %v3350_v53 = vsub.f32 %v6344_v14, %v3206_v52 }
 0x673   :  { %v3186_v31 = vpop.xlane.xlu1 %3185 }
 0x674   :  { %v3205_v50 = vmul.f32 0.015625, %v3186_v31 }
 0x676   :  { %v3301_v54 = vmul.f32 %v3205_v50, %v3205_v50  ;;  %v3349_v44 = vsub.f32 %v6350_v3, %v3205_v50  ;;  %v4628_v3 = vld [vmem:[#allocation7 + $0x8] sm:$0xf] }
 0x677   :  { %v3267_v2 = vpop.xlane.xlu1 %3266  ;;  %v3466_v14 = vrot.slane %v4628_v3, %v1601_v13 }
 0x678   :  { %v3285_v10 = vmul.f32 0.015625, %v3267_v2 }
 0x67a   :  { %v3317_v17 = vsub.f32 %v3285_v10, %v3301_v54 }
 0x67b   :  { %v3270_v47 = vpop.xlane.xlu1 %3269 }
 0x67c   :  { %v3333_v11 = vmax.f32 %v3317_v17, 0.0  ;;  %v3286_v12 = vmul.f32 0.015625, %v3270_v47 }
 0x67e   :  { %v3365_v19 = vadd.f32 1e-05, %v3333_v11  ;;  %v3318_v51 = vsub.f32 %v3286_v12, %v3302_v56 }
 0x680   :  { %4607 = vrsqrt.f32 %v3365_v19  ;;  %v3334_v7 = vmax.f32 %v3318_v51, 0.0 }
 0x682   :  { %v3366_v4 = vadd.f32 1e-05, %v3334_v7 }
 0x684   :  { %4609 = vrsqrt.f32 %v3366_v4 }
 0x68d   :  { %v4608_v18 = vpop.eup %4607 }
 0x68e   :  { %v3397_v38 = vmul.f32 %v4608_v18, %v3349_v44 }
 0x690   :  { %v3417_v43 = vmul.f32 %v6364_v26, %v3397_v38 }
 0x691   :  { %v4610_v39 = vpop.eup %4609 }
 0x692   :  { %v3398_v27 = vmul.f32 %v4610_v39, %v3350_v53  ;;  %v3437_v61 = vadd.f32 %v6373_v59, %v3417_v43 }
 0x694   :  { %v3418_v41 = vmul.f32 %v6364_v26, %v3398_v27  ;;  %v3453_v62 = vmax.f32 %v3437_v61, 0.0 }
 0x696   :  { %4269 = vmatprep.mubr.msk.f32.mxu1 %vm3141_vm1, %v3453_v62  ;;  %v3438_v42 = vadd.f32 %v6373_v59, %v3418_v41 }
 0x698   :  { %v3454_v36 = vmax.f32 %v3438_v42, 0.0 }
 0x69a   :  { %4270 = vmatmul.mubr.msk.f32.vlgmr.msra.gmra.mxu1 %vm3141_vm1, %v3454_v36 }
 0x6b6   :  { %v4250_v45 = vpop.f32.mrf.mxu0 }
 0x6b7   :  { %v3587_v1 = vadd.f32 %v4250_v45, %v3466_v14 }
 0x6b8   :  { %v3581_v15 = vpop.f32.mrf.mxu0 }
 0x6b9   :  { %v3661_v35 = vadd.f32 %v3587_v1, %v5886_v46  ;;  %v3582_v0 = vadd.f32 %v3581_v15, %v3466_v14 }
 0x6bb   :  { %3677 = vst.msk [vmem:[%s6540_s9 + $0x8] sm:$0xff] %vm74_vm0, %v3661_v35  ;;  %v3660_v26 = vadd.f32 %v3582_v0, %v5896_v28 }
 0x6bd   :  { %3676 = vst.msk [vmem:[%s6540_s9] sm:$0xff] %vm74_vm0, %v3660_v26 }
 0x6be   :  { %v4253_v29 = vpop.f32.mrf.mxu0 }
 0x6bf   :  { %v3597_v13 = vadd.f32 %v4253_v29, %v3466_v14 }
 0x6c0   :  { %v3591_v59 = vpop.f32.mrf.mxu0 }
 0x6c1   :  { %v3663_v40 = vadd.f32 %v3597_v13, %v5916_v49  ;;  %v3592_v9 = vadd.f32 %v3591_v59, %v3466_v14 }
 0x6c3   :  { %3679 = vst.msk [vmem:[%s6540_s9 + $0x18] sm:$0xff] %vm74_vm0, %v3663_v40  ;;  %v3662_v46 = vadd.f32 %v3592_v9, %v5920_v8 }
 0x6c5   :  { %3678 = vst.msk [vmem:[%s6540_s9 + $0x10] sm:$0xff] %vm74_vm0, %v3662_v46 }
 0x6c6   :  { %v4256_v28 = vpop.f32.mrf.mxu0 }
 0x6c7   :  { %v3607_v30 = vadd.f32 %v4256_v28, %v3466_v14 }
 0x6c8   :  { %v3601_v58 = vpop.f32.mrf.mxu0 }
 0x6c9   :  { %v3665_v63 = vadd.f32 %v3607_v30, %v5940_v48  ;;  %v3602_v60 = vadd.f32 %v3601_v58, %v3466_v14 }
 0x6cb   :  { %3681 = vst.msk [vmem:[%s6540_s9 + $0x28] sm:$0xff] %vm74_vm0, %v3665_v63  ;;  %v3664_v49 = vadd.f32 %v3602_v60, %v5944_v6 }
 0x6cd   :  { %3680 = vst.msk [vmem:[%s6540_s9 + $0x20] sm:$0xff] %vm74_vm0, %v3664_v49 }
 0x6ce   :  { %v4259_v8 = vpop.f32.mrf.mxu0 }
 0x6cf   :  { %v3617_v23 = vadd.f32 %v4259_v8, %v3466_v14 }
 0x6d0   :  { %v3611_v5 = vpop.f32.mrf.mxu0 }
 0x6d1   :  { %v3667_v25 = vadd.f32 %v3617_v23, %v5964_v57  ;;  %v3612_v16 = vadd.f32 %v3611_v5, %v3466_v14 }
 0x6d3   :  { %3683 = vst.msk [vmem:[%s6540_s9 + $0x38] sm:$0xff] %vm74_vm0, %v3667_v25  ;;  %v3666_v48 = vadd.f32 %v3612_v16, %v5967_v24 }
 0x6d5   :  { %3682 = vst.msk [vmem:[%s6540_s9 + $0x30] sm:$0xff] %vm74_vm0, %v3666_v48 }
 0x6dd   :  { %v4262_v6 = vpop.f32.mrf.mxu0 }
 0x6de   :  { %v3627_v31 = vadd.f32 %v4262_v6, %v3466_v14 }
 0x6df   :  { %v3621_v50 = vpop.f32.mrf.mxu0 }
 0x6e0   :  { %v3669_v2 = vadd.f32 %v3627_v31, %v5988_v22  ;;  %v3622_v52 = vadd.f32 %v3621_v50, %v3466_v14 }
 0x6e2   :  { %3685 = vst.msk [vmem:[%s6540_s9 + $0x48] sm:$0xff] %vm74_vm0, %v3669_v2  ;;  %v3668_v57 = vadd.f32 %v3622_v52, %v5993_v34 }
 0x6e4   :  { %3684 = vst.msk [vmem:[%s6540_s9 + $0x40] sm:$0xff] %vm74_vm0, %v3668_v57 }
 0x705   :  { %v4265_v24 = vpop.f32.mrf.mxu0 }
 0x706   :  { %v3637_v54 = vadd.f32 %v4265_v24, %v3466_v14 }
 0x707   :  { %v3631_v10 = vpop.f32.mrf.mxu0 }
 0x708   :  { %v3671_v17 = vadd.f32 %v3637_v54, %v6024_v21  ;;  %v3632_v47 = vadd.f32 %v3631_v10, %v3466_v14 }
 0x70a   :  { %3687 = vst.msk [vmem:[%s6540_s9 + $0x58] sm:$0xff] %vm74_vm0, %v3671_v17  ;;  %v3670_v22 = vadd.f32 %v3632_v47, %v6029_v32 }
 0x70c   :  { %3686 = vst.msk [vmem:[%s6540_s9 + $0x50] sm:$0xff] %vm74_vm0, %v3670_v22 }
 0x732   :  { %v4268_v34 = vpop.f32.mrf.mxu0 }
 0x733   :  { %v3647_v56 = vadd.f32 %v4268_v34, %v3466_v14 }
 0x734   :  { %v3641_v11 = vpop.f32.mrf.mxu0 }
 0x735   :  { %v3673_v12 = vadd.f32 %v3647_v56, %v6048_v20  ;;  %v3642_v19 = vadd.f32 %v3641_v11, %v3466_v14 }
 0x737   :  { %3689 = vst.msk [vmem:[%s6540_s9 + $0x68] sm:$0xff] %vm74_vm0, %v3673_v12  ;;  %v3672_v21 = vadd.f32 %v3642_v19, %v6053_v55 }
 0x739   :  { %3688 = vst.msk [vmem:[%s6540_s9 + $0x60] sm:$0xff] %vm74_vm0, %v3672_v21 }
 0x75a   :  { %v4271_v32 = vpop.f32.mrf.mxu1 }
 0x75b   :  { %v3657_v51 = vadd.f32 %v4271_v32, %v3466_v14 }
 0x75c   :  { %v3651_v7 = vpop.f32.mrf.mxu1 }
 0x75d   :  { %v3675_v4 = vadd.f32 %v3657_v51, %v6092_v33  ;;  %v3652_v44 = vadd.f32 %v3651_v7, %v3466_v14 }
 0x75f   :  { %3691 = vst.msk [vmem:[%s6540_s9 + $0x78] sm:$0xff] %vm74_vm0, %v3675_v4  ;;  %v3674_v20 = vadd.f32 %v3652_v44, %v6101_v37 }
 0x761   :  { %3690 = vst.msk [vmem:[%s6540_s9 + $0x70] sm:$0xff] %vm74_vm0, %v3674_v20 }
 0x762   :  { %3696 = vsyncpa [#allocation8], 1 }

</bundles_post_ra>
